<compile_context>
chip_gen: v7x
topology: tpu7x:2x2x1
jax: 0.10.0
libtpu: 0.0.40
codegen_flags: <defaults>
</compile_context>

<pallas_src>
import functools

import jax
import jax.numpy as jnp
import numpy as np
from jax.experimental import pallas as pl
from jax.experimental.pallas import tpu as pltpu


def resnet_layer_kernel(xp_ref, w_ref, mask_ref, o_ref, acc_ref, *, H, W, Wp, C, eps):
    """One grid step = one batch element.

    xp_ref  : (1, P, C)   reflect-padded activation, spatial flattened row-major
                          over (Hp, Wp), plus >=2 junk halo rows so every shifted
                          tap slice stays in bounds.  P = ceil8(Hp*Wp + 2).
    w_ref   : (9, C, C)   conv weight, slab t = (dy, dx) with t = dy*3 + dx,
                          layout (c_in, c_out).
    mask_ref: (L, 1)      1.0 where (row % Wp) < W, else 0.0  (valid spatial pos).
    o_ref   : (1, L, C)   conv+instancenorm+skip in padded-row coords, L = H*Wp.
    acc_ref : (L, C) f32  VMEM scratch accumulator for the 9 tap matmuls.
    """
    L = H * Wp

    # Fresh accumulator every grid step (scratch persists across steps).
    acc_ref[...] = jnp.zeros_like(acc_ref)

    # Load the padded block once and upcast once (no-op for f32 operands).  All
    # tap slices below are static sublane shifts of this f32 value, which avoids
    # unaligned slicing of packed (bf16) layouts.
    xp32 = xp_ref[0].astype(jnp.float32)                     # (P, C)

    # 3x3 conv as 9 accumulating matmuls with K = C.  Tap (dy, dx) of output row
    # p = h*Wp + w is the padded row p + dy*Wp + dx, so each tap is one shifted
    # length-L slice — no im2col materialization anywhere.
    for t in range(9):
        dy, dx = divmod(t, 3)
        off = dy * Wp + dx
        wt = w_ref[t]                                        # (C, C), operand dtype
        tap = xp32[off:off + L, :].astype(wt.dtype)          # (L, C)
        acc_ref[...] += jnp.dot(tap, wt, preferred_element_type=jnp.float32)

    y = acc_ref[...]                                         # (L, C) f32

    # InstanceNorm2d(affine=False): per-channel stats over the H*W valid
    # positions only (padded columns masked out).  Single pass, `centered`
    # computed once and reused; rsqrt goes to the EUP slot.
    valid = mask_ref[...]                                    # (L, 1) f32 {0,1}
    inv_count = jnp.float32(1.0 / (H * W))
    mean = jnp.sum(y * valid, axis=0, keepdims=True) * inv_count        # (1, C)
    centered = y - mean
    cz = centered * valid
    var = jnp.sum(cz * cz, axis=0, keepdims=True) * inv_count
    normed = centered * jax.lax.rsqrt(var + eps)

    # Skip connection: the center tap (dy=1, dx=1) equals x at every valid row.
    resid = xp32[Wp + 1:Wp + 1 + L, :]                       # (L, C) f32

    o_ref[0] = (resid + normed).astype(o_ref.dtype)


def resnet_layer(x_nchw, w_hwio, bias=None, *, eps=1e-5, operand_dtype=jnp.float32):
    """x_nchw: [N, C, H, W] float32 (PyTorch convention). Returns NCHW float32.

    `bias` is accepted for API parity with Conv2d(..., bias=True) but unused:
    InstanceNorm(affine=False) cancels any per-channel constant exactly.
    `operand_dtype` controls the wire/MXU dtype of activation+weights (f32 or
    bf16); accumulation and the output are always f32.
    """
    del bias
    N, C, H, W = x_nchw.shape
    Hp, Wp = H + 2, W + 2
    L = H * Wp                                   # output rows (padded-width coords)
    P = -(-(Hp * Wp + 2) // 8) * 8               # input rows incl. halo for (dy=2,dx=2)

    # Wrapper-side prep is only NHWC transpose + ReflectionPad2d(1) + flatten:
    # ~1.3x the activation bytes (vs. 9x for the old im2col path).
    x_nhwc = jnp.transpose(x_nchw, (0, 2, 3, 1))
    xp = jnp.pad(x_nhwc, ((0, 0), (1, 1), (1, 1), (0, 0)), mode="reflect")
    xp_flat = xp.reshape(N, Hp * Wp, C)
    xp_flat = jnp.pad(xp_flat, ((0, 0), (0, P - Hp * Wp), (0, 0)))  # junk halo rows
    xp_flat = xp_flat.astype(operand_dtype)

    # Weight: HWIO -> (9, Cin, Cout), slab t = (dy, dx).  Resident across grid.
    w_taps = w_hwio.reshape(9, C, C).astype(operand_dtype)

    # Valid-column mask over the flattened padded rows (compile-time constant).
    mask = jnp.asarray((np.arange(L) % Wp < W).astype(np.float32).reshape(L, 1))

    kernel = functools.partial(resnet_layer_kernel, H=H, W=W, Wp=Wp, C=C, eps=eps)

    out_flat = pl.pallas_call(
        kernel,
        out_shape=jax.ShapeDtypeStruct((N, L, C), jnp.float32),
        grid_spec=pltpu.PrefetchScalarGridSpec(
            num_scalar_prefetch=0,
            grid=(N,),
            in_specs=[
                pl.BlockSpec((1, P, C), lambda n: (n, 0, 0)),
                pl.BlockSpec((9, C, C), lambda n: (0, 0, 0)),
                pl.BlockSpec((L, 1), lambda n: (0, 0)),
            ],
            out_specs=pl.BlockSpec((1, L, C), lambda n: (n, 0, 0)),
            scratch_shapes=[pltpu.VMEM((L, C), jnp.float32)],
        ),
        compiler_params=pltpu.CompilerParams(
            dimension_semantics=("parallel",),       # N>=2 feeds both v7x TCs
            vmem_limit_bytes=32 * 1024 * 1024,       # explicit; <= half v7x VMEM
        ),
    )(xp_flat, w_taps, mask)

    # Drop the Wp-W padded columns and return to NCHW.
    out = out_flat.reshape(N, H, Wp, C)[:, :, :W, :]
    return jnp.transpose(out, (0, 3, 1, 2))


def reference(x_nchw, w_hwio, bias, *, eps=1e-5):
    """Pure-JAX reference (same semantics as the torch module, bias included)."""
    x = jnp.transpose(x_nchw, (0, 2, 3, 1))
    xp = jnp.pad(x, ((0, 0), (1, 1), (1, 1), (0, 0)), mode="reflect")
    y = jax.lax.conv_general_dilated(
        xp, w_hwio, window_strides=(1, 1), padding="VALID",
        dimension_numbers=("NHWC", "HWIO", "NHWC")) + bias
    mean = jnp.mean(y, axis=(1, 2), keepdims=True)
    var = jnp.mean((y - mean) ** 2, axis=(1, 2), keepdims=True)
    out = x + (y - mean) * jax.lax.rsqrt(var + eps)
    return jnp.transpose(out, (0, 3, 1, 2))


if __name__ == "__main__":
    # Small shapes consistent with the module: dim=4, batch=2, spatial=16x16.
    N, C, H, W = 2, 4, 16, 16
    key = jax.random.PRNGKey(0)
    kx, kw, kb = jax.random.split(key, 3)

    x = jax.random.normal(kx, (N, C, H, W), dtype=jnp.float32)
    # Conv2d(dim, dim, kernel_size=3, bias=True) parameters (HWIO layout).
    w_hwio = 0.1 * jax.random.normal(kw, (3, 3, C, C), dtype=jnp.float32)
    bias = 0.1 * jax.random.normal(kb, (C,), dtype=jnp.float32)

    ref = jax.block_until_ready(reference(x, w_hwio, bias))

    # f32 end-to-end: must match the reference tightly.
    out = jax.block_until_ready(resnet_layer(x, w_hwio, bias))
    np.testing.assert_allclose(np.asarray(out), np.asarray(ref), rtol=1e-4, atol=1e-4)
    assert out.shape == (N, C, H, W)

    # bf16 wire/MXU operands (v6e/v7x feedback item): f32 accumulation, loose
    # tolerance since conv operands and the skip are bf16-rounded in this mode.
    out_bf16 = jax.block_until_ready(
        resnet_layer(x, w_hwio, bias, operand_dtype=jnp.bfloat16))
    np.testing.assert_allclose(np.asarray(out_bf16), np.asarray(ref),
                               rtol=1e-1, atol=1e-1)

    print("KERNEL_OK")
</pallas_src>

<mosaic_0001>
module attributes {stable_mosaic.version = 11 : i64} {
  func.func @resnet_layer_kernel(%arg0: i32, %arg1: memref<1x328x4xf32, #tpu.memory_space<vmem>>, %arg2: memref<9x4x4xf32, #tpu.memory_space<vmem>>, %arg3: memref<288x1xf32, #tpu.memory_space<vmem>>, %arg4: memref<1x288x4xf32, #tpu.memory_space<vmem>>, %arg5: memref<288x4xf32, #tpu.memory_space<vmem>>) attributes {dimension_semantics = [#tpu.dimension_semantics<parallel>], iteration_bounds = array<i64: 2>, scalar_prefetch = 0 : i64, scratch_operands = 1 : i64, tpu.core_type = #tpu.core_type<tc>, window_params = [{transform_indices = @transform_0, window_bounds = array<i64: 1, 328, 4>}, {pipeline_mode = #tpu.pipeline_mode<synchronous>, transform_indices = @transform_1, window_bounds = array<i64: 9, 4, 4>}, {pipeline_mode = #tpu.pipeline_mode<synchronous>, transform_indices = @transform_2, window_bounds = array<i64: 288, 1>}, {transform_indices = @transform_3, window_bounds = array<i64: 1, 288, 4>}]} {
    %cst = arith.constant 0.000000e+00 : f32
    %0 = vector.broadcast %cst : f32 to vector<288x4xf32>
    %c0 = arith.constant 0 : index
    %c0_0 = arith.constant 0 : index
    %1 = vector.load %arg5[%c0, %c0_0] : memref<288x4xf32, #tpu.memory_space<vmem>>, vector<288x4xf32>
    tpu.vector_store %arg5[%c0, %c0_0], %0 {strides = array<i32>} : memref<288x4xf32, #tpu.memory_space<vmem>>, vector<288x4xf32>,
    %c0_1 = arith.constant 0 : index
    %c0_2 = arith.constant 0 : index
    %c0_3 = arith.constant 0 : index
    %2 = vector.load %arg1[%c0_1, %c0_2, %c0_3] : memref<1x328x4xf32, #tpu.memory_space<vmem>>, vector<1x328x4xf32>
    %3 = vector.shape_cast %2 : vector<1x328x4xf32> to vector<328x4xf32>
    %c0_4 = arith.constant 0 : index
    %c0_5 = arith.constant 0 : index
    %c0_6 = arith.constant 0 : index
    %4 = vector.load %arg2[%c0_4, %c0_5, %c0_6] : memref<9x4x4xf32, #tpu.memory_space<vmem>>, vector<1x4x4xf32>
    %5 = vector.shape_cast %4 : vector<1x4x4xf32> to vector<4x4xf32>
    %6 = vector.extract_strided_slice %3 {offsets = [0, 0], sizes = [288, 4], strides = [1, 1]} : vector<328x4xf32> to vector<288x4xf32>
    %c0_7 = arith.constant 0 : index
    %c0_8 = arith.constant 0 : index
    %7 = vector.load %arg5[%c0_7, %c0_8] : memref<288x4xf32, #tpu.memory_space<vmem>>, vector<288x4xf32>
    %cst_9 = arith.constant dense<0.000000e+00> : vector<288x4xf32>
    %8 = tpu.matmul %6, %5, %cst_9 {dimension_numbers = #tpu.dot_dimension_numbers<[1], [0], [0], [1], [0, 0, 1, 1], [], []>} : vector<288x4xf32>, vector<4x4xf32>, vector<288x4xf32> -> vector<288x4xf32>
    %9 = arith.addf %7, %8 : vector<288x4xf32>
    %c0_10 = arith.constant 0 : index
    %c0_11 = arith.constant 0 : index
    %10 = vector.load %arg5[%c0_10, %c0_11] : memref<288x4xf32, #tpu.memory_space<vmem>>, vector<288x4xf32>
    tpu.vector_store %arg5[%c0_10, %c0_11], %9 {strides = array<i32>} : memref<288x4xf32, #tpu.memory_space<vmem>>, vector<288x4xf32>,
    %c1 = arith.constant 1 : index
    %c0_12 = arith.constant 0 : index
    %c0_13 = arith.constant 0 : index
    %11 = vector.load %arg2[%c1, %c0_12, %c0_13] : memref<9x4x4xf32, #tpu.memory_space<vmem>>, vector<1x4x4xf32>
    %12 = vector.shape_cast %11 : vector<1x4x4xf32> to vector<4x4xf32>
    %13 = vector.extract_strided_slice %3 {offsets = [1, 0], sizes = [288, 4], strides = [1, 1]} : vector<328x4xf32> to vector<288x4xf32>
    %c0_14 = arith.constant 0 : index
    %c0_15 = arith.constant 0 : index
    %14 = vector.load %arg5[%c0_14, %c0_15] : memref<288x4xf32, #tpu.memory_space<vmem>>, vector<288x4xf32>
    %cst_16 = arith.constant dense<0.000000e+00> : vector<288x4xf32>
    %15 = tpu.matmul %13, %12, %cst_16 {dimension_numbers = #tpu.dot_dimension_numbers<[1], [0], [0], [1], [0, 0, 1, 1], [], []>} : vector<288x4xf32>, vector<4x4xf32>, vector<288x4xf32> -> vector<288x4xf32>
    %16 = arith.addf %14, %15 : vector<288x4xf32>
    %c0_17 = arith.constant 0 : index
    %c0_18 = arith.constant 0 : index
    %17 = vector.load %arg5[%c0_17, %c0_18] : memref<288x4xf32, #tpu.memory_space<vmem>>, vector<288x4xf32>
    tpu.vector_store %arg5[%c0_17, %c0_18], %16 {strides = array<i32>} : memref<288x4xf32, #tpu.memory_space<vmem>>, vector<288x4xf32>,
    %c2 = arith.constant 2 : index
    %c0_19 = arith.constant 0 : index
    %c0_20 = arith.constant 0 : index
    %18 = vector.load %arg2[%c2, %c0_19, %c0_20] : memref<9x4x4xf32, #tpu.memory_space<vmem>>, vector<1x4x4xf32>
    %19 = vector.shape_cast %18 : vector<1x4x4xf32> to vector<4x4xf32>
    %20 = vector.extract_strided_slice %3 {offsets = [2, 0], sizes = [288, 4], strides = [1, 1]} : vector<328x4xf32> to vector<288x4xf32>
    %c0_21 = arith.constant 0 : index
    %c0_22 = arith.constant 0 : index
    %21 = vector.load %arg5[%c0_21, %c0_22] : memref<288x4xf32, #tpu.memory_space<vmem>>, vector<288x4xf32>
    %cst_23 = arith.constant dense<0.000000e+00> : vector<288x4xf32>
    %22 = tpu.matmul %20, %19, %cst_23 {dimension_numbers = #tpu.dot_dimension_numbers<[1], [0], [0], [1], [0, 0, 1, 1], [], []>} : vector<288x4xf32>, vector<4x4xf32>, vector<288x4xf32> -> vector<288x4xf32>
    %23 = arith.addf %21, %22 : vector<288x4xf32>
    %c0_24 = arith.constant 0 : index
    %c0_25 = arith.constant 0 : index
    %24 = vector.load %arg5[%c0_24, %c0_25] : memref<288x4xf32, #tpu.memory_space<vmem>>, vector<288x4xf32>
    tpu.vector_store %arg5[%c0_24, %c0_25], %23 {strides = array<i32>} : memref<288x4xf32, #tpu.memory_space<vmem>>, vector<288x4xf32>,
    %c3 = arith.constant 3 : index
    %c0_26 = arith.constant 0 : index
    %c0_27 = arith.constant 0 : index
    %25 = vector.load %arg2[%c3, %c0_26, %c0_27] : memref<9x4x4xf32, #tpu.memory_space<vmem>>, vector<1x4x4xf32>
    %26 = vector.shape_cast %25 : vector<1x4x4xf32> to vector<4x4xf32>
    %27 = vector.extract_strided_slice %3 {offsets = [18, 0], sizes = [288, 4], strides = [1, 1]} : vector<328x4xf32> to vector<288x4xf32>
    %c0_28 = arith.constant 0 : index
    %c0_29 = arith.constant 0 : index
    %28 = vector.load %arg5[%c0_28, %c0_29] : memref<288x4xf32, #tpu.memory_space<vmem>>, vector<288x4xf32>
    %cst_30 = arith.constant dense<0.000000e+00> : vector<288x4xf32>
    %29 = tpu.matmul %27, %26, %cst_30 {dimension_numbers = #tpu.dot_dimension_numbers<[1], [0], [0], [1], [0, 0, 1, 1], [], []>} : vector<288x4xf32>, vector<4x4xf32>, vector<288x4xf32> -> vector<288x4xf32>
    %30 = arith.addf %28, %29 : vector<288x4xf32>
    %c0_31 = arith.constant 0 : index
    %c0_32 = arith.constant 0 : index
    %31 = vector.load %arg5[%c0_31, %c0_32] : memref<288x4xf32, #tpu.memory_space<vmem>>, vector<288x4xf32>
    tpu.vector_store %arg5[%c0_31, %c0_32], %30 {strides = array<i32>} : memref<288x4xf32, #tpu.memory_space<vmem>>, vector<288x4xf32>,
    %c4 = arith.constant 4 : index
    %c0_33 = arith.constant 0 : index
    %c0_34 = arith.constant 0 : index
    %32 = vector.load %arg2[%c4, %c0_33, %c0_34] : memref<9x4x4xf32, #tpu.memory_space<vmem>>, vector<1x4x4xf32>
    %33 = vector.shape_cast %32 : vector<1x4x4xf32> to vector<4x4xf32>
    %34 = vector.extract_strided_slice %3 {offsets = [19, 0], sizes = [288, 4], strides = [1, 1]} : vector<328x4xf32> to vector<288x4xf32>
    %c0_35 = arith.constant 0 : index
    %c0_36 = arith.constant 0 : index
    %35 = vector.load %arg5[%c0_35, %c0_36] : memref<288x4xf32, #tpu.memory_space<vmem>>, vector<288x4xf32>
    %cst_37 = arith.constant dense<0.000000e+00> : vector<288x4xf32>
    %36 = tpu.matmul %34, %33, %cst_37 {dimension_numbers = #tpu.dot_dimension_numbers<[1], [0], [0], [1], [0, 0, 1, 1], [], []>} : vector<288x4xf32>, vector<4x4xf32>, vector<288x4xf32> -> vector<288x4xf32>
    %37 = arith.addf %35, %36 : vector<288x4xf32>
    %c0_38 = arith.constant 0 : index
    %c0_39 = arith.constant 0 : index
    %38 = vector.load %arg5[%c0_38, %c0_39] : memref<288x4xf32, #tpu.memory_space<vmem>>, vector<288x4xf32>
    tpu.vector_store %arg5[%c0_38, %c0_39], %37 {strides = array<i32>} : memref<288x4xf32, #tpu.memory_space<vmem>>, vector<288x4xf32>,
    %c5 = arith.constant 5 : index
    %c0_40 = arith.constant 0 : index
    %c0_41 = arith.constant 0 : index
    %39 = vector.load %arg2[%c5, %c0_40, %c0_41] : memref<9x4x4xf32, #tpu.memory_space<vmem>>, vector<1x4x4xf32>
    %40 = vector.shape_cast %39 : vector<1x4x4xf32> to vector<4x4xf32>
    %41 = vector.extract_strided_slice %3 {offsets = [20, 0], sizes = [288, 4], strides = [1, 1]} : vector<328x4xf32> to vector<288x4xf32>
    %c0_42 = arith.constant 0 : index
    %c0_43 = arith.constant 0 : index
    %42 = vector.load %arg5[%c0_42, %c0_43] : memref<288x4xf32, #tpu.memory_space<vmem>>, vector<288x4xf32>
    %cst_44 = arith.constant dense<0.000000e+00> : vector<288x4xf32>
    %43 = tpu.matmul %41, %40, %cst_44 {dimension_numbers = #tpu.dot_dimension_numbers<[1], [0], [0], [1], [0, 0, 1, 1], [], []>} : vector<288x4xf32>, vector<4x4xf32>, vector<288x4xf32> -> vector<288x4xf32>
    %44 = arith.addf %42, %43 : vector<288x4xf32>
    %c0_45 = arith.constant 0 : index
    %c0_46 = arith.constant 0 : index
    %45 = vector.load %arg5[%c0_45, %c0_46] : memref<288x4xf32, #tpu.memory_space<vmem>>, vector<288x4xf32>
    tpu.vector_store %arg5[%c0_45, %c0_46], %44 {strides = array<i32>} : memref<288x4xf32, #tpu.memory_space<vmem>>, vector<288x4xf32>,
    %c6 = arith.constant 6 : index
    %c0_47 = arith.constant 0 : index
    %c0_48 = arith.constant 0 : index
    %46 = vector.load %arg2[%c6, %c0_47, %c0_48] : memref<9x4x4xf32, #tpu.memory_space<vmem>>, vector<1x4x4xf32>
    %47 = vector.shape_cast %46 : vector<1x4x4xf32> to vector<4x4xf32>
    %48 = vector.extract_strided_slice %3 {offsets = [36, 0], sizes = [288, 4], strides = [1, 1]} : vector<328x4xf32> to vector<288x4xf32>
    %c0_49 = arith.constant 0 : index
    %c0_50 = arith.constant 0 : index
    %49 = vector.load %arg5[%c0_49, %c0_50] : memref<288x4xf32, #tpu.memory_space<vmem>>, vector<288x4xf32>
    %cst_51 = arith.constant dense<0.000000e+00> : vector<288x4xf32>
    %50 = tpu.matmul %48, %47, %cst_51 {dimension_numbers = #tpu.dot_dimension_numbers<[1], [0], [0], [1], [0, 0, 1, 1], [], []>} : vector<288x4xf32>, vector<4x4xf32>, vector<288x4xf32> -> vector<288x4xf32>
    %51 = arith.addf %49, %50 : vector<288x4xf32>
    %c0_52 = arith.constant 0 : index
    %c0_53 = arith.constant 0 : index
    %52 = vector.load %arg5[%c0_52, %c0_53] : memref<288x4xf32, #tpu.memory_space<vmem>>, vector<288x4xf32>
    tpu.vector_store %arg5[%c0_52, %c0_53], %51 {strides = array<i32>} : memref<288x4xf32, #tpu.memory_space<vmem>>, vector<288x4xf32>,
    %c7 = arith.constant 7 : index
    %c0_54 = arith.constant 0 : index
    %c0_55 = arith.constant 0 : index
    %53 = vector.load %arg2[%c7, %c0_54, %c0_55] : memref<9x4x4xf32, #tpu.memory_space<vmem>>, vector<1x4x4xf32>
    %54 = vector.shape_cast %53 : vector<1x4x4xf32> to vector<4x4xf32>
    %55 = vector.extract_strided_slice %3 {offsets = [37, 0], sizes = [288, 4], strides = [1, 1]} : vector<328x4xf32> to vector<288x4xf32>
    %c0_56 = arith.constant 0 : index
    %c0_57 = arith.constant 0 : index
    %56 = vector.load %arg5[%c0_56, %c0_57] : memref<288x4xf32, #tpu.memory_space<vmem>>, vector<288x4xf32>
    %cst_58 = arith.constant dense<0.000000e+00> : vector<288x4xf32>
    %57 = tpu.matmul %55, %54, %cst_58 {dimension_numbers = #tpu.dot_dimension_numbers<[1], [0], [0], [1], [0, 0, 1, 1], [], []>} : vector<288x4xf32>, vector<4x4xf32>, vector<288x4xf32> -> vector<288x4xf32>
    %58 = arith.addf %56, %57 : vector<288x4xf32>
    %c0_59 = arith.constant 0 : index
    %c0_60 = arith.constant 0 : index
    %59 = vector.load %arg5[%c0_59, %c0_60] : memref<288x4xf32, #tpu.memory_space<vmem>>, vector<288x4xf32>
    tpu.vector_store %arg5[%c0_59, %c0_60], %58 {strides = array<i32>} : memref<288x4xf32, #tpu.memory_space<vmem>>, vector<288x4xf32>,
    %c8 = arith.constant 8 : index
    %c0_61 = arith.constant 0 : index
    %c0_62 = arith.constant 0 : index
    %60 = vector.load %arg2[%c8, %c0_61, %c0_62] : memref<9x4x4xf32, #tpu.memory_space<vmem>>, vector<1x4x4xf32>
    %61 = vector.shape_cast %60 : vector<1x4x4xf32> to vector<4x4xf32>
    %62 = vector.extract_strided_slice %3 {offsets = [38, 0], sizes = [288, 4], strides = [1, 1]} : vector<328x4xf32> to vector<288x4xf32>
    %c0_63 = arith.constant 0 : index
    %c0_64 = arith.constant 0 : index
    %63 = vector.load %arg5[%c0_63, %c0_64] : memref<288x4xf32, #tpu.memory_space<vmem>>, vector<288x4xf32>
    %cst_65 = arith.constant dense<0.000000e+00> : vector<288x4xf32>
    %64 = tpu.matmul %62, %61, %cst_65 {dimension_numbers = #tpu.dot_dimension_numbers<[1], [0], [0], [1], [0, 0, 1, 1], [], []>} : vector<288x4xf32>, vector<4x4xf32>, vector<288x4xf32> -> vector<288x4xf32>
    %65 = arith.addf %63, %64 : vector<288x4xf32>
    %c0_66 = arith.constant 0 : index
    %c0_67 = arith.constant 0 : index
    %66 = vector.load %arg5[%c0_66, %c0_67] : memref<288x4xf32, #tpu.memory_space<vmem>>, vector<288x4xf32>
    tpu.vector_store %arg5[%c0_66, %c0_67], %65 {strides = array<i32>} : memref<288x4xf32, #tpu.memory_space<vmem>>, vector<288x4xf32>,
    %c0_68 = arith.constant 0 : index
    %c0_69 = arith.constant 0 : index
    %67 = vector.load %arg5[%c0_68, %c0_69] : memref<288x4xf32, #tpu.memory_space<vmem>>, vector<288x4xf32>
    %c0_70 = arith.constant 0 : index
    %c0_71 = arith.constant 0 : index
    %68 = vector.load %arg3[%c0_70, %c0_71] : memref<288x1xf32, #tpu.memory_space<vmem>>, vector<288x1xf32>
    %69 = vector.broadcast %68 : vector<288x1xf32> to vector<288x4xf32>
    %70 = arith.mulf %67, %69 : vector<288x4xf32>
    %cst_72 = arith.constant dense<0.000000e+00> : vector<4xf32>
    %71 = vector.multi_reduction <add>, %70, %cst_72 [0] : vector<288x4xf32> to vector<4xf32>
    %72 = vector.shape_cast %71 : vector<4xf32> to vector<1x4xf32>
    %cst_73 = arith.constant 3.906250e-03 : f32
    %73 = vector.broadcast %cst_73 : f32 to vector<1x4xf32>
    %74 = arith.mulf %72, %73 : vector<1x4xf32>
    %75 = vector.broadcast %74 : vector<1x4xf32> to vector<288x4xf32>
    %76 = arith.subf %67, %75 : vector<288x4xf32>
    %77 = vector.broadcast %68 : vector<288x1xf32> to vector<288x4xf32>
    %78 = arith.mulf %76, %77 : vector<288x4xf32>
    %79 = arith.mulf %78, %78 : vector<288x4xf32>
    %cst_74 = arith.constant dense<0.000000e+00> : vector<4xf32>
    %80 = vector.multi_reduction <add>, %79, %cst_74 [0] : vector<288x4xf32> to vector<4xf32>
    %81 = vector.shape_cast %80 : vector<4xf32> to vector<1x4xf32>
    %cst_75 = arith.constant 3.906250e-03 : f32
    %82 = vector.broadcast %cst_75 : f32 to vector<1x4xf32>
    %83 = arith.mulf %81, %82 : vector<1x4xf32>
    %cst_76 = arith.constant 9.99999974E-6 : f32
    %84 = vector.broadcast %cst_76 : f32 to vector<1x4xf32>
    %85 = arith.addf %83, %84 : vector<1x4xf32>
    %86 = math.rsqrt %85 : vector<1x4xf32>
    %87 = vector.broadcast %86 : vector<1x4xf32> to vector<288x4xf32>
    %88 = arith.mulf %76, %87 : vector<288x4xf32>
    %89 = vector.extract_strided_slice %3 {offsets = [19, 0], sizes = [288, 4], strides = [1, 1]} : vector<328x4xf32> to vector<288x4xf32>
    %90 = arith.addf %89, %88 : vector<288x4xf32>
    %c0_77 = arith.constant 0 : index
    %c0_78 = arith.constant 0 : index
    %c0_79 = arith.constant 0 : index
    %91 = vector.load %arg4[%c0_77, %c0_78, %c0_79] : memref<1x288x4xf32, #tpu.memory_space<vmem>>, vector<1x288x4xf32>
    %92 = vector.shape_cast %91 : vector<1x288x4xf32> to vector<288x4xf32>
    %93 = vector.shape_cast %90 : vector<288x4xf32> to vector<1x288x4xf32>
    tpu.vector_store %arg4[%c0_77, %c0_78, %c0_79], %93 {strides = array<i32>} : memref<1x288x4xf32, #tpu.memory_space<vmem>>, vector<1x288x4xf32>,
    return
  }
  func.func @transform_0(%arg0: i32) -> (i32, i32, i32) {
    %c0_i32 = arith.constant 0 : i32
    %c0_i32_0 = arith.constant 0 : i32
    %c0_i32_1 = arith.constant 0 : i32
    return %arg0, %c0_i32, %c0_i32_0 : i32, i32, i32
  }
  func.func @transform_1(%arg0: i32) -> (i32, i32, i32) {
    %c0_i32 = arith.constant 0 : i32
    %c0_i32_0 = arith.constant 0 : i32
    %c0_i32_1 = arith.constant 0 : i32
    %c0_i32_2 = arith.constant 0 : i32
    return %c0_i32, %c0_i32_0, %c0_i32_1 : i32, i32, i32
  }
  func.func @transform_2(%arg0: i32) -> (i32, i32) {
    %c0_i32 = arith.constant 0 : i32
    %c0_i32_0 = arith.constant 0 : i32
    %c0_i32_1 = arith.constant 0 : i32
    return %c0_i32, %c0_i32_0 : i32, i32
  }
  func.func @transform_3(%arg0: i32) -> (i32, i32, i32) {
    %c0_i32 = arith.constant 0 : i32
    %c0_i32_0 = arith.constant 0 : i32
    %c0_i32_1 = arith.constant 0 : i32
    return %arg0, %c0_i32, %c0_i32_0 : i32, i32, i32
  }
}

</mosaic_0001>

<bundles_post_ra>
// kernel: tpu_custom_call.1
= control target key start
LH: loop header
LB: loop body
LE: loop exit
PB: predicated region body
PF: predicated region fallthrough
CT: control target
= control target key end

     0   :  { %s6649_s12 = smov 0   ;;  %s9217_s0 = inlined_call_operand.vmem [shape: f32[2,328,4], index: 0, kind: input, shape index: {}]   ;;  %s9218_s1 = inlined_call_operand.vmem [shape: f32[9,4,4], index: 1, kind: input, shape index: {}]   ;;  %s9219_s2 = inlined_call_operand.vmem [shape: f32[288,1], index: 2, kind: input, shape index: {}]   ;;  %s9220_s3 = inlined_call_operand.vmem [shape: f32[2,288,4], index: 3, kind: output, shape index: {}]  }
   0x1 LB: > { %s5340_s13 = sadd.s32 4294967295, %s6625_s12   ;;  %p5344_p0 = scmp.ge.s32.totalorder %s6625_s12, 1  ;;  %s6625_s12 = sphi %s6649_s12, %s13_s12  }
   0x2   : > { %p137_p1 = scmp.lt.s32.totalorder %s6625_s12, 3 }
   0x4   : > { %p138_p2 = pnand %p5344_p0, %p137_p1 }
   0x6   : > { %141 = sbr.rel (%p138_p2) target bundleno = 748 (0x2ec), region = 32 }
   0xd   : > { %v249_v0 = vld [vmem:[%s9218_s1] sm:$0xf]  ;;  %vm394_vm0 = vcmask 1043456   ;;  %p161_p3 = scmp.lt.s32.totalorder %s5340_s13, 1  ;;  %v5384_v1 = vld [vmem:[%s9218_s1 + $0x4] sm:$0xf] }
   0xe   : > { %6527 = vmatprep.subr.msk.mxu1 %vm394_vm0, %v249_v0  ;;  %6023 = vmatprep.subr.msk.mxu0 %vm394_vm0, %v249_v0  ;;  %v5422_v2 = vld [vmem:[%s9218_s1 + $0x8] sm:$0xf]  ;;  %vm171_vm1 = vcmask 31744   ;;  %v6697_v7 = vld [vmem:[%s9218_s1 + $0xc] sm:$0xf]  ;;  %vm754_vm2 = vcmask 1046528  }
   0xf   : > { %6528 = vmatpush3.msk.msra.mxu1 %vm394_vm0, %v249_v0  ;;  %s9364_s13 = smov (!%p161_p3, %s5340_s13), 1  ;;  %6024 = vmatpush3.msk.msra.mxu0 %vm394_vm0, %v249_v0  ;;  %v6718_v11 = vld [vmem:[%s9218_s1 + $0x10] sm:$0xf]  ;;  %vm1258_vm3 = vcmask 1045504   ;;  %v6897_v57 = vld [vmem:[%s9218_s1 + $0x14] sm:$0xf] }
  0x10   : > { %6079 = vmatprep.subr.msk.mxu1 %vm394_vm0, %v5384_v1  ;;  %6135 = vmatprep.subr.msk.mxu0 %vm394_vm0, %v5422_v2  ;;  %s6529_s20 = smul.u32 328, %s9364_s13  ;;  %v6912_v62 = vld [vmem:[%s9218_s1 + $0x18] sm:$0xf]  ;;  %vm2130_vm4 = vcmask 1044480   ;;  %vm3505_vm5 = vcmask 1042432   ;;  %vm4009_vm6 = vcmask 1041408  }
  0x11   : > { %vm5246_vm7 = vcmask 31747   ;;  %s6530_s9 = smul.u32 288, %s9364_s13  ;;  %vm5283_vm8 = vcmask 26624  }
  0x12   : > { %s6678_s23 = scalar_lea.vmem %s9217_s0, %s6529_s20 }
  0x13   : > { %v6681_v3 = vld [vmem:[%s6678_s23 + $0x90] sm:$0xff]  ;;  %v6684_v4 = vld [vmem:[%s6678_s23 + $0x98] sm:$0xff]  ;;  %v6687_v5 = vld [vmem:[%s6678_s23 + $0xa0] sm:$0xff]  ;;  %s9045_s11 = scalar_lea.vmem %s9220_s3, %s6530_s9 }
  0x14   : > { %9269 = vst [vmem:[#allocation3_spill] sm:$0xff] %v6684_v4  ;;  %6052 = vmatprep.mubr.msk.f32.mxu1 %vm171_vm1, %v6681_v3  ;;  %v6692_v6 = vld [vmem:[%s6678_s23] sm:$0xff]  ;;  %v6704_v8 = vld [vmem:[%s6678_s23 + $0x8] sm:$0xff]  ;;  %v6713_v10 = vld [vmem:[%s6678_s23 + $0x10] sm:$0xff] }
  0x15   : > { %6053 = vmatmul.mubr.msk.f32.vlgmr.msra.gmra.mrb[0].mxu1 %vm171_vm1, %v6684_v4  ;;  %6025 = vmatprep.mubr.msk.f32.mxu0 %vm171_vm1, %v6692_v6  ;;  %v6710_v9 = vld [vmem:[%s6678_s23 + $0xa8] sm:$0xff]  ;;  %v6721_v12 = vld [vmem:[%s6678_s23 + $0xb0] sm:$0xff]  ;;  %v6731_v13 = vld [vmem:[%s6678_s23 + $0x18] sm:$0xff]  ;;  %v755_v36 = vrot.slane %v6692_v6, 1  ;;  %v756_v37 = vrot.slane %v6704_v8, 1  ;;  %v1259_v40 = vrot.slane %v6692_v6, 2 }
  0x16   : > { %6080 = vmatpush3.msk.msra.mxu1 %vm394_vm0, %v5384_v1  ;;  %6055 = vmatprep.mubr.msk.f32.mxu1 %vm171_vm1, %v6687_v5  ;;  %9270 = vst [vmem:[#allocation4_spill] sm:$0xff] %v6710_v9  ;;  %v6736_v14 = vld [vmem:[%s6678_s23 + $0x20] sm:$0xff]  ;;  %v6743_v15 = vld [vmem:[%s6678_s23 + $0xb8] sm:$0xff]  ;;  %v6753_v17 = vld [vmem:[%s6678_s23 + $0x28] sm:$0xff]  ;;  %v1260_v41 = vrot.slane %v6704_v8, 2  ;;  %v758_v44 = vrot.slane %v6713_v10, 1 }
  0x17   : > { %6026 = vmatmul.mubr.msk.f32.vlgmr.msra.gmra.mrb[0].mxu0 %vm171_vm1, %v6704_v8  ;;  %6191 = vmatprep.subr.msk.mxu1 %vm394_vm0, %v6697_v7  ;;  %v6746_v16 = vld [vmem:[%s6678_s23 + $0xc0] sm:$0xff]  ;;  %v6758_v18 = vld [vmem:[%s6678_s23 + $0x30] sm:$0xff]  ;;  %v6763_v19 = vld [vmem:[%s6678_s23 + $0xc8] sm:$0xff]  ;;  %v757_v45 = vsel %vm754_vm2, %v755_v36, %v756_v37  ;;  %v760_v46 = vrot.slane %v6731_v13, 1  ;;  %v1262_v48 = vrot.slane %v6713_v10, 2  ;;  %v1264_v50 = vrot.slane %v6731_v13, 2 }
  0x18   : > { %6136 = vmatpush3.msk.msra.mxu0 %vm394_vm0, %v5422_v2  ;;  %6028 = vmatprep.mubr.msk.f32.mxu0 %vm171_vm1, %v6713_v10  ;;  %9271 = vst [vmem:[#allocation5_spill] sm:$0xff] %v6746_v16  ;;  %9272 = vst [vmem:[#allocation6_spill] sm:$0xff] %v6763_v19  ;;  %v6766_v20 = vld [vmem:[%s6678_s23 + $0xd0] sm:$0xff]  ;;  %v6773_v21 = vld [vmem:[%s6678_s23 + $0x38] sm:$0xff]  ;;  %v1261_v49 = vsel %vm1258_vm3, %v1259_v40, %v1260_v41  ;;  %v759_v51 = vsel %vm754_vm2, %v756_v37, %v758_v44  ;;  %v762_v52 = vrot.slane %v6736_v14, 1 }
  0x19   : > { %6056 = vmatmul.mubr.msk.f32.gmra.mrb[2].mxu1 %vm171_vm1, %v6710_v9  ;;  %6247 = vmatprep.subr.msk.mxu0 %vm394_vm0, %v6718_v11  ;;  %v6778_v22 = vld [vmem:[%s6678_s23 + $0x40] sm:$0xff]  ;;  %v6783_v23 = vld [vmem:[%s6678_s23 + $0xd8] sm:$0xff]  ;;  %v6793_v25 = vld [vmem:[%s6678_s23 + $0x48] sm:$0xff]  ;;  %v761_v53 = vsel %vm754_vm2, %v758_v44, %v760_v46  ;;  %v764_v54 = vrot.slane %v6753_v17, 1  ;;  %v1263_v55 = vsel %vm1258_vm3, %v1260_v41, %v1262_v48  ;;  %v1266_v56 = vrot.slane %v6736_v14, 2 }
  0x1a   : > { %6058 = vmatprep.mubr.msk.f32.mxu1 %vm171_vm1, %v6721_v12  ;;  %9273 = vst [vmem:[#allocation7_spill] sm:$0xff] %v6783_v23  ;;  %v6786_v24 = vld [vmem:[%s6678_s23 + $0xe0] sm:$0xff]  ;;  %v6798_v26 = vld [vmem:[%s6678_s23 + $0x50] sm:$0xff]  ;;  %v6803_v27 = vld [vmem:[%s6678_s23 + $0xe8] sm:$0xff]  ;;  %v6901_v58 = vsel %vm1258_vm3, %v1262_v48, %v1264_v50  ;;  %v1268_v59 = vrot.slane %v6753_v17, 2  ;;  %v763_v60 = vsel %vm754_vm2, %v760_v46, %v762_v52  ;;  %v766_v61 = vrot.slane %v6758_v18, 1 }
  0x1b   : > { %6029 = vmatmul.mubr.msk.f32.gmra.mrb[2].mxu0 %vm171_vm1, %v6731_v13  ;;  %9274 = vst [vmem:[#allocation8_spill] sm:$0xff] %v6803_v27  ;;  %v6806_v28 = vld [vmem:[%s6678_s23 + $0xf0] sm:$0xff]  ;;  %v6813_v29 = vld [vmem:[%s6678_s23 + $0x58] sm:$0xff]  ;;  %v6818_v30 = vld [vmem:[%s6678_s23 + $0x60] sm:$0xff]  ;;  %v765_v63 = vsel %vm754_vm2, %v762_v52, %v764_v54  ;;  %v768_v0 = vrot.slane %v6773_v21, 1  ;;  %v6924_v1 = vsel %vm1258_vm3, %v1264_v50, %v1266_v56  ;;  %v1270_v2 = vrot.slane %v6758_v18, 2 }
  0x1c   : > { %6031 = vmatprep.mubr.msk.f32.mxu0 %vm171_vm1, %v6736_v14  ;;  %v6823_v31 = vld [vmem:[%s6678_s23 + $0xf8] sm:$0xff]  ;;  %v6826_v32 = vld [vmem:[%s6678_s23 + $0x100] sm:$0xff]  ;;  %v6833_v33 = vld [vmem:[%s6678_s23 + $0x68] sm:$0xff]  ;;  %v6929_v6 = vsel %vm1258_vm3, %v1266_v56, %v1268_v59  ;;  %v767_v8 = vsel %vm754_vm2, %v764_v54, %v766_v61  ;;  %v772_v37 = vrot.slane %v6793_v25, 1  ;;  %v1274_v41 = vrot.slane %v6778_v22, 2 }
  0x1d   : > { %6059 = vmatmul.mubr.msk.f32.gmra.mrb[4].mxu1 %vm171_vm1, %v6743_v15  ;;  %9275 = vst [vmem:[#allocation9_spill] sm:$0xff] %v6823_v31  ;;  %v6838_v34 = vld [vmem:[%s6678_s23 + $0x70] sm:$0xff]  ;;  %v6843_v35 = vld [vmem:[%s6678_s23 + $0x108] sm:$0xff]  ;;  %v6855_v39 = vld [vmem:[%s6678_s23 + $0x78] sm:$0xff]  ;;  %v769_v36 = vsel %vm754_vm2, %v766_v61, %v768_v0  ;;  %v6944_v40 = vsel %vm1258_vm3, %v1268_v59, %v1270_v2  ;;  %v774_v48 = vrot.slane %v6798_v26, 1  ;;  %v776_v50 = vrot.slane %v6813_v29, 1 }
  0x1e   : > { %6061 = vmatprep.mubr.msk.f32.mxu1 %vm171_vm1, %v6746_v16  ;;  %9276 = vst [vmem:[#allocation10_spill] sm:$0xff] %v6843_v35  ;;  %v6848_v38 = vld [vmem:[%s6678_s23 + $0x110] sm:$0xff]  ;;  %v6862_v42 = vld [vmem:[%s6678_s23 + $0x80] sm:$0xff]  ;;  %v6867_v43 = vld [vmem:[%s6678_s23 + $0x118] sm:$0xff]  ;;  %v1278_v52 = vrot.slane %v6798_v26, 2  ;;  %v778_v59 = vrot.slane %v6818_v30, 1 }
  0x1f   : > { %6032 = vmatmul.mubr.msk.f32.gmra.mrb[4].mxu0 %vm171_vm1, %v6753_v17  ;;  %v6877_v47 = vld [vmem:[%s6678_s23 + $0x88] sm:$0xff]  ;;  %v775_v56 = vsel %vm754_vm2, %v772_v37, %v774_v48  ;;  %v777_v61 = vsel %vm754_vm2, %v774_v48, %v776_v50  ;;  %v784_v48 = vrot.slane %v6855_v39, 1 }
  0x20   : > { %6034 = vmatprep.mubr.msk.f32.mxu0 %vm171_vm1, %v6758_v18 }
  0x21   : > { %6062 = vmatmul.mubr.msk.f32.gmra.mrb[6].mxu1 %vm171_vm1, %v6763_v19 }
  0x22   : > { %6064 = vmatprep.mubr.msk.f32.mxu1 %vm171_vm1, %v6766_v20 }
  0x23   : > { %6035 = vmatmul.mubr.msk.f32.gmra.mrb[6].mxu0 %vm171_vm1, %v6773_v21 }
  0x24   : > { %6037 = vmatprep.mubr.msk.f32.mxu0 %vm171_vm1, %v6778_v22 }
  0x25   : > { %6065 = vmatmul.mubr.msk.f32.gmra.mrb[8].mxu1 %vm171_vm1, %v6783_v23 }
  0x26   : > { %6067 = vmatprep.mubr.msk.f32.mxu1 %vm171_vm1, %v6786_v24 }
  0x27   : > { %6038 = vmatmul.mubr.msk.f32.gmra.mrb[8].mxu0 %vm171_vm1, %v6793_v25 }
  0x28   : > { %6040 = vmatprep.mubr.msk.f32.mxu0 %vm171_vm1, %v6798_v26 }
  0x29   : > { %6068 = vmatmul.mubr.msk.f32.gmra.mrb[10].mxu1 %vm171_vm1, %v6803_v27 }
  0x2a   : > { %6070 = vmatprep.mubr.msk.f32.mxu1 %vm171_vm1, %v6806_v28 }
  0x2b   : > { %6041 = vmatmul.mubr.msk.f32.gmra.mrb[10].mxu0 %vm171_vm1, %v6813_v29 }
  0x2c   : > { %6043 = vmatprep.mubr.msk.f32.mxu0 %vm171_vm1, %v6818_v30 }
  0x2d   : > { %6071 = vmatmul.mubr.msk.f32.gmra.mrb[12].mxu1 %vm171_vm1, %v6823_v31 }
  0x2e   : > { %6073 = vmatprep.mubr.msk.f32.mxu1 %vm171_vm1, %v6826_v32 }
  0x2f   : > { %6044 = vmatmul.mubr.msk.f32.gmra.mrb[12].mxu0 %vm171_vm1, %v6833_v33 }
  0x30   : > { %6046 = vmatprep.mubr.msk.f32.mxu0 %vm171_vm1, %v6838_v34 }
  0x31   : > { %6074 = vmatmul.mubr.msk.f32.gmra.mrb[14].mxu1 %vm171_vm1, %v6843_v35 }
  0x32   : > { %6076 = vmatprep.mubr.msk.f32.mxu1 %vm171_vm1, %v6848_v38 }
  0x33   : > { %6047 = vmatmul.mubr.msk.f32.gmra.mrb[14].mxu0 %vm171_vm1, %v6855_v39 }
  0x34   : > { %6049 = vmatprep.mubr.msk.f32.mxu0 %vm171_vm1, %v6862_v42 }
  0x35   : > { %6077 = vmatmul.mubr.msk.f32.gmra.mrb[16].mxu1 %vm171_vm1, %v6867_v43 }
  0x36   : > { %6081 = vmatprep.mubr.msk.f32.mxu1 %vm171_vm1, %v757_v45  ;;  %v1276_v45 = vrot.slane %v6793_v25, 2 }
  0x37   : > { %6050 = vmatmul.mubr.msk.f32.gmra.mrb[16].mxu0 %vm171_vm1, %v6877_v47 }
  0x38   : > { %6137 = vmatprep.mubr.msk.f32.mxu0 %vm171_vm1, %v1261_v49  ;;  %v6970_v54 = vsel %vm1258_vm3, %v1274_v41, %v1276_v45 }
  0x39   : > { %6082 = vmatmul.mubr.msk.f32.vlgmr.msra.gmra.mrb[18].mxu1 %vm171_vm1, %v759_v51 }
  0x3a   : > { %6192 = vmatpush3.msk.msra.mxu1 %vm394_vm0, %v6697_v7  ;;  %6084 = vmatprep.mubr.msk.f32.mxu1 %vm171_vm1, %v761_v53  ;;  %v1272_v7 = vrot.slane %v6773_v21, 2  ;;  %v6966_v53 = vld [vmem:[%s6678_s23 + $0x128] sm:$0xff] }
  0x3b   : > { %6138 = vmatmul.mubr.msk.f32.vlgmr.msra.gmra.mrb[18].mxu0 %vm171_vm1, %v1263_v55  ;;  %6303 = vmatprep.subr.msk.mxu1 %vm394_vm0, %v6897_v57  ;;  %9277 = vst [vmem:[#allocation11_spill] sm:$0xff] %v6966_v53  ;;  %v1280_v55 = vrot.slane %v6813_v29, 2 }
  0x3c   : > { %6248 = vmatpush3.msk.msra.mxu0 %vm394_vm0, %v6718_v11  ;;  %6140 = vmatprep.mubr.msk.f32.mxu0 %vm171_vm1, %v6901_v58  ;;  %v770_v11 = vrot.slane %v6778_v22, 1  ;;  %v6949_v44 = vsel %vm1258_vm3, %v1270_v2, %v1272_v7  ;;  %v6962_v51 = vsel %vm1258_vm3, %v1272_v7, %v1274_v41  ;;  %v9221_v2 = vrot.slane %v6966_v53, 2 }
  0x3d   : > { %6085 = vmatmul.mubr.msk.f32.gmra.mrb[20].mxu1 %vm171_vm1, %v763_v60  ;;  %6359 = vmatprep.subr.msk.mxu0 %vm394_vm0, %v6912_v62  ;;  %v6977_v60 = vld [vmem:[%s6678_s23 + $0x120] sm:$0xff]  ;;  %v6988_v7 = vsel %vm1258_vm3, %v1276_v45, %v1278_v52  ;;  %v779_v41 = vsel %vm754_vm2, %v776_v50, %v778_v59  ;;  %v782_v45 = vrot.slane %v6838_v34, 1  ;;  %v794_v53 = vrot.slane %v6687_v5, 1 }
  0x3e   : > { %6087 = vmatprep.mubr.msk.f32.mxu1 %vm171_vm1, %v765_v63  ;;  %v771_v46 = vsel %vm754_vm2, %v768_v0, %v770_v11  ;;  %v773_v49 = vsel %vm754_vm2, %v770_v11, %v772_v37  ;;  %v780_v63 = vrot.slane %v6833_v33, 1  ;;  %v9222_v0 = vrot.slane %v6977_v60, 2 }
  0x3f   : > { %6141 = vmatmul.mubr.msk.f32.gmra.mrb[20].mxu0 %vm171_vm1, %v6924_v1  ;;  %v6993_v11 = vsel %vm1258_vm3, %v1278_v52, %v1280_v55  ;;  %v1286_v52 = vrot.slane %v6838_v34, 2 }
  0x40   : > { %6143 = vmatprep.mubr.msk.f32.mxu0 %vm171_vm1, %v6929_v6  ;;  %v7001_v37 = vsel %vm1258_vm3, %v9222_v0, %v9221_v2  ;;  %v785_v2 = vsel %vm754_vm2, %v782_v45, %v784_v48  ;;  %v790_v0 = vrot.slane %v6681_v3, 1 }
  0x41   : > { %6088 = vmatmul.mubr.msk.f32.gmra.mrb[22].mxu1 %vm171_vm1, %v767_v8  ;;  %v1282_v8 = vrot.slane %v6818_v30, 2  ;;  %9278 = vst [vmem:[#allocation12_spill] sm:$0xff] %v7001_v37 }
  0x42   : > { %6090 = vmatprep.mubr.msk.f32.mxu1 %vm171_vm1, %v769_v36  ;;  %v1284_v36 = vrot.slane %v6833_v33, 2 }
  0x43   : > { %6144 = vmatmul.mubr.msk.f32.gmra.mrb[22].mxu0 %vm171_vm1, %v6944_v40 }
  0x44   : > { %6146 = vmatprep.mubr.msk.f32.mxu0 %vm171_vm1, %v6949_v44  ;;  %v7018_v50 = vsel %vm1258_vm3, %v1282_v8, %v1284_v36 }
  0x45   : > { %6091 = vmatmul.mubr.msk.f32.gmra.mrb[24].mxu1 %vm171_vm1, %v771_v46  ;;  %v781_v46 = vsel %vm754_vm2, %v778_v59, %v780_v63  ;;  %v783_v59 = vsel %vm754_vm2, %v780_v63, %v782_v45  ;;  %v1292_v45 = vrot.slane %v6877_v47, 2 }
  0x46   : > { %6093 = vmatprep.mubr.msk.f32.mxu1 %vm171_vm1, %v773_v49  ;;  %v7013_v49 = vsel %vm1258_vm3, %v1280_v55, %v1282_v8  ;;  %v788_v55 = vrot.slane %v6877_v47, 1  ;;  %v7031_v8 = vsel %vm1258_vm3, %v1284_v36, %v1286_v52  ;;  %v792_v36 = vrot.slane %v6684_v4, 1 }
  0x47   : > { %6147 = vmatmul.mubr.msk.f32.gmra.mrb[24].mxu0 %vm171_vm1, %v6962_v51 }
  0x48   : > { %6149 = vmatprep.mubr.msk.f32.mxu0 %vm171_vm1, %v6970_v54 }
  0x49   : > { %6094 = vmatmul.mubr.msk.f32.gmra.mrb[26].mxu1 %vm171_vm1, %v775_v56  ;;  %v1288_v56 = vrot.slane %v6855_v39, 2 }
  0x4a   : > { %6096 = vmatprep.mubr.msk.f32.mxu1 %vm171_vm1, %v777_v61  ;;  %v786_v61 = vrot.slane %v6862_v42, 1 }
  0x4b   : > { %6150 = vmatmul.mubr.msk.f32.gmra.mrb[26].mxu0 %vm171_vm1, %v6988_v7  ;;  %v7036_v63 = vsel %vm1258_vm3, %v1286_v52, %v1288_v56 }
  0x4c   : > { %6152 = vmatprep.mubr.msk.f32.mxu0 %vm171_vm1, %v6993_v11  ;;  %9279 = vst [vmem:[#allocation13_spill] sm:$0xff] %v7036_v63  ;;  %v789_v37 = vsel %vm754_vm2, %v786_v61, %v788_v55 }
  0x4d   : > { %6097 = vmatmul.mubr.msk.f32.gmra.mrb[28].mxu1 %vm171_vm1, %v779_v41  ;;  %v1290_v41 = vrot.slane %v6862_v42, 2 }
  0x4e   : > { %6099 = vmatprep.mubr.msk.f32.mxu1 %vm171_vm1, %v781_v46  ;;  %v787_v46 = vsel %vm754_vm2, %v784_v48, %v786_v61  ;;  %v1296_v48 = vrot.slane %v6684_v4, 2  ;;  %v791_v61 = vsel %vm754_vm2, %v788_v55, %v790_v0  ;;  %v795_v55 = vsel %vm754_vm2, %v792_v36, %v794_v53 }
  0x4f   : > { %6153 = vmatmul.mubr.msk.f32.gmra.mrb[28].mxu0 %vm171_vm1, %v7013_v49  ;;  %v7049_v52 = vsel %vm1258_vm3, %v1288_v56, %v1290_v41  ;;  %v796_v56 = vrot.slane %v6710_v9, 1  ;;  %v798_v4 = vrot.slane %v6721_v12, 1 }
  0x50   : > { %6155 = vmatprep.mubr.msk.f32.mxu0 %vm171_vm1, %v7018_v50 }
  0x51   : > { %6100 = vmatmul.mubr.msk.f32.gmra.mrb[30].mxu1 %vm171_vm1, %v783_v59  ;;  %v1294_v59 = vrot.slane %v6681_v3, 2 }
  0x52   : > { %6102 = vmatprep.mubr.msk.f32.mxu1 %vm171_vm1, %v785_v2  ;;  %v7054_v2 = vsel %vm1258_vm3, %v1290_v41, %v1292_v45 }
  0x53   : > { %6156 = vmatmul.mubr.msk.f32.gmra.mrb[30].mxu0 %vm171_vm1, %v7031_v8  ;;  %9280 = vst [vmem:[#allocation14_spill] sm:$0xff] %v7054_v2  ;;  %v7067_v41 = vsel %vm1258_vm3, %v1292_v45, %v1294_v59  ;;  %v800_v45 = vrot.slane %v6743_v15, 1 }
  0x54   : > { %6158 = vmatprep.mubr.msk.f32.mxu0 %vm171_vm1, %v7036_v63  ;;  %v793_v63 = vsel %vm754_vm2, %v790_v0, %v792_v36  ;;  %v1300_v0 = vrot.slane %v6710_v9, 2  ;;  %v799_v36 = vsel %vm754_vm2, %v796_v56, %v798_v4  ;;  %v802_v9 = vrot.slane %v6746_v16, 1 }
  0x55   : > { %6103 = vmatmul.mubr.msk.f32.gmra.mrb[32].mxu1 %vm171_vm1, %v787_v46  ;;  %v1298_v46 = vrot.slane %v6687_v5, 2 }
  0x56   : > { %6105 = vmatprep.mubr.msk.f32.mxu1 %vm171_vm1, %v789_v37  ;;  %v7072_v37 = vsel %vm1258_vm3, %v1294_v59, %v1296_v48 }
  0x57   : > { %6159 = vmatmul.mubr.msk.f32.gmra.mrb[32].mxu0 %vm171_vm1, %v7049_v52  ;;  %9281 = vst [vmem:[#allocation15_spill] sm:$0xff] %v7072_v37  ;;  %v7085_v59 = vsel %vm1258_vm3, %v1296_v48, %v1298_v46  ;;  %v804_v48 = vrot.slane %v6763_v19, 1 }
  0x58   : > { %6161 = vmatprep.mubr.msk.f32.mxu0 %vm171_vm1, %v7054_v2  ;;  %v797_v2 = vsel %vm754_vm2, %v794_v53, %v796_v56  ;;  %v1304_v53 = vrot.slane %v6743_v15, 2  ;;  %v6627_v56 = vmov 0.0  }
  0x59   : > { %6106 = vmatmul.mubr.msk.f32.gmra.mrb[34].mxu1 %vm171_vm1, %v791_v61  ;;  %v1302_v61 = vrot.slane %v6721_v12, 2  ;;  %191 = vst.msk [vmem:[#allocation2 + $0x98] sm:$0xff] %vm171_vm1, %v6627_v56  ;;  %172 = vst.msk [vmem:[#allocation2] sm:$0xff] %vm171_vm1, %v6627_v56 }
  0x5a   : > { %6108 = vmatprep.mubr.msk.f32.mxu1 %vm171_vm1, %v793_v63  ;;  %v7090_v63 = vsel %vm1258_vm3, %v1298_v46, %v1300_v0  ;;  %173 = vst.msk [vmem:[#allocation2 + $0x8] sm:$0xff] %vm171_vm1, %v6627_v56  ;;  %174 = vst.msk [vmem:[#allocation2 + $0x10] sm:$0xff] %vm171_vm1, %v6627_v56 }
  0x5b   : > { %6162 = vmatmul.mubr.msk.f32.gmra.mrb[34].mxu0 %vm171_vm1, %v7067_v41  ;;  %v7103_v46 = vsel %vm1258_vm3, %v1300_v0, %v1302_v61  ;;  %175 = vst.msk [vmem:[#allocation2 + $0x18] sm:$0xff] %vm171_vm1, %v6627_v56  ;;  %176 = vst.msk [vmem:[#allocation2 + $0x20] sm:$0xff] %vm171_vm1, %v6627_v56  ;;  %v803_v0 = vsel %vm754_vm2, %v800_v45, %v802_v9 }
  0x5c   : > { %6164 = vmatprep.mubr.msk.f32.mxu0 %vm171_vm1, %v7072_v37  ;;  %v801_v37 = vsel %vm754_vm2, %v798_v4, %v800_v45  ;;  %9282 = vst [vmem:[#allocation16_spill] sm:$0xff] %v7103_v46  ;;  %v1308_v4 = vrot.slane %v6763_v19, 2  ;;  %177 = vst.msk [vmem:[#allocation2 + $0x28] sm:$0xff] %vm171_vm1, %v6627_v56  ;;  %v808_v19 = vrot.slane %v6783_v23, 1 }
  0x5d   : > { %6109 = vmatmul.mubr.msk.f32.gmra.mrb[36].mxu1 %vm171_vm1, %v795_v55  ;;  %v1306_v55 = vrot.slane %v6746_v16, 2  ;;  %178 = vst.msk [vmem:[#allocation2 + $0x30] sm:$0xff] %vm171_vm1, %v6627_v56  ;;  %179 = vst.msk [vmem:[#allocation2 + $0x38] sm:$0xff] %vm171_vm1, %v6627_v56 }
  0x5e   : > { %6111 = vmatprep.mubr.msk.f32.mxu1 %vm171_vm1, %v797_v2  ;;  %v7108_v2 = vsel %vm1258_vm3, %v1302_v61, %v1304_v53  ;;  %180 = vst.msk [vmem:[#allocation2 + $0x40] sm:$0xff] %vm171_vm1, %v6627_v56  ;;  %181 = vst.msk [vmem:[#allocation2 + $0x48] sm:$0xff] %vm171_vm1, %v6627_v56  ;;  %v806_v61 = vrot.slane %v6766_v20, 1 }
  0x5f   : > { %6165 = vmatmul.mubr.msk.f32.gmra.mrb[36].mxu0 %vm171_vm1, %v7085_v59  ;;  %9283 = vst [vmem:[#allocation17_spill] sm:$0xff] %v7108_v2  ;;  %182 = vst.msk [vmem:[#allocation2 + $0x50] sm:$0xff] %vm171_vm1, %v6627_v56  ;;  %v7157_v16 = vsel %vm1258_vm3, %v1304_v53, %v1306_v55  ;;  %v812_v53 = vrot.slane %v6803_v27, 1 }
  0x60   : > { %6167 = vmatprep.mubr.msk.f32.mxu0 %vm171_vm1, %v7090_v63  ;;  %183 = vst.msk [vmem:[#allocation2 + $0x58] sm:$0xff] %vm171_vm1, %v6627_v56  ;;  %184 = vst.msk [vmem:[#allocation2 + $0x60] sm:$0xff] %vm171_vm1, %v6627_v56  ;;  %v807_v45 = vsel %vm754_vm2, %v804_v48, %v806_v61 }
  0x61   : > { %6112 = vmatmul.mubr.msk.f32.gmra.mrb[38].mxu1 %vm171_vm1, %v799_v36  ;;  %185 = vst.msk [vmem:[#allocation2 + $0x68] sm:$0xff] %vm171_vm1, %v6627_v56  ;;  %186 = vst.msk [vmem:[#allocation2 + $0x70] sm:$0xff] %vm171_vm1, %v6627_v56  ;;  %v805_v36 = vsel %vm754_vm2, %v802_v9, %v804_v48  ;;  %v1312_v9 = vrot.slane %v6783_v23, 2  ;;  %v814_v23 = vrot.slane %v6806_v28, 1 }
  0x62   : > { %187 = vst.msk [vmem:[#allocation2 + $0x78] sm:$0xff] %vm171_vm1, %v6627_v56  ;;  %188 = vst.msk [vmem:[#allocation2 + $0x80] sm:$0xff] %vm171_vm1, %v6627_v56  ;;  %6114 = vmatprep.mubr.msk.f32.mxu1 %vm171_vm1, %v801_v37  ;;  %v7162_v37 = vsel %vm1258_vm3, %v1306_v55, %v1308_v4 }
  0x63   : > { %189 = vst.msk [vmem:[#allocation2 + $0x88] sm:$0xff] %vm171_vm1, %v6627_v56  ;;  %190 = vst.msk [vmem:[#allocation2 + $0x90] sm:$0xff] %vm171_vm1, %v6627_v56  ;;  %6168 = vmatmul.mubr.msk.f32.gmra.mrb[38].mxu0 %vm171_vm1, %v7103_v46  ;;  %v810_v46 = vrot.slane %v6786_v24, 1 }
  0x64   : > { %192 = vst.msk [vmem:[#allocation2 + $0xa0] sm:$0xff] %vm171_vm1, %v6627_v56  ;;  %193 = vst.msk [vmem:[#allocation2 + $0xa8] sm:$0xff] %vm171_vm1, %v6627_v56  ;;  %6170 = vmatprep.mubr.msk.f32.mxu0 %vm171_vm1, %v7108_v2  ;;  %v809_v2 = vsel %vm754_vm2, %v806_v61, %v808_v19  ;;  %v1316_v61 = vrot.slane %v6803_v27, 2  ;;  %v818_v27 = vrot.slane %v6826_v32, 1 }
  0x65   : > { %194 = vst.msk [vmem:[#allocation2 + $0xb0] sm:$0xff] %vm171_vm1, %v6627_v56  ;;  %195 = vst.msk [vmem:[#allocation2 + $0xb8] sm:$0xff] %vm171_vm1, %v6627_v56  ;;  %6115 = vmatmul.mubr.msk.f32.gmra.mrb[40].mxu1 %vm171_vm1, %v803_v0  ;;  %v1314_v0 = vrot.slane %v6786_v24, 2 }
  0x66   : > { %196 = vst.msk [vmem:[#allocation2 + $0xc0] sm:$0xff] %vm171_vm1, %v6627_v56  ;;  %197 = vst.msk [vmem:[#allocation2 + $0xc8] sm:$0xff] %vm171_vm1, %v6627_v56  ;;  %6117 = vmatprep.mubr.msk.f32.mxu1 %vm171_vm1, %v805_v36  ;;  %v811_v36 = vsel %vm754_vm2, %v808_v19, %v810_v46 }
  0x67   : > { %198 = vst.msk [vmem:[#allocation2 + $0xd0] sm:$0xff] %vm171_vm1, %v6627_v56  ;;  %199 = vst.msk [vmem:[#allocation2 + $0xd8] sm:$0xff] %vm171_vm1, %v6627_v56  ;;  %6171 = vmatmul.mubr.msk.f32.gmra.mrb[40].mxu0 %vm171_vm1, %v7157_v16  ;;  %v7198_v19 = vsel %vm1258_vm3, %v1314_v0, %v1316_v61 }
  0x68   : > { %200 = vst.msk [vmem:[#allocation2 + $0xe0] sm:$0xff] %vm171_vm1, %v6627_v56  ;;  %201 = vst.msk [vmem:[#allocation2 + $0xe8] sm:$0xff] %vm171_vm1, %v6627_v56  ;;  %6173 = vmatprep.mubr.msk.f32.mxu0 %vm171_vm1, %v7162_v37 }
  0x69   : > { %202 = vst.msk [vmem:[#allocation2 + $0xf0] sm:$0xff] %vm171_vm1, %v6627_v56  ;;  %203 = vst.msk [vmem:[#allocation2 + $0xf8] sm:$0xff] %vm171_vm1, %v6627_v56  ;;  %6118 = vmatmul.mubr.msk.f32.gmra.mrb[42].mxu1 %vm171_vm1, %v807_v45  ;;  %v1318_v45 = vrot.slane %v6806_v28, 2 }
  0x6a   : > { %204 = vst.msk [vmem:[#allocation2 + $0x100] sm:$0xff] %vm171_vm1, %v6627_v56  ;;  %205 = vst.msk [vmem:[#allocation2 + $0x108] sm:$0xff] %vm171_vm1, %v6627_v56  ;;  %6120 = vmatprep.mubr.msk.f32.mxu1 %vm171_vm1, %v809_v2  ;;  %v815_v2 = vsel %vm754_vm2, %v812_v53, %v814_v23 }
  0x6b   : > { %206 = vst.msk [vmem:[#allocation2 + $0x110] sm:$0xff] %vm171_vm1, %v6627_v56  ;;  %207 = vst.msk [vmem:[#allocation2 + $0x118] sm:$0xff] %vm171_vm1, %v6627_v56  ;;  %v1310_v56 = vrot.slane %v6766_v20, 2 }
  0x6c   : > { %9284 = vst [vmem:[#allocation18_spill] sm:$0xff] %v7162_v37  ;;  %v813_v37 = vsel %vm754_vm2, %v810_v46, %v812_v53  ;;  %9286 = vst [vmem:[#allocation20_spill] sm:$0xff] %v7198_v19  ;;  %v1320_v46 = vrot.slane %v6823_v31, 2 }
  0x6d   : > { %v7175_v55 = vsel %vm1258_vm3, %v1308_v4, %v1310_v56  ;;  %v7180_v48 = vsel %vm1258_vm3, %v1310_v56, %v1312_v9  ;;  %v816_v4 = vrot.slane %v6823_v31, 1  ;;  %v7193_v56 = vsel %vm1258_vm3, %v1312_v9, %v1314_v0  ;;  %6121 = vmatmul.mubr.msk.f32.gmra.mrb[44].mxu1 %vm171_vm1, %v811_v36 }
  0x6e   : > { %9285 = vst [vmem:[#allocation19_spill] sm:$0xff] %v7180_v48  ;;  %6174 = vmatmul.mubr.msk.f32.gmra.mrb[42].mxu0 %vm171_vm1, %v7175_v55  ;;  %6123 = vmatprep.mubr.msk.f32.mxu1 %vm171_vm1, %v813_v37  ;;  %v820_v9 = vrot.slane %v6843_v35, 1  ;;  %v7211_v0 = vsel %vm1258_vm3, %v1316_v61, %v1318_v45  ;;  %v1322_v36 = vrot.slane %v6826_v32, 2  ;;  %v7216_v37 = vsel %vm1258_vm3, %v1318_v45, %v1320_v46 }
  0x6f   : > { %6176 = vmatprep.mubr.msk.f32.mxu0 %vm171_vm1, %v7180_v48  ;;  %v817_v48 = vsel %vm754_vm2, %v814_v23, %v816_v4  ;;  %9287 = vst [vmem:[#allocation21_spill] sm:$0xff] %v7216_v37  ;;  %v1324_v23 = vrot.slane %v6843_v35, 2  ;;  %v819_v53 = vsel %vm754_vm2, %v816_v4, %v818_v27  ;;  %v822_v31 = vrot.slane %v6848_v38, 1 }
  0x70   : > { %v824_v61 = vrot.slane %v6867_v43, 1  ;;  %v7229_v45 = vsel %vm1258_vm3, %v1320_v46, %v1322_v36  ;;  %v826_v35 = vrot.slane %v6977_v60, 1 }
  0x71   : > { %6124 = vmatmul.mubr.msk.f32.gmra.mrb[46].mxu1 %vm171_vm1, %v815_v2  ;;  %v1326_v2 = vrot.slane %v6848_v38, 2  ;;  %v823_v4 = vsel %vm754_vm2, %v820_v9, %v822_v31 }
  0x72   : > { %6177 = vmatmul.mubr.msk.f32.gmra.mrb[44].mxu0 %vm171_vm1, %v7193_v56  ;;  %6126 = vmatprep.mubr.msk.f32.mxu1 %vm171_vm1, %v817_v48  ;;  %v7234_v48 = vsel %vm1258_vm3, %v1322_v36, %v1324_v23 }
  0x73   : > { %6179 = vmatprep.mubr.msk.f32.mxu0 %vm171_vm1, %v7198_v19  ;;  %v821_v19 = vsel %vm754_vm2, %v818_v27, %v820_v9  ;;  %v1328_v27 = vrot.slane %v6867_v43, 2  ;;  %v7246_v46 = vsel %vm1258_vm3, %v1324_v23, %v1326_v2  ;;  %v2132_v9 = vrot.slane %v6731_v13, 3 }
  0x74   : > { %v9288_v23 = vrot.slane %v6977_v60, 2 }
  0x75   : > { %6127 = vmatmul.mubr.msk.f32.gmra.mrb[48].mxu1 %vm171_vm1, %v819_v53  ;;  %v7250_v36 = vsel %vm1258_vm3, %v1326_v2, %v1328_v27  ;;  %v2134_v2 = vrot.slane %v6736_v14, 3 }
  0x76   : > { %6180 = vmatmul.mubr.msk.f32.gmra.mrb[46].mxu0 %vm171_vm1, %v7211_v0  ;;  %6129 = vmatprep.mubr.msk.f32.mxu1 %vm171_vm1, %v821_v19  ;;  %v2131_v19 = vrot.slane %v6713_v10, 3  ;;  %v7263_v53 = vsel %vm1258_vm3, %v1328_v27, %v9288_v23  ;;  %v2138_v27 = vrot.slane %v6758_v18, 3  ;;  %v2146_v23 = vrot.slane %v6798_v26, 3 }
  0x77   : > { %6182 = vmatprep.mubr.msk.f32.mxu0 %vm171_vm1, %v7216_v37  ;;  %v825_v37 = vsel %vm754_vm2, %v822_v31, %v824_v61  ;;  %v827_v31 = vsel %vm754_vm2, %v824_v61, %v826_v35  ;;  %v2136_v35 = vrot.slane %v6753_v17, 3  ;;  %v2135_v61 = vsel %vm2130_vm4, %v2132_v9, %v2134_v2 }
  0x79   : > { %6130 = vmatmul.mubr.msk.f32.gmra.mrb[50].mxu1 %vm171_vm1, %v823_v4  ;;  %v7279_v4 = vld [vmem:[%s9218_s1 + $0x1c] sm:$0xf] }
  0x7a   : > { %6183 = vmatmul.mubr.msk.f32.gmra.mrb[48].mxu0 %vm171_vm1, %v7229_v45  ;;  %6132 = vmatprep.mubr.msk.f32.mxu1 %vm171_vm1, %v825_v37  ;;  %v2133_v37 = vsel %vm2130_vm4, %v2131_v19, %v2132_v9  ;;  %v2137_v19 = vsel %vm2130_vm4, %v2134_v2, %v2136_v35  ;;  %v7292_v9 = vld [vmem:[%s9218_s1 + $0x20] sm:$0xf]  ;;  %v2148_v2 = vrot.slane %v6813_v29, 3 }
  0x7b   : > { %6185 = vmatprep.mubr.msk.f32.mxu0 %vm171_vm1, %v7234_v48 }
  0x7d   : > { %6133 = vmatmul.mubr.msk.f32.gmra.mrb[52].mxu1 %vm171_vm1, %v827_v31  ;;  %v2144_v31 = vrot.slane %v6793_v25, 3 }
  0x7e   : > { %6186 = vmatmul.mubr.msk.f32.gmra.mrb[50].mxu0 %vm171_vm1, %v7246_v46  ;;  %6193 = vmatprep.mubr.msk.f32.mxu1 %vm171_vm1, %v6901_v58  ;;  %v2140_v58 = vrot.slane %v6773_v21, 3 }
  0x7f   : > { %6188 = vmatprep.mubr.msk.f32.mxu0 %vm171_vm1, %v7250_v36 }
  0x81   : > { %6194 = vmatmul.mubr.msk.f32.vlgmr.msra.gmra.mrb[54].mxu1 %vm171_vm1, %v6924_v1  ;;  %v2142_v1 = vrot.slane %v6778_v22, 3 }
  0x82   : > { %6189 = vmatmul.mubr.msk.f32.gmra.mrb[52].mxu0 %vm171_vm1, %v7263_v53  ;;  %6304 = vmatpush3.msk.msra.mxu1 %vm394_vm0, %v6897_v57  ;;  %v2139_v57 = vsel %vm2130_vm4, %v2136_v35, %v2138_v27  ;;  %v2152_v35 = vrot.slane %v6833_v33, 3 }
  0x83   : > { %6249 = vmatprep.mubr.msk.f32.mxu0 %vm171_vm1, %v2133_v37  ;;  %6196 = vmatprep.mubr.msk.f32.mxu1 %vm171_vm1, %v6929_v6  ;;  %v2141_v6 = vsel %vm2130_vm4, %v2138_v27, %v2140_v58  ;;  %v2150_v37 = vrot.slane %v6818_v30, 3  ;;  %v2156_v27 = vrot.slane %v6855_v39, 3 }
  0x84   : > { %6415 = vmatprep.subr.msk.mxu1 %vm394_vm0, %v7279_v4 }
  0x85   : > { %6197 = vmatmul.mubr.msk.f32.gmra.mrb[56].mxu1 %vm171_vm1, %v6944_v40  ;;  %v2145_v40 = vsel %vm2130_vm4, %v2142_v1, %v2144_v31 }
  0x86   : > { %6250 = vmatmul.mubr.msk.f32.vlgmr.msra.gmra.mrb[54].mxu0 %vm171_vm1, %v2135_v61  ;;  %6199 = vmatprep.mubr.msk.f32.mxu1 %vm171_vm1, %v6949_v44  ;;  %v2147_v44 = vsel %vm2130_vm4, %v2144_v31, %v2146_v23  ;;  %v2154_v61 = vrot.slane %v6838_v34, 3 }
  0x87   : > { %6360 = vmatpush3.msk.msra.mxu0 %vm394_vm0, %v6912_v62  ;;  %6252 = vmatprep.mubr.msk.f32.mxu0 %vm171_vm1, %v2137_v19  ;;  %v2143_v62 = vsel %vm2130_vm4, %v2140_v58, %v2142_v1  ;;  %v2158_v19 = vrot.slane %v6862_v42, 3  ;;  %v9289_v58 = vld [vmem:[#allocation13_spill] sm:$0xff] }
  0x88   : > { %6471 = vmatprep.subr.msk.mxu0 %vm394_vm0, %v7292_v9  ;;  %v2157_v34 = vsel %vm2130_vm4, %v2154_v61, %v2156_v27 }
  0x89   : > { %6200 = vmatmul.mubr.msk.f32.gmra.mrb[58].mxu1 %vm171_vm1, %v6962_v51  ;;  %v2149_v51 = vsel %vm2130_vm4, %v2146_v23, %v2148_v2 }
  0x8a   : > { %6253 = vmatmul.mubr.msk.f32.gmra.mrb[56].mxu0 %vm171_vm1, %v2139_v57  ;;  %6202 = vmatprep.mubr.msk.f32.mxu1 %vm171_vm1, %v6970_v54  ;;  %v2151_v54 = vsel %vm2130_vm4, %v2148_v2, %v2150_v37  ;;  %v2162_v57 = vrot.slane %v6681_v3, 3 }
  0x8b   : > { %6255 = vmatprep.mubr.msk.f32.mxu0 %vm171_vm1, %v2141_v6  ;;  %v9291_v6 = vld [vmem:[#allocation14_spill] sm:$0xff] }
  0x8d   : > { %6203 = vmatmul.mubr.msk.f32.gmra.mrb[60].mxu1 %vm171_vm1, %v6988_v7  ;;  %v2153_v7 = vsel %vm2130_vm4, %v2150_v37, %v2152_v35 }
  0x8e   : > { %6256 = vmatmul.mubr.msk.f32.gmra.mrb[58].mxu0 %vm171_vm1, %v2143_v62  ;;  %6205 = vmatprep.mubr.msk.f32.mxu1 %vm171_vm1, %v6993_v11  ;;  %v2155_v11 = vsel %vm2130_vm4, %v2152_v35, %v2154_v61  ;;  %v2166_v62 = vrot.slane %v6687_v5, 3 }
  0x8f   : > { %6258 = vmatprep.mubr.msk.f32.mxu0 %vm171_vm1, %v2145_v40  ;;  %v9293_v40 = vld [vmem:[#allocation15_spill] sm:$0xff] }
  0x91   : > { %6206 = vmatmul.mubr.msk.f32.gmra.mrb[62].mxu1 %vm171_vm1, %v7013_v49  ;;  %v2160_v49 = vrot.slane %v6877_v47, 3 }
  0x92   : > { %6259 = vmatmul.mubr.msk.f32.gmra.mrb[60].mxu0 %vm171_vm1, %v2147_v44  ;;  %6208 = vmatprep.mubr.msk.f32.mxu1 %vm171_vm1, %v7018_v50  ;;  %v2159_v50 = vsel %vm2130_vm4, %v2156_v27, %v2158_v19  ;;  %v2170_v44 = vrot.slane %v6721_v12, 3 }
  0x93   : > { %6261 = vmatprep.mubr.msk.f32.mxu0 %vm171_vm1, %v2149_v51  ;;  %v2161_v42 = vsel %vm2130_vm4, %v2158_v19, %v2160_v49  ;;  %v2163_v31 = vsel %vm2130_vm4, %v2160_v49, %v2162_v57  ;;  %v9294_v51 = vld [vmem:[#allocation5_spill] sm:$0xff] }
  0x94   : > { %v2174_v35 = vrot.slane %v9294_v51, 3  ;;  %v2198_v51 = vrot.slane %v6977_v60, 3  ;;  %v2635_v60 = vrot.slane %v6731_v13, 4  ;;  %v9307_v13 = vld [vmem:[#allocation12_spill] sm:$0xff] }
  0x95   : > { %6209 = vmatmul.mubr.msk.f32.gmra.mrb[64].mxu1 %vm171_vm1, %v7031_v8  ;;  %v9290_v8 = vld [vmem:[#allocation3_spill] sm:$0xff] }
  0x96   : > { %6262 = vmatmul.mubr.msk.f32.gmra.mrb[62].mxu0 %vm171_vm1, %v2151_v54  ;;  %6211 = vmatprep.mubr.msk.f32.mxu1 %vm171_vm1, %v9289_v58  ;;  %v2164_v1 = vrot.slane %v9290_v8, 3  ;;  %v9295_v54 = vld [vmem:[#allocation16_spill] sm:$0xff]  ;;  %v2182_v58 = vrot.slane %v6786_v24, 3  ;;  %v2186_v8 = vrot.slane %v6806_v28, 3 }
  0x97   : > { %6264 = vmatprep.mubr.msk.f32.mxu0 %vm171_vm1, %v2153_v7  ;;  %v9297_v7 = vld [vmem:[#allocation17_spill] sm:$0xff] }
  0x98   : > { %v2165_v3 = vsel %vm2130_vm4, %v2162_v57, %v2164_v1  ;;  %v2167_v2 = vsel %vm2130_vm4, %v2164_v1, %v2166_v62  ;;  %v9301_v57 = vld [vmem:[#allocation19_spill] sm:$0xff] }
  0x99   : > { %6212 = vmatmul.mubr.msk.f32.gmra.mrb[66].mxu1 %vm171_vm1, %v7049_v52  ;;  %v9292_v52 = vld [vmem:[#allocation4_spill] sm:$0xff] }
  0x9a   : > { %6265 = vmatmul.mubr.msk.f32.gmra.mrb[64].mxu0 %vm171_vm1, %v2155_v11  ;;  %6214 = vmatprep.mubr.msk.f32.mxu1 %vm171_vm1, %v9291_v6  ;;  %v2168_v23 = vrot.slane %v9292_v52, 3  ;;  %v9298_v11 = vld [vmem:[#allocation7_spill] sm:$0xff]  ;;  %v9303_v6 = vld [vmem:[#allocation20_spill] sm:$0xff]  ;;  %v9304_v52 = vld [vmem:[#allocation10_spill] sm:$0xff] }
  0x9b   : > { %6267 = vmatprep.mubr.msk.f32.mxu0 %vm171_vm1, %v2157_v34  ;;  %v2180_v19 = vrot.slane %v9298_v11, 3  ;;  %v9299_v34 = vld [vmem:[#allocation18_spill] sm:$0xff] }
  0x9c   : > { %v2169_v5 = vsel %vm2130_vm4, %v2166_v62, %v2168_v23  ;;  %v2171_v37 = vsel %vm2130_vm4, %v2168_v23, %v2170_v44  ;;  %v4511_v62 = vld [vmem:[%s9219_s2] sm:$0xff]  ;;  %v2192_v23 = vrot.slane %v9304_v52, 3  ;;  %v2659_v52 = vrot.slane %v6855_v39, 4 }
  0x9d   : > { %6215 = vmatmul.mubr.msk.f32.gmra.mrb[68].mxu1 %vm171_vm1, %v7067_v41  ;;  %v2172_v41 = vrot.slane %v6743_v15, 3 }
  0x9e   : > { %6268 = vmatmul.mubr.msk.f32.gmra.mrb[66].mxu0 %vm171_vm1, %v2159_v50  ;;  %6217 = vmatprep.mubr.msk.f32.mxu1 %vm171_vm1, %v9293_v40  ;;  %v9305_v40 = vld [vmem:[#allocation21_spill] sm:$0xff] }
  0x9f   : > { %6270 = vmatprep.mubr.msk.f32.mxu0 %vm171_vm1, %v2161_v42  ;;  %v2173_v12 = vsel %vm2130_vm4, %v2170_v44, %v2172_v41  ;;  %v2175_v15 = vsel %vm2130_vm4, %v2172_v41, %v2174_v35  ;;  %v2183_v42 = vsel %vm2130_vm4, %v2180_v19, %v2182_v58  ;;  %v2194_v44 = vrot.slane %v6848_v38, 3  ;;  %v4514_v38 = vld [vmem:[%s9219_s2 + $0x18] sm:$0xff] }
  0xa0   : > { %v2196_v41 = vrot.slane %v6867_v43, 3 }
  0xa1   : > { %6218 = vmatmul.mubr.msk.f32.gmra.mrb[70].mxu1 %vm171_vm1, %v7085_v59  ;;  %v9296_v59 = vld [vmem:[#allocation6_spill] sm:$0xff]  ;;  %v2195_v43 = vsel %vm2130_vm4, %v2192_v23, %v2194_v44 }
  0xa2   : > { %6271 = vmatmul.mubr.msk.f32.gmra.mrb[68].mxu0 %vm171_vm1, %v2163_v31  ;;  %6220 = vmatprep.mubr.msk.f32.mxu1 %vm171_vm1, %v7090_v63  ;;  %v2176_v61 = vrot.slane %v9296_v59, 3  ;;  %v2178_v63 = vrot.slane %v6766_v20, 3  ;;  %v9300_v20 = vld [vmem:[#allocation8_spill] sm:$0xff]  ;;  %v6628_v31 = vmov 0   ;;  %v2634_v59 = vrot.slane %v6713_v10, 4 }
  0xa3   : > { %6273 = vmatprep.mubr.msk.f32.mxu0 %vm171_vm1, %v2165_v3  ;;  %v2184_v50 = vrot.slane %v9300_v20, 3  ;;  %6541 = vset.pattern.permute.xlu0 %v6628_v31  ;;  %v4520_v20 = vld [vmem:[%s9219_s2 + $0x48] sm:$0xff] }
  0xa4   : > { %v2177_v27 = vsel %vm2130_vm4, %v2174_v35, %v2176_v61  ;;  %v2179_v49 = vsel %vm2130_vm4, %v2176_v61, %v2178_v63  ;;  %4549 = vperm.xlu0 %6541, %v4511_v62   ;;  %6542 = vset.pattern.permute.xlu1 %v6628_v31  ;;  %v9306_v35 = vld [vmem:[#allocation11_spill] sm:$0xff]  ;;  %v4517_v61 = vld [vmem:[%s9219_s2 + $0x30] sm:$0xff]  ;;  %v2636_v11 = vsel %vm394_vm0, %v2634_v59, %v2635_v60  ;;  %v2655_v31 = vrot.slane %v6833_v33, 4  ;;  %v4526_v62 = vld [vmem:[%s9219_s2 + $0x78] sm:$0xff] }
  0xa5   : > { %6221 = vmatmul.mubr.msk.f32.gmra.mrb[72].mxu1 %vm171_vm1, %v9295_v54  ;;  %v2185_v24 = vsel %vm2130_vm4, %v2182_v58, %v2184_v50  ;;  %v2187_v28 = vsel %vm2130_vm4, %v2184_v50, %v2186_v8  ;;  %v2200_v54 = vrot.slane %v9306_v35, 3  ;;  %v4521_v50 = vld [vmem:[%s9219_s2 + $0x50] sm:$0xff]  ;;  %v7619_v59 = vld [vmem:[%s6678_s23 + $0xa0] sm:$0xff] }
  0xa6   : > { %6274 = vmatmul.mubr.msk.f32.gmra.mrb[70].mxu0 %vm171_vm1, %v2167_v2  ;;  %6223 = vmatprep.mubr.msk.f32.mxu1 %vm171_vm1, %v9297_v7  ;;  %v4513_v2 = vld [vmem:[%s9219_s2 + $0x10] sm:$0xff] }
  0xa7   : > { %6276 = vmatprep.mubr.msk.f32.mxu0 %vm171_vm1, %v2169_v5  ;;  %4559 = vperm.xlu1 %6542, %v4513_v2   ;;  %v2201_v10 = vsel %vm2130_vm4, %v2198_v51, %v2200_v54 }
  0xa9   : > { %6224 = vmatmul.mubr.msk.f32.gmra.mrb[74].mxu1 %vm171_vm1, %v7157_v16  ;;  %v2181_v16 = vsel %vm2130_vm4, %v2178_v63, %v2180_v19  ;;  %v2639_v19 = vrot.slane %v6753_v17, 4  ;;  %v2641_v17 = vrot.slane %v6758_v18, 4 }
  0xaa   : > { %6277 = vmatmul.mubr.msk.f32.gmra.mrb[72].mxu0 %vm171_vm1, %v2171_v37  ;;  %6226 = vmatprep.mubr.msk.f32.mxu1 %vm171_vm1, %v9299_v34  ;;  %v7451_v37 = vld [vmem:[%s6678_s23 + $0x130] sm:$0xff]  ;;  %v4519_v34 = vld [vmem:[%s9219_s2 + $0x40] sm:$0xff] }
  0xab   : > { %6279 = vmatprep.mubr.msk.f32.mxu0 %vm171_vm1, %v2173_v12  ;;  %4564 = vperm.xlu1 %6542, %v4514_v38   ;;  %v1766_v12 = vrot.slane %v7451_v37, 2  ;;  %v2202_v7 = vrot.slane %v7451_v37, 3  ;;  %v2642_v18 = vsel %vm394_vm0, %v2639_v19, %v2641_v17 }
  0xad   : > { %6227 = vmatmul.mubr.msk.f32.gmra.mrb[76].mxu1 %vm171_vm1, %v7175_v55  ;;  %v9302_v55 = vld [vmem:[#allocation9_spill] sm:$0xff] }
  0xae   : > { %6280 = vmatmul.mubr.msk.f32.gmra.mrb[74].mxu0 %vm171_vm1, %v2175_v15  ;;  %6229 = vmatprep.mubr.msk.f32.mxu1 %vm171_vm1, %v9301_v57  ;;  %v2188_v1 = vrot.slane %v9302_v55, 3  ;;  %v9308_v15 = vrot.slane %v9306_v35, 2  ;;  %v2651_v55 = vrot.slane %v6813_v29, 4  ;;  %v2653_v29 = vrot.slane %v6818_v30, 4  ;;  %v4532_v35 = vld [vmem:[%s9219_s2 + $0xa8] sm:$0xff] }
  0xaf   : > { %6282 = vmatprep.mubr.msk.f32.mxu0 %vm171_vm1, %v2177_v27  ;;  %v2637_v27 = vrot.slane %v6736_v14, 4 }
  0xb0   : > { %v2189_v3 = vsel %vm2130_vm4, %v2186_v8, %v2188_v1  ;;  %v1767_v63 = vsel %vm1258_vm3, %v9308_v15, %v1766_v12  ;;  %v4522_v8 = vld [vmem:[%s9219_s2 + $0x58] sm:$0xff]  ;;  %v2654_v30 = vsel %vm394_vm0, %v2651_v55, %v2653_v29 }
  0xb1   : > { %6230 = vmatmul.mubr.msk.f32.gmra.mrb[78].mxu1 %vm171_vm1, %v7193_v56  ;;  %v2190_v56 = vrot.slane %v6826_v32, 3  ;;  %v4512_v32 = vld [vmem:[%s9219_s2 + $0x8] sm:$0xff]  ;;  %v2638_v14 = vsel %vm394_vm0, %v2635_v60, %v2637_v27  ;;  %v2640_v58 = vsel %vm394_vm0, %v2637_v27, %v2639_v19  ;;  %v2669_v60 = vrot.slane %v7619_v59, 4 }
  0xb2   : > { %6283 = vmatmul.mubr.msk.f32.gmra.mrb[76].mxu0 %vm171_vm1, %v2179_v49  ;;  %6232 = vmatprep.mubr.msk.f32.mxu1 %vm171_vm1, %v9303_v6  ;;  %v2203_v49 = vsel %vm2130_vm4, %v2200_v54, %v2202_v7  ;;  %v4533_v54 = vld [vmem:[%s9219_s2 + $0xb0] sm:$0xff]  ;;  %v4534_v7 = vld [vmem:[%s9219_s2 + $0xb8] sm:$0xff] }
  0xb3   : > { %6285 = vmatprep.mubr.msk.f32.mxu0 %vm171_vm1, %v2181_v16  ;;  %v2193_v5 = vsel %vm2130_vm4, %v2190_v56, %v2192_v23  ;;  %4554 = vperm.xlu0 %6541, %v4512_v32   ;;  %v2643_v16 = vrot.slane %v6773_v21, 4  ;;  %v2645_v21 = vrot.slane %v6778_v22, 4  ;;  %v4528_v23 = vld [vmem:[%s9219_s2 + $0x88] sm:$0xff]  ;;  %v7582_v32 = vld [vmem:[%s6678_s23 + $0x80] sm:$0xff] }
  0xb4   : > { %v2661_v39 = vrot.slane %v7582_v32, 4 }
  0xb5   : > { %6233 = vmatmul.mubr.msk.f32.gmra.mrb[80].mxu1 %vm171_vm1, %v7211_v0  ;;  %v2191_v0 = vsel %vm2130_vm4, %v2188_v1, %v2190_v56  ;;  %v2644_v57 = vsel %vm394_vm0, %v2641_v17, %v2643_v16  ;;  %v2646_v22 = vsel %vm394_vm0, %v2643_v16, %v2645_v21  ;;  %v4525_v1 = vld [vmem:[%s9219_s2 + $0x70] sm:$0xff] }
  0xb6   : > { %6286 = vmatmul.mubr.msk.f32.gmra.mrb[78].mxu0 %vm171_vm1, %v2183_v42  ;;  %6235 = vmatprep.mubr.msk.f32.mxu1 %vm171_vm1, %v9305_v40  ;;  %v2647_v42 = vrot.slane %v6793_v25, 4  ;;  %v2649_v25 = vrot.slane %v6798_v26, 4  ;;  %v7565_v56 = vld [vmem:[%s6678_s23 + $0x70] sm:$0xff]  ;;  %v2662_v38 = vsel %vm394_vm0, %v2659_v52, %v2661_v39 }
  0xb7   : > { %6288 = vmatprep.mubr.msk.f32.mxu0 %vm171_vm1, %v2185_v24  ;;  %v2657_v33 = vrot.slane %v7565_v56, 4  ;;  %v4529_v40 = vld [vmem:[%s9219_s2 + $0x90] sm:$0xff] }
  0xb8   : > { %v2648_v24 = vsel %vm394_vm0, %v2645_v21, %v2647_v42  ;;  %v2650_v26 = vsel %vm394_vm0, %v2647_v42, %v2649_v25  ;;  %v2652_v6 = vsel %vm394_vm0, %v2649_v25, %v2651_v55  ;;  %v271_v21 = vld [vmem:[#allocation2 + $0xa8] sm:$0xff] }
  0xb9   : > { %6236 = vmatmul.mubr.msk.f32.gmra.mrb[82].mxu1 %vm171_vm1, %v7229_v45  ;;  %v4515_v45 = vld [vmem:[%s9219_s2 + $0x20] sm:$0xff]  ;;  %v2658_v2 = vsel %vm394_vm0, %v2655_v31, %v2657_v33 }
  0xba   : > { %6289 = vmatmul.mubr.msk.f32.gmra.mrb[80].mxu0 %vm171_vm1, %v2187_v28  ;;  %6238 = vmatprep.mubr.msk.f32.mxu1 %vm171_vm1, %v7234_v48  ;;  %v2197_v48 = vsel %vm2130_vm4, %v2194_v44, %v2196_v41  ;;  %v4527_v28 = vld [vmem:[%s9219_s2 + $0x80] sm:$0xff]  ;;  %v2663_v44 = vrot.slane %v6877_v47, 4 }
  0xbb   : > { %6291 = vmatprep.mubr.msk.f32.mxu0 %vm171_vm1, %v2189_v3  ;;  %4569 = vperm.xlu0 %6541, %v4515_v45   ;;  %v2656_v3 = vsel %vm394_vm0, %v2653_v29, %v2655_v31  ;;  %v7599_v45 = vld [vmem:[%s6678_s23 + $0x90] sm:$0xff]  ;;  %v4539_v29 = vld [vmem:[%s9219_s2 + $0xe0] sm:$0xff] }
  0xbc   : > { %v2665_v47 = vrot.slane %v7599_v45, 4 }
  0xbd   : > { %6239 = vmatmul.mubr.msk.f32.gmra.mrb[84].mxu1 %vm171_vm1, %v7246_v46  ;;  %v4516_v46 = vld [vmem:[%s9219_s2 + $0x28] sm:$0xff] }
  0xbe   : > { %6292 = vmatmul.mubr.msk.f32.gmra.mrb[82].mxu0 %vm171_vm1, %v2191_v0  ;;  %6241 = vmatprep.mubr.msk.f32.mxu1 %vm171_vm1, %v7250_v36  ;;  %v2199_v36 = vsel %vm2130_vm4, %v2196_v41, %v2198_v51  ;;  %v2660_v0 = vsel %vm394_vm0, %v2657_v33, %v2659_v52  ;;  %v4531_v41 = vld [vmem:[%s9219_s2 + $0xa0] sm:$0xff]  ;;  %v7605_v51 = vld [vmem:[%s6678_s23 + $0x98] sm:$0xff]  ;;  %v2666_v12 = vsel %vm394_vm0, %v2663_v44, %v2665_v47  ;;  %v252_v33 = vld [vmem:[#allocation2 + $0x10] sm:$0xff] }
  0xbf   : > { %6294 = vmatprep.mubr.msk.f32.mxu0 %vm171_vm1, %v2193_v5  ;;  %4574 = vperm.xlu1 %6542, %v4516_v46   ;;  %v4530_v5 = vld [vmem:[%s9219_s2 + $0x98] sm:$0xff] }
  0xc0   : > { %4579 = vperm.xlu0 %6541, %v4517_v61   ;;  %v7625_v61 = vld [vmem:[%s6678_s23 + $0xa8] sm:$0xff]  ;;  %v273_v52 = vld [vmem:[#allocation2 + $0xb8] sm:$0xff] }
  0xc1   : > { %6242 = vmatmul.mubr.msk.f32.gmra.mrb[86].mxu1 %vm171_vm1, %v7263_v53  ;;  %v4518_v53 = vld [vmem:[%s9219_s2 + $0x38] sm:$0xff] }
  0xc2   : > { %6295 = vmatmul.mubr.msk.f32.gmra.mrb[84].mxu0 %vm171_vm1, %v2195_v43  ;;  %6244 = vmatprep.mubr.msk.f32.mxu1 %vm171_vm1, %v9307_v13  ;;  %v2664_v43 = vsel %vm394_vm0, %v2661_v39, %v2663_v44  ;;  %v269_v13 = vld [vmem:[#allocation2 + $0x98] sm:$0xff] }
  0xc3   : > { %6297 = vmatprep.mubr.msk.f32.mxu0 %vm171_vm1, %v2197_v48  ;;  %4584 = vperm.xlu1 %6542, %v4518_v53   ;;  %v2667_v48 = vrot.slane %v7605_v51, 4  ;;  %v7645_v53 = vld [vmem:[%s6678_s23 + $0xb8] sm:$0xff] }
  0xc4   : > { %4589 = vperm.xlu0 %6541, %v4519_v34   ;;  %v2675_v34 = vrot.slane %v7645_v53, 4 }
  0xc5   : > { %6245 = vmatmul.mubr.msk.f32.gmra.mrb[88].mxu1 %vm171_vm1, %v1767_v63  ;;  %v2668_v46 = vsel %vm394_vm0, %v2665_v47, %v2667_v48  ;;  %v2670_v15 = vsel %vm394_vm0, %v2667_v48, %v2669_v60  ;;  %v7639_v63 = vld [vmem:[%s6678_s23 + $0xb0] sm:$0xff] }
  0xc6   : > { %6298 = vmatmul.mubr.msk.f32.gmra.mrb[86].mxu0 %vm171_vm1, %v2199_v36  ;;  %6305 = vmatprep.mubr.msk.f32.mxu1 %vm171_vm1, %v2636_v11  ;;  %v2671_v36 = vrot.slane %v7625_v61, 4  ;;  %v2673_v27 = vrot.slane %v7639_v63, 4  ;;  %v268_v11 = vld [vmem:[#allocation2 + $0x90] sm:$0xff] }
  0xc7   : > { %6300 = vmatprep.mubr.msk.f32.mxu0 %vm171_vm1, %v2201_v10  ;;  %4594 = vperm.xlu1 %6542, %v4520_v20   ;;  %v4535_v10 = vld [vmem:[%s9219_s2 + $0xc0] sm:$0xff]  ;;  %v4541_v48 = vld [vmem:[%s9219_s2 + $0xf0] sm:$0xff] }
  0xc8   : > { %4599 = vperm.xlu0 %6541, %v4521_v50   ;;  %v2672_v19 = vsel %vm394_vm0, %v2669_v60, %v2671_v36  ;;  %v250_v50 = vld [vmem:[#allocation2] sm:$0xff]  ;;  %v2676_v25 = vsel %vm394_vm0, %v2673_v27, %v2675_v34 }
  0xc9   : > { %6306 = vmatmul.mubr.msk.f32.vlgmr.msra.gmra.mrb[90].mxu1 %vm171_vm1, %v2638_v14  ;;  %v4537_v14 = vld [vmem:[%s9219_s2 + $0xd0] sm:$0xff] }
  0xca   : > { %6301 = vmatmul.mubr.msk.f32.gmra.mrb[88].mxu0 %vm171_vm1, %v2203_v49  ;;  %6416 = vmatpush3.msk.msra.mxu1 %vm394_vm0, %v7279_v4  ;;  %v4523_v4 = vld [vmem:[%s9219_s2 + $0x60] sm:$0xff]  ;;  %v4536_v49 = vld [vmem:[%s9219_s2 + $0xc8] sm:$0xff] }
  0xcb   : > { %6361 = vmatprep.mubr.msk.f32.mxu0 %vm171_vm1, %v2640_v58  ;;  %6308 = vmatprep.mubr.msk.f32.mxu1 %vm171_vm1, %v2640_v58  ;;  %v251_v58 = vld [vmem:[#allocation2 + $0x8] sm:$0xff] }
  0xcc   : > { %4604 = vperm.xlu1 %6542, %v4522_v8   ;;  %4609 = vperm.xlu0 %6541, %v4523_v4   ;;  %v7659_v8 = vld [vmem:[%s6678_s23 + $0xc0] sm:$0xff] }
  0xcd   : > { %6309 = vmatmul.mubr.msk.f32.gmra.mrb[92].mxu1 %vm171_vm1, %v2642_v18  ;;  %v2677_v4 = vrot.slane %v7659_v8, 4 }
  0xce   : > { %6362 = vmatmul.mubr.msk.f32.vlgmr.msra.gmra.mrb[90].mxu0 %vm171_vm1, %v2642_v18  ;;  %6311 = vmatprep.mubr.msk.f32.mxu1 %vm171_vm1, %v2644_v57 }
  0xcf   : > { %6472 = vmatpush3.msk.msra.mxu0 %vm394_vm0, %v7292_v9  ;;  %6364 = vmatprep.mubr.msk.f32.mxu0 %vm171_vm1, %v2644_v57  ;;  %v4524_v9 = vld [vmem:[%s9219_s2 + $0x68] sm:$0xff]  ;;  %v2674_v57 = vsel %vm394_vm0, %v2671_v36, %v2673_v27  ;;  %v254_v36 = vld [vmem:[#allocation2 + $0x20] sm:$0xff] }
  0xd0   : > { %4614 = vperm.xlu1 %6542, %v4524_v9   ;;  %4619 = vperm.xlu0 %6541, %v4525_v1   ;;  %v7666_v9 = vld [vmem:[%s6678_s23 + $0xc8] sm:$0xff]  ;;  %v7707_v27 = vld [vmem:[%s6678_s23 + $0xe0] sm:$0xff] }
  0xd1   : > { %6312 = vmatmul.mubr.msk.f32.gmra.mrb[94].mxu1 %vm171_vm1, %v2646_v22  ;;  %v2679_v1 = vrot.slane %v7666_v9, 4 }
  0xd2   : > { %6365 = vmatmul.mubr.msk.f32.gmra.mrb[92].mxu0 %vm171_vm1, %v2646_v22  ;;  %6314 = vmatprep.mubr.msk.f32.mxu1 %vm171_vm1, %v2648_v24  ;;  %v270_v22 = vld [vmem:[#allocation2 + $0xa0] sm:$0xff] }
  0xd3   : > { %6367 = vmatprep.mubr.msk.f32.mxu0 %vm171_vm1, %v2648_v24  ;;  %v2680_v44 = vsel %vm394_vm0, %v2677_v4, %v2679_v1 }
  0xd4   : > { %4624 = vperm.xlu1 %6542, %v4526_v62   ;;  %4629 = vperm.xlu0 %6541, %v4527_v28   ;;  %v253_v62 = vld [vmem:[#allocation2 + $0x18] sm:$0xff] }
  0xd5   : > { %6315 = vmatmul.mubr.msk.f32.gmra.mrb[96].mxu1 %vm171_vm1, %v2650_v26 }
  0xd6   : > { %6368 = vmatmul.mubr.msk.f32.gmra.mrb[94].mxu0 %vm171_vm1, %v2650_v26  ;;  %6317 = vmatprep.mubr.msk.f32.mxu1 %vm171_vm1, %v2652_v6  ;;  %v4538_v26 = vld [vmem:[%s9219_s2 + $0xd8] sm:$0xff] }
  0xd7   : > { %6370 = vmatprep.mubr.msk.f32.mxu0 %vm171_vm1, %v2652_v6 }
  0xd8   : > { %4634 = vperm.xlu1 %6542, %v4528_v23   ;;  %4639 = vperm.xlu0 %6541, %v4529_v40   ;;  %v2678_v23 = vsel %vm394_vm0, %v2675_v34, %v2677_v4  ;;  %v256_v4 = vld [vmem:[#allocation2 + $0x30] sm:$0xff] }
  0xd9   : > { %6318 = vmatmul.mubr.msk.f32.gmra.mrb[98].mxu1 %vm171_vm1, %v2654_v30 }
  0xda   : > { %6371 = vmatmul.mubr.msk.f32.gmra.mrb[96].mxu0 %vm171_vm1, %v2654_v30  ;;  %6320 = vmatprep.mubr.msk.f32.mxu1 %vm171_vm1, %v2656_v3 }
  0xdb   : > { %6373 = vmatprep.mubr.msk.f32.mxu0 %vm171_vm1, %v2656_v3 }
  0xdc   : > { %4644 = vperm.xlu1 %6542, %v4530_v5   ;;  %4649 = vperm.xlu0 %6541, %v4531_v41  }
  0xdd   : > { %6321 = vmatmul.mubr.msk.f32.gmra.mrb[100].mxu1 %vm171_vm1, %v2658_v2 }
  0xde   : > { %6374 = vmatmul.mubr.msk.f32.gmra.mrb[98].mxu0 %vm171_vm1, %v2658_v2  ;;  %6323 = vmatprep.mubr.msk.f32.mxu1 %vm171_vm1, %v2660_v0  ;;  %v7683_v2 = vld [vmem:[%s6678_s23 + $0xd0] sm:$0xff] }
  0xdf   : > { %6376 = vmatprep.mubr.msk.f32.mxu0 %vm171_vm1, %v2660_v0  ;;  %v2681_v39 = vrot.slane %v7683_v2, 4  ;;  %v272_v0 = vld [vmem:[#allocation2 + $0xb0] sm:$0xff] }
  0xe0   : > { %4654 = vperm.xlu1 %6542, %v4532_v35   ;;  %4659 = vperm.xlu0 %6541, %v4533_v54  }
  0xe1   : > { %6324 = vmatmul.mubr.msk.f32.gmra.mrb[102].mxu1 %vm171_vm1, %v2662_v38 }
  0xe2   : > { %6377 = vmatmul.mubr.msk.f32.gmra.mrb[100].mxu0 %vm171_vm1, %v2662_v38  ;;  %6326 = vmatprep.mubr.msk.f32.mxu1 %vm171_vm1, %v2664_v43  ;;  %v7690_v38 = vld [vmem:[%s6678_s23 + $0xd8] sm:$0xff] }
  0xe3   : > { %6379 = vmatprep.mubr.msk.f32.mxu0 %vm171_vm1, %v2664_v43  ;;  %v2683_v47 = vrot.slane %v7690_v38, 4  ;;  %v4540_v43 = vld [vmem:[%s9219_s2 + $0xe8] sm:$0xff] }
  0xe4   : > { %4664 = vperm.xlu1 %6542, %v4534_v7   ;;  %4669 = vperm.xlu0 %6541, %v4535_v10   ;;  %v275_v10 = vld [vmem:[#allocation2 + $0xc8] sm:$0xff] }
  0xe5   : > { %6327 = vmatmul.mubr.msk.f32.gmra.mrb[104].mxu1 %vm171_vm1, %v2666_v12  ;;  %v2684_v34 = vsel %vm394_vm0, %v2681_v39, %v2683_v47 }
  0xe6   : > { %6380 = vmatmul.mubr.msk.f32.gmra.mrb[102].mxu0 %vm171_vm1, %v2666_v12  ;;  %6329 = vmatprep.mubr.msk.f32.mxu1 %vm171_vm1, %v2668_v46  ;;  %v255_v12 = vld [vmem:[#allocation2 + $0x28] sm:$0xff] }
  0xe7   : > { %6382 = vmatprep.mubr.msk.f32.mxu0 %vm171_vm1, %v2668_v46 }
  0xe8   : > { %v6054_v17 = vpop.f32.mrb[0].mxu1  ;;  %4674 = vperm.xlu1 %6542, %v4536_v49   ;;  %4679 = vperm.xlu0 %6541, %v4537_v14  }
  0xe9   : > { %v662_v16 = vadd.f32 %v6054_v17, %v269_v13  ;;  %v554_v20 = vpop.f32.mrb[1].mxu1  ;;  %6330 = vmatmul.mubr.msk.f32.gmra.mrb[106].mxu1 %vm171_vm1, %v2670_v15  ;;  %v2682_v13 = vsel %vm394_vm0, %v2679_v1, %v2681_v39  ;;  %v7714_v17 = vld [vmem:[%s6678_s23 + $0xe8] sm:$0xff]  ;;  %v7731_v1 = vld [vmem:[%s6678_s23 + $0xf0] sm:$0xff] }
  0xea   : > { %6383 = vmatmul.mubr.msk.f32.gmra.mrb[104].mxu0 %vm171_vm1, %v2670_v15  ;;  %v661_v18 = vadd.f32 %v554_v20, %v268_v11  ;;  %6332 = vmatprep.mubr.msk.f32.mxu1 %vm171_vm1, %v2672_v19  ;;  %v6027_v42 = vpop.f32.mrb[0].mxu0  ;;  %v2685_v11 = vrot.slane %v7707_v27, 4  ;;  %v4543_v20 = vld [vmem:[%s9219_s2 + $0x100] sm:$0xff] }
  0xeb   : > { %6385 = vmatprep.mubr.msk.f32.mxu0 %vm171_vm1, %v2672_v19  ;;  %698 = vst.msk [vmem:[#allocation2 + $0x98] sm:$0xff] %vm171_vm1, %v662_v16  ;;  %v644_v24 = vadd.f32 %v6027_v42, %v251_v58  ;;  %v464_v55 = vpop.f32.mrb[1].mxu0  ;;  %v274_v19 = vld [vmem:[#allocation2 + $0xc0] sm:$0xff]  ;;  %v2687_v58 = vrot.slane %v7714_v17, 4  ;;  %v4542_v16 = vld [vmem:[%s9219_s2 + $0xf8] sm:$0xff] }
  0xec   : > { %697 = vst.msk [vmem:[#allocation2 + $0x90] sm:$0xff] %vm171_vm1, %v661_v18  ;;  %v6057_v6 = vpop.f32.mrb[2].mxu1  ;;  %v643_v31 = vadd.f32 %v464_v55, %v250_v50  ;;  %4684 = vperm.xlu1 %6542, %v4538_v26   ;;  %4689 = vperm.xlu0 %6541, %v4539_v29   ;;  %v2689_v26 = vrot.slane %v7731_v1, 4  ;;  %v276_v29 = vld [vmem:[#allocation2 + $0xd0] sm:$0xff] }
  0xed   : > { %v664_v28 = vadd.f32 %v6057_v6, %v271_v21  ;;  %v564_v30 = vpop.f32.mrb[3].mxu1  ;;  %6333 = vmatmul.mubr.msk.f32.gmra.mrb[108].mxu1 %vm171_vm1, %v2674_v57  ;;  %680 = vst.msk [vmem:[#allocation2 + $0x8] sm:$0xff] %vm171_vm1, %v644_v24  ;;  %v257_v21 = vld [vmem:[#allocation2 + $0x38] sm:$0xff]  ;;  %v2686_v24 = vsel %vm394_vm0, %v2683_v47, %v2685_v11  ;;  %v2688_v6 = vsel %vm394_vm0, %v2685_v11, %v2687_v58 }
  0xee   : > { %6386 = vmatmul.mubr.msk.f32.gmra.mrb[106].mxu0 %vm171_vm1, %v2674_v57  ;;  %v663_v3 = vadd.f32 %v564_v30, %v270_v22  ;;  %6335 = vmatprep.mubr.msk.f32.mxu1 %vm171_vm1, %v2676_v25  ;;  %679 = vst.msk [vmem:[#allocation2] sm:$0xff] %vm171_vm1, %v643_v31  ;;  %v6030_v40 = vpop.f32.mrb[2].mxu0  ;;  %v2690_v47 = vsel %vm394_vm0, %v2687_v58, %v2689_v26  ;;  %v261_v11 = vld [vmem:[#allocation2 + $0x58] sm:$0xff] }
  0xef   : > { %6388 = vmatprep.mubr.msk.f32.mxu0 %vm171_vm1, %v2676_v25  ;;  %700 = vst.msk [vmem:[#allocation2 + $0xa8] sm:$0xff] %vm171_vm1, %v664_v28  ;;  %v646_v5 = vadd.f32 %v6030_v40, %v253_v62  ;;  %v474_v41 = vpop.f32.mrb[3].mxu0  ;;  %v277_v25 = vld [vmem:[#allocation2 + $0xd8] sm:$0xff]  ;;  %v259_v40 = vld [vmem:[#allocation2 + $0x48] sm:$0xff] }
  0xf0   : > { %699 = vst.msk [vmem:[#allocation2 + $0xa0] sm:$0xff] %vm171_vm1, %v663_v3  ;;  %v6060_v35 = vpop.f32.mrb[4].mxu1  ;;  %v645_v54 = vadd.f32 %v474_v41, %v252_v33  ;;  %4694 = vperm.xlu1 %6542, %v4540_v43   ;;  %4699 = vperm.xlu0 %6541, %v4541_v48   ;;  %v7738_v28 = vld [vmem:[%s6678_s23 + $0xf8] sm:$0xff]  ;;  %v4544_v33 = vld [vmem:[%s9219_s2 + $0x108] sm:$0xff]  ;;  %v4545_v3 = vld [vmem:[%s9219_s2 + $0x110] sm:$0xff] }
  0xf1   : > { %v666_v60 = vadd.f32 %v6060_v35, %v273_v52  ;;  %v574_v46 = vpop.f32.mrb[5].mxu1  ;;  %6336 = vmatmul.mubr.msk.f32.gmra.mrb[110].mxu1 %vm171_vm1, %v2678_v23  ;;  %682 = vst.msk [vmem:[#allocation2 + $0x18] sm:$0xff] %vm171_vm1, %v646_v5  ;;  %v2691_v30 = vrot.slane %v7738_v28, 4  ;;  %v279_v41 = vld [vmem:[#allocation2 + $0xe8] sm:$0xff]  ;;  %v7755_v48 = vld [vmem:[%s6678_s23 + $0x100] sm:$0xff]  ;;  %v281_v58 = vld [vmem:[#allocation2 + $0xf8] sm:$0xff] }
  0xf2   : > { %6389 = vmatmul.mubr.msk.f32.gmra.mrb[108].mxu0 %vm171_vm1, %v2678_v23  ;;  %v665_v7 = vadd.f32 %v574_v46, %v272_v0  ;;  %6338 = vmatprep.mubr.msk.f32.mxu1 %vm171_vm1, %v2680_v44  ;;  %681 = vst.msk [vmem:[#allocation2 + $0x10] sm:$0xff] %vm171_vm1, %v645_v54  ;;  %v6033_v15 = vpop.f32.mrb[4].mxu0  ;;  %v2693_v35 = vrot.slane %v7755_v48, 4  ;;  %v278_v54 = vld [vmem:[#allocation2 + $0xe0] sm:$0xff] }
  0xf3   : > { %6391 = vmatprep.mubr.msk.f32.mxu0 %vm171_vm1, %v2680_v44  ;;  %702 = vst.msk [vmem:[#allocation2 + $0xb8] sm:$0xff] %vm171_vm1, %v666_v60  ;;  %v648_v49 = vadd.f32 %v6033_v15, %v255_v12  ;;  %v484_v14 = vpop.f32.mrb[5].mxu0  ;;  %v258_v44 = vld [vmem:[#allocation2 + $0x40] sm:$0xff]  ;;  %v2692_v12 = vsel %vm394_vm0, %v2689_v26, %v2691_v30  ;;  %v263_v26 = vld [vmem:[#allocation2 + $0x68] sm:$0xff] }
  0xf4   : > { %701 = vst.msk [vmem:[#allocation2 + $0xb0] sm:$0xff] %vm171_vm1, %v665_v7  ;;  %v6063_v50 = vpop.f32.mrb[6].mxu1  ;;  %v647_v18 = vadd.f32 %v484_v14, %v254_v36  ;;  %4704 = vperm.xlu1 %6542, %v4542_v16   ;;  %4709 = vperm.xlu0 %6541, %v4543_v20   ;;  %v7762_v36 = vld [vmem:[%s6678_s23 + $0x108] sm:$0xff]  ;;  %v2694_v16 = vsel %vm394_vm0, %v2691_v30, %v2693_v35 }
  0xf5   : > { %v668_v57 = vadd.f32 %v6063_v50, %v275_v10  ;;  %v584_v42 = vpop.f32.mrb[7].mxu1  ;;  %6339 = vmatmul.mubr.msk.f32.gmra.mrb[112].mxu1 %vm171_vm1, %v2682_v13  ;;  %684 = vst.msk [vmem:[#allocation2 + $0x28] sm:$0xff] %vm171_vm1, %v648_v49  ;;  %v2695_v7 = vrot.slane %v7762_v36, 4  ;;  %v4546_v10 = vld [vmem:[%s9219_s2 + $0x118] sm:$0xff]  ;;  %v260_v49 = vld [vmem:[#allocation2 + $0x50] sm:$0xff]  ;;  %v283_v30 = vld [vmem:[#allocation2 + $0x108] sm:$0xff] }
  0xf6   : > { %6392 = vmatmul.mubr.msk.f32.gmra.mrb[110].mxu0 %vm171_vm1, %v2682_v13  ;;  %v667_v22 = vadd.f32 %v584_v42, %v274_v19  ;;  %6341 = vmatprep.mubr.msk.f32.mxu1 %vm171_vm1, %v2684_v34  ;;  %683 = vst.msk [vmem:[#allocation2 + $0x20] sm:$0xff] %vm171_vm1, %v647_v18  ;;  %v6036_v55 = vpop.f32.mrb[6].mxu0  ;;  %v7776_v50 = vld [vmem:[%s6678_s23 + $0x110] sm:$0xff] }
  0xf7   : > { %6394 = vmatprep.mubr.msk.f32.mxu0 %vm171_vm1, %v2684_v34  ;;  %704 = vst.msk [vmem:[#allocation2 + $0xc8] sm:$0xff] %vm171_vm1, %v668_v57  ;;  %v650_v31 = vadd.f32 %v6036_v55, %v257_v21  ;;  %v494_v62 = vpop.f32.mrb[7].mxu0  ;;  %v2697_v18 = vrot.slane %v7776_v50, 4  ;;  %v280_v21 = vld [vmem:[#allocation2 + $0xf0] sm:$0xff]  ;;  %v2696_v57 = vsel %vm394_vm0, %v2693_v35, %v2695_v7 }
  0xf8   : > { %703 = vst.msk [vmem:[#allocation2 + $0xc0] sm:$0xff] %vm171_vm1, %v667_v22  ;;  %v6066_v52 = vpop.f32.mrb[8].mxu1  ;;  %v649_v23 = vadd.f32 %v494_v62, %v256_v4  ;;  %4714 = vperm.xlu1 %6542, %v4544_v33   ;;  %4719 = vperm.xlu0 %6541, %v4545_v3   ;;  %v7783_v22 = vld [vmem:[%s6678_s23 + $0x118] sm:$0xff] }
  0xf9   : > { %v670_v39 = vadd.f32 %v6066_v52, %v277_v25  ;;  %v594_v0 = vpop.f32.mrb[9].mxu1  ;;  %6342 = vmatmul.mubr.msk.f32.gmra.mrb[114].mxu1 %vm171_vm1, %v2686_v24  ;;  %686 = vst.msk [vmem:[#allocation2 + $0x38] sm:$0xff] %vm171_vm1, %v650_v31  ;;  %v2699_v25 = vrot.slane %v7783_v22, 4  ;;  %v262_v31 = vld [vmem:[#allocation2 + $0x60] sm:$0xff]  ;;  %v2698_v33 = vsel %vm394_vm0, %v2695_v7, %v2697_v18 }
  0xfa   : > { %6395 = vmatmul.mubr.msk.f32.gmra.mrb[112].mxu0 %vm171_vm1, %v2686_v24  ;;  %v669_v5 = vadd.f32 %v594_v0, %v276_v29  ;;  %6344 = vmatprep.mubr.msk.f32.mxu1 %vm171_vm1, %v2688_v6  ;;  %685 = vst.msk [vmem:[#allocation2 + $0x30] sm:$0xff] %vm171_vm1, %v649_v23  ;;  %v6039_v43 = vpop.f32.mrb[8].mxu0  ;;  %v7794_v52 = vld [vmem:[%s6678_s23 + $0x120] sm:$0xff] }
  0xfb   : > { %6397 = vmatprep.mubr.msk.f32.mxu0 %vm171_vm1, %v2688_v6  ;;  %706 = vst.msk [vmem:[#allocation2 + $0xd8] sm:$0xff] %vm171_vm1, %v670_v39  ;;  %v652_v60 = vadd.f32 %v6039_v43, %v259_v40  ;;  %v504_v46 = vpop.f32.mrb[9].mxu0  ;;  %v2701_v23 = vrot.slane %v7794_v52, 4  ;;  %v7798_v40 = vld [vmem:[%s6678_s23 + $0x138] sm:$0xff]  ;;  %v282_v39 = vld [vmem:[#allocation2 + $0x100] sm:$0xff]  ;;  %v2700_v0 = vsel %vm394_vm0, %v2697_v18, %v2699_v25 }
  0xfc   : > { %705 = vst.msk [vmem:[#allocation2 + $0xd0] sm:$0xff] %vm171_vm1, %v669_v5  ;;  %v6069_v13 = vpop.f32.mrb[10].mxu1  ;;  %v651_v15 = vadd.f32 %v504_v46, %v258_v44  ;;  %4724 = vperm.xlu1 %6542, %v4546_v10   ;;  %v264_v46 = vld [vmem:[#allocation2 + $0x70] sm:$0xff]  ;;  %v3139_v7 = vrot.slane %v7798_v40, 4  ;;  %v7813_v10 = vld [vmem:[%s6678_s23 + $0x140] sm:$0xff] }
  0xfd   : > { %v672_v19 = vadd.f32 %v6069_v13, %v279_v41  ;;  %v604_v34 = vpop.f32.mrb[11].mxu1  ;;  %6345 = vmatmul.mubr.msk.f32.gmra.mrb[116].mxu1 %vm171_vm1, %v2690_v47  ;;  %688 = vst.msk [vmem:[#allocation2 + $0x48] sm:$0xff] %vm171_vm1, %v652_v60  ;;  %v7804_v41 = vld [vmem:[%s6678_s23 + $0x128] sm:$0xff] }
  0xfe   : > { %6398 = vmatmul.mubr.msk.f32.gmra.mrb[114].mxu0 %vm171_vm1, %v2690_v47  ;;  %v671_v14 = vadd.f32 %v604_v34, %v278_v54  ;;  %6347 = vmatprep.mubr.msk.f32.mxu1 %vm171_vm1, %v2692_v12  ;;  %687 = vst.msk [vmem:[#allocation2 + $0x40] sm:$0xff] %vm171_vm1, %v651_v15  ;;  %v6042_v20 = vpop.f32.mrb[10].mxu0  ;;  %v2703_v47 = vrot.slane %v7804_v41, 4  ;;  %v265_v54 = vld [vmem:[#allocation2 + $0x78] sm:$0xff]  ;;  %v2705_v34 = vrot.slane %v7451_v37, 4  ;;  %v267_v37 = vld [vmem:[#allocation2 + $0x88] sm:$0xff] }
  0xff   : > { %6400 = vmatprep.mubr.msk.f32.mxu0 %vm171_vm1, %v2692_v12  ;;  %708 = vst.msk [vmem:[#allocation2 + $0xe8] sm:$0xff] %vm171_vm1, %v672_v19  ;;  %v654_v42 = vadd.f32 %v6042_v20, %v261_v11  ;;  %v514_v4 = vpop.f32.mrb[11].mxu0  ;;  %v285_v15 = vld [vmem:[#allocation2 + $0x118] sm:$0xff]  ;;  %v2702_v11 = vsel %vm394_vm0, %v2699_v25, %v2701_v23  ;;  %v6567_v20 = vld [vmem:[%s6678_s23 + $0x20] sm:$0xff]  ;;  %v3141_v25 = vrot.slane %v7813_v10, 4 }
 0x100   : > { %707 = vst.msk [vmem:[#allocation2 + $0xe0] sm:$0xff] %vm171_vm1, %v671_v14  ;;  %v6072_v24 = vpop.f32.mrb[12].mxu1  ;;  %v653_v55 = vadd.f32 %v514_v4, %v260_v49  ;;  %v284_v49 = vld [vmem:[#allocation2 + $0x110] sm:$0xff]  ;;  %v2704_v14 = vsel %vm394_vm0, %v2701_v23, %v2703_v47  ;;  %v3506_v18 = vrot.slane %v6567_v20, 5 }
 0x101   : > { %v674_v29 = vadd.f32 %v6072_v24, %v281_v58  ;;  %v614_v6 = vpop.f32.mrb[13].mxu1  ;;  %6348 = vmatmul.mubr.msk.f32.gmra.mrb[118].mxu1 %vm171_vm1, %v2694_v16  ;;  %690 = vst.msk [vmem:[#allocation2 + $0x58] sm:$0xff] %vm171_vm1, %v654_v42 }
 0x102   : > { %6401 = vmatmul.mubr.msk.f32.gmra.mrb[116].mxu0 %vm171_vm1, %v2694_v16  ;;  %v673_v62 = vadd.f32 %v614_v6, %v280_v21  ;;  %6350 = vmatprep.mubr.msk.f32.mxu1 %vm171_vm1, %v2696_v57  ;;  %689 = vst.msk [vmem:[#allocation2 + $0x50] sm:$0xff] %vm171_vm1, %v653_v55  ;;  %v6045_v3 = vpop.f32.mrb[12].mxu0  ;;  %v7824_v21 = vld [vmem:[%s6678_s23 + $0x28] sm:$0xff]  ;;  %v4010_v6 = vrot.slane %v6567_v20, 6 }
 0x103   : > { %6403 = vmatprep.mubr.msk.f32.mxu0 %vm171_vm1, %v2696_v57  ;;  %710 = vst.msk [vmem:[#allocation2 + $0xf8] sm:$0xff] %vm171_vm1, %v674_v29  ;;  %v656_v44 = vadd.f32 %v6045_v3, %v263_v26  ;;  %v524_v5 = vpop.f32.mrb[13].mxu0  ;;  %v3507_v57 = vrot.slane %v7824_v21, 5  ;;  %v266_v26 = vld [vmem:[#allocation2 + $0x80] sm:$0xff]  ;;  %v3140_v29 = vsel %vm394_vm0, %v2705_v34, %v3139_v7  ;;  %v6569_v3 = vld [vmem:[%s6678_s23 + $0x30] sm:$0xff] }
 0x104   : > { %709 = vst.msk [vmem:[#allocation2 + $0xf0] sm:$0xff] %vm171_vm1, %v673_v62  ;;  %v6075_v43 = vpop.f32.mrb[14].mxu1  ;;  %v655_v35 = vadd.f32 %v524_v5, %v262_v31  ;;  %v4011_v31 = vrot.slane %v7824_v21, 6  ;;  %v3509_v23 = vrot.slane %v6569_v3, 5  ;;  %v6570_v5 = vld [vmem:[%s6678_s23 + $0x38] sm:$0xff] }
 0x105   : > { %v676_v12 = vadd.f32 %v6075_v43, %v283_v30  ;;  %v624_v60 = vpop.f32.mrb[15].mxu1  ;;  %6351 = vmatmul.mubr.msk.f32.gmra.mrb[120].mxu1 %vm171_vm1, %v2698_v33  ;;  %692 = vst.msk [vmem:[#allocation2 + $0x68] sm:$0xff] %vm171_vm1, %v656_v44  ;;  %v2706_v30 = vsel %vm394_vm0, %v2703_v47, %v2705_v34  ;;  %v3511_v43 = vrot.slane %v6570_v5, 5 }
 0x106   : > { %6404 = vmatmul.mubr.msk.f32.gmra.mrb[118].mxu0 %vm171_vm1, %v2698_v33  ;;  %v675_v13 = vadd.f32 %v624_v60, %v282_v39  ;;  %6353 = vmatprep.mubr.msk.f32.mxu1 %vm171_vm1, %v2700_v0  ;;  %691 = vst.msk [vmem:[#allocation2 + $0x60] sm:$0xff] %vm171_vm1, %v655_v35  ;;  %v6048_v19 = vpop.f32.mrb[14].mxu0  ;;  %v3508_v39 = vsel %vm3505_vm5, %v3506_v18, %v3507_v57  ;;  %v718_v35 = vld [vmem:[#allocation2 + $0x8] sm:$0xff]  ;;  %v4013_v60 = vrot.slane %v6569_v3, 6 }
 0x107   : > { %6406 = vmatprep.mubr.msk.f32.mxu0 %vm171_vm1, %v2700_v0  ;;  %712 = vst.msk [vmem:[#allocation2 + $0x108] sm:$0xff] %vm171_vm1, %v676_v12  ;;  %v658_v58 = vadd.f32 %v6048_v19, %v265_v54  ;;  %v534_v16 = vpop.f32.mrb[15].mxu0  ;;  %v3142_v12 = vsel %vm394_vm0, %v3139_v7, %v3141_v25  ;;  %v4015_v19 = vrot.slane %v6570_v5, 6  ;;  %v6572_v18 = vld [vmem:[%s6678_s23 + $0x48] sm:$0xff] }
 0x108   : > { %711 = vst.msk [vmem:[#allocation2 + $0x100] sm:$0xff] %vm171_vm1, %v675_v13  ;;  %v6078_v42 = vpop.f32.mrb[16].mxu1  ;;  %v657_v4 = vadd.f32 %v534_v16, %v264_v46  ;;  %v717_v13 = vld [vmem:[#allocation2] sm:$0xff]  ;;  %v3512_v16 = vsel %vm3505_vm5, %v3509_v23, %v3511_v43  ;;  %v3515_v21 = vrot.slane %v6572_v18, 5 }
 0x109   : > { %v678_v24 = vadd.f32 %v6078_v42, %v285_v15  ;;  %v634_v55 = vpop.f32.mrb[17].mxu1  ;;  %6354 = vmatmul.mubr.msk.f32.gmra.mrb[122].mxu1 %vm171_vm1, %v2702_v11  ;;  %694 = vst.msk [vmem:[#allocation2 + $0x78] sm:$0xff] %vm171_vm1, %v658_v58  ;;  %v720_v42 = vld [vmem:[#allocation2 + $0x18] sm:$0xff] }
 0x10a   : > { %6407 = vmatmul.mubr.msk.f32.gmra.mrb[120].mxu0 %vm171_vm1, %v2702_v11  ;;  %v677_v62 = vadd.f32 %v634_v55, %v284_v49  ;;  %6356 = vmatprep.mubr.msk.f32.mxu1 %vm171_vm1, %v2704_v14  ;;  %693 = vst.msk [vmem:[#allocation2 + $0x70] sm:$0xff] %vm171_vm1, %v657_v4  ;;  %v6051_v33 = vpop.f32.mrb[16].mxu0  ;;  %v4012_v11 = vsel %vm4009_vm6, %v4010_v6, %v4011_v31 }
 0x10b   : > { %6409 = vmatprep.mubr.msk.f32.mxu0 %vm171_vm1, %v2704_v14  ;;  %714 = vst.msk [vmem:[#allocation2 + $0x118] sm:$0xff] %vm171_vm1, %v678_v24  ;;  %v660_v0 = vadd.f32 %v6051_v33, %v267_v37  ;;  %v544_v44 = vpop.f32.mrb[17].mxu0  ;;  %v3510_v49 = vsel %vm3505_vm5, %v3507_v57, %v3509_v23  ;;  %v6571_v14 = vld [vmem:[%s6678_s23 + $0x40] sm:$0xff]  ;;  %v4014_v57 = vsel %vm4009_vm6, %v4011_v31, %v4013_v60  ;;  %v719_v24 = vld [vmem:[#allocation2 + $0x10] sm:$0xff] }
 0x10c   : > { %713 = vst.msk [vmem:[#allocation2 + $0x110] sm:$0xff] %vm171_vm1, %v677_v62  ;;  %v6083_v47 = vpop.f32.mrb[18].mxu1  ;;  %v659_v54 = vadd.f32 %v544_v44, %v266_v26  ;;  %v3513_v58 = vrot.slane %v6571_v14, 5  ;;  %v4017_v37 = vrot.slane %v6571_v14, 6  ;;  %v4016_v26 = vsel %vm4009_vm6, %v4013_v60, %v4015_v19  ;;  %v6573_v33 = vld [vmem:[%s6678_s23 + $0x50] sm:$0xff]  ;;  %v722_v44 = vld [vmem:[#allocation2 + $0x28] sm:$0xff] }
 0x10d   : > { %v1149_v46 = vadd.f32 %v6083_v47, %v718_v35  ;;  %v969_v15 = vpop.f32.mrb[19].mxu1  ;;  %6357 = vmatmul.mubr.msk.f32.gmra.mrb[124].mxu1 %vm171_vm1, %v2706_v30  ;;  %696 = vst.msk [vmem:[#allocation2 + $0x88] sm:$0xff] %vm171_vm1, %v660_v0  ;;  %v3517_v3 = vrot.slane %v6573_v33, 5  ;;  %v4021_v35 = vrot.slane %v6573_v33, 6 }
 0x10e   : > { %6410 = vmatmul.mubr.msk.f32.gmra.mrb[122].mxu0 %vm171_vm1, %v2706_v30  ;;  %v1148_v34 = vadd.f32 %v969_v15, %v717_v13  ;;  %6417 = vmatprep.mubr.msk.f32.mxu1 %vm171_vm1, %v3508_v39  ;;  %695 = vst.msk [vmem:[#allocation2 + $0x80] sm:$0xff] %vm171_vm1, %v659_v54  ;;  %v6139_v7 = vpop.f32.mrb[18].mxu0  ;;  %v3514_v62 = vsel %vm3505_vm5, %v3511_v43, %v3513_v58  ;;  %v7868_v39 = vld [vmem:[%s6678_s23 + $0x58] sm:$0xff]  ;;  %v721_v54 = vld [vmem:[#allocation2 + $0x20] sm:$0xff] }
 0x10f   : > { %6412 = vmatprep.mubr.msk.f32.mxu0 %vm171_vm1, %v3140_v29  ;;  %1185 = vst.msk [vmem:[#allocation2 + $0x8] sm:$0xff] %vm171_vm1, %v1149_v46  ;;  %v1473_v20 = vpop.f32.mrb[19].mxu0  ;;  %v4019_v29 = vrot.slane %v6572_v18, 6  ;;  %v3516_v31 = vsel %vm3505_vm5, %v3513_v58, %v3515_v21  ;;  %v3519_v0 = vrot.slane %v7868_v39, 5  ;;  %v4018_v43 = vsel %vm4009_vm6, %v4015_v19, %v4017_v37 }
 0x110   : > { %1184 = vst.msk [vmem:[#allocation2] sm:$0xff] %vm171_vm1, %v1148_v34  ;;  %v6086_v4 = vpop.f32.mrb[20].mxu1  ;;  %v4023_v46 = vrot.slane %v7868_v39, 6 }
 0x111   : > { %v1151_v25 = vadd.f32 %v6086_v4, %v720_v42  ;;  %v979_v55 = vpop.f32.mrb[21].mxu1  ;;  %6418 = vmatmul.mubr.msk.f32.vlgmr.msra.gmra.mrb[126].mxu1 %vm171_vm1, %v3510_v49  ;;  %v4020_v60 = vsel %vm4009_vm6, %v4017_v37, %v4019_v29  ;;  %v6575_v49 = vld [vmem:[%s6678_s23 + $0x60] sm:$0xff]  ;;  %v7886_v42 = vld [vmem:[%s6678_s23 + $0x68] sm:$0xff] }
 0x112   : > { %6413 = vmatmul.mubr.msk.f32.gmra.mrb[124].mxu0 %vm171_vm1, %v3142_v12  ;;  %v1150_v6 = vadd.f32 %v979_v55, %v719_v24  ;;  %6420 = vmatprep.mubr.msk.f32.mxu1 %vm171_vm1, %v3512_v16  ;;  %v6142_v30 = vpop.f32.mrb[20].mxu0  ;;  %v3521_v19 = vrot.slane %v6575_v49, 5  ;;  %v3520_v16 = vsel %vm3505_vm5, %v3517_v3, %v3519_v0  ;;  %v3523_v4 = vrot.slane %v7886_v42, 5  ;;  %v723_v55 = vld [vmem:[#allocation2 + $0x30] sm:$0xff] }
 0x113   : > { %6473 = vmatprep.mubr.msk.f32.mxu0 %vm171_vm1, %v4012_v11  ;;  %1187 = vst.msk [vmem:[#allocation2 + $0x18] sm:$0xff] %vm171_vm1, %v1151_v25  ;;  %v1483_v23 = vpop.f32.mrb[21].mxu0  ;;  %v3518_v11 = vsel %vm3505_vm5, %v3515_v21, %v3517_v3  ;;  %v4025_v25 = vrot.slane %v6575_v49, 6 }
 0x114   : > { %1186 = vst.msk [vmem:[#allocation2 + $0x10] sm:$0xff] %vm171_vm1, %v1150_v6  ;;  %v6089_v5 = vpop.f32.mrb[22].mxu1  ;;  %v4024_v6 = vsel %vm4009_vm6, %v4021_v35, %v4023_v46 }
 0x115   : > { %v1153_v47 = vadd.f32 %v6089_v5, %v722_v44  ;;  %v989_v12 = vpop.f32.mrb[23].mxu1  ;;  %6421 = vmatmul.mubr.msk.f32.gmra.mrb[128].mxu1 %vm171_vm1, %v3514_v62  ;;  %v4027_v62 = vrot.slane %v7886_v42, 6  ;;  %v3524_v5 = vsel %vm3505_vm5, %v3521_v19, %v3523_v4 }
 0x116   : > { %6474 = vmatmul.mubr.msk.f32.vlgmr.msra.gmra.mrb[126].mxu0 %vm171_vm1, %v4014_v57  ;;  %v1152_v13 = vadd.f32 %v989_v12, %v721_v54  ;;  %v1223_v15 = vld [vmem:[#allocation2 + $0x8] sm:$0xff]  ;;  %6423 = vmatprep.mubr.msk.f32.mxu1 %vm171_vm1, %v3516_v31  ;;  %v6145_v34 = vpop.f32.mrb[22].mxu0  ;;  %v724_v57 = vld [vmem:[#allocation2 + $0x38] sm:$0xff]  ;;  %v3525_v31 = vrot.slane %v7565_v56, 5 }
 0x117   : > { %6476 = vmatprep.mubr.msk.f32.mxu0 %vm171_vm1, %v4016_v26  ;;  %1189 = vst.msk [vmem:[#allocation2 + $0x28] sm:$0xff] %vm171_vm1, %v1153_v47  ;;  %v1653_v14 = vadd.f32 %v6139_v7, %v1223_v15  ;;  %v1222_v58 = vld [vmem:[#allocation2] sm:$0xff]  ;;  %v7882_v18 = vpop.f32.mrb[23].mxu0  ;;  %v4022_v7 = vsel %vm4009_vm6, %v4019_v29, %v4021_v35  ;;  %v3522_v29 = vsel %vm3505_vm5, %v3519_v0, %v3521_v19  ;;  %v7904_v35 = vld [vmem:[%s6678_s23 + $0x78] sm:$0xff]  ;;  %v726_v0 = vld [vmem:[#allocation2 + $0x48] sm:$0xff] }
 0x118   : > { %1188 = vst.msk [vmem:[#allocation2 + $0x20] sm:$0xff] %vm171_vm1, %v1152_v13  ;;  %v1652_v21 = vadd.f32 %v1473_v20, %v1222_v58  ;;  %v6092_v37 = vpop.f32.mrb[24].mxu1  ;;  %v3527_v47 = vrot.slane %v7904_v35, 5  ;;  %v725_v15 = vld [vmem:[#allocation2 + $0x40] sm:$0xff]  ;;  %v4028_v49 = vsel %vm4009_vm6, %v4025_v25, %v4027_v62  ;;  %v3529_v58 = vrot.slane %v7582_v32, 5 }
 0x119   : > { %1689 = vst.msk [vmem:[#allocation2 + $0x8] sm:$0xff] %vm171_vm1, %v1653_v14  ;;  %v1155_v24 = vadd.f32 %v6092_v37, %v724_v57  ;;  %v999_v26 = vpop.f32.mrb[25].mxu1  ;;  %6424 = vmatmul.mubr.msk.f32.gmra.mrb[130].mxu1 %vm171_vm1, %v3518_v11  ;;  %v7923_v37 = vld [vmem:[%s6678_s23 + $0x88] sm:$0xff] }
 0x11a   : > { %6477 = vmatmul.mubr.msk.f32.gmra.mrb[128].mxu0 %vm171_vm1, %v4018_v43  ;;  %1688 = vst.msk [vmem:[#allocation2] sm:$0xff] %vm171_vm1, %v1652_v21  ;;  %v1154_v20 = vadd.f32 %v999_v26, %v723_v55  ;;  %v1225_v33 = vld [vmem:[#allocation2 + $0x18] sm:$0xff]  ;;  %6426 = vmatprep.mubr.msk.f32.mxu1 %vm171_vm1, %v3520_v16  ;;  %v6148_v3 = vpop.f32.mrb[24].mxu0  ;;  %v3528_v21 = vsel %vm3505_vm5, %v3525_v31, %v3527_v47  ;;  %v4033_v55 = vrot.slane %v7582_v32, 6 }
 0x11b   : > { %6479 = vmatprep.mubr.msk.f32.mxu0 %vm171_vm1, %v4020_v60  ;;  %1191 = vst.msk [vmem:[#allocation2 + $0x38] sm:$0xff] %vm171_vm1, %v1155_v24  ;;  %v1655_v39 = vadd.f32 %v6142_v30, %v1225_v33  ;;  %v1224_v44 = vld [vmem:[#allocation2 + $0x10] sm:$0xff]  ;;  %v1503_v43 = vpop.f32.mrb[25].mxu0  ;;  %v4026_v60 = vsel %vm4009_vm6, %v4023_v46, %v4025_v25  ;;  %v4029_v30 = vrot.slane %v7565_v56, 6  ;;  %v3526_v56 = vsel %vm3505_vm5, %v3523_v4, %v3525_v31  ;;  %v728_v25 = vld [vmem:[#allocation2 + $0x58] sm:$0xff] }
 0x11c   : > { %1190 = vst.msk [vmem:[#allocation2 + $0x30] sm:$0xff] %vm171_vm1, %v1154_v20  ;;  %v1654_v54 = vadd.f32 %v1483_v23, %v1224_v44  ;;  %v6095_v12 = vpop.f32.mrb[26].mxu1  ;;  %v4031_v23 = vrot.slane %v7904_v35, 6 }
 0x11d   : > { %1691 = vst.msk [vmem:[#allocation2 + $0x18] sm:$0xff] %vm171_vm1, %v1655_v39  ;;  %v1157_v13 = vadd.f32 %v6095_v12, %v726_v0  ;;  %v1009_v11 = vpop.f32.mrb[27].mxu1  ;;  %6427 = vmatmul.mubr.msk.f32.gmra.mrb[132].mxu1 %vm171_vm1, %v3522_v29  ;;  %v4035_v29 = vrot.slane %v7923_v37, 6  ;;  %v3533_v39 = vrot.slane %v7599_v45, 5  ;;  %v3535_v0 = vrot.slane %v7605_v51, 5 }
 0x11e   : > { %6480 = vmatmul.mubr.msk.f32.gmra.mrb[130].mxu0 %vm171_vm1, %v4022_v7  ;;  %1690 = vst.msk [vmem:[#allocation2 + $0x10] sm:$0xff] %vm171_vm1, %v1654_v54  ;;  %v1156_v19 = vadd.f32 %v1009_v11, %v725_v15  ;;  %v1227_v14 = vld [vmem:[#allocation2 + $0x28] sm:$0xff]  ;;  %6429 = vmatprep.mubr.msk.f32.mxu1 %vm171_vm1, %v3524_v5  ;;  %v6151_v46 = vpop.f32.mrb[26].mxu0  ;;  %v3531_v7 = vrot.slane %v7923_v37, 5  ;;  %v4032_v33 = vsel %vm4009_vm6, %v4029_v30, %v4031_v23  ;;  %v729_v15 = vld [vmem:[#allocation2 + $0x60] sm:$0xff] }
 0x11f   : > { %6482 = vmatprep.mubr.msk.f32.mxu0 %vm171_vm1, %v4024_v6  ;;  %1193 = vst.msk [vmem:[#allocation2 + $0x48] sm:$0xff] %vm171_vm1, %v1157_v13  ;;  %v1657_v16 = vadd.f32 %v6145_v34, %v1227_v14  ;;  %v1226_v42 = vld [vmem:[#allocation2 + $0x20] sm:$0xff]  ;;  %v1513_v57 = vpop.f32.mrb[27].mxu0  ;;  %v4030_v34 = vsel %vm4009_vm6, %v4027_v62, %v4029_v30  ;;  %v727_v6 = vld [vmem:[#allocation2 + $0x50] sm:$0xff]  ;;  %v3530_v62 = vsel %vm3505_vm5, %v3527_v47, %v3529_v58  ;;  %v4037_v13 = vrot.slane %v7599_v45, 6 }
 0x120   : > { %1192 = vst.msk [vmem:[#allocation2 + $0x40] sm:$0xff] %vm171_vm1, %v1156_v19  ;;  %v1656_v4 = vadd.f32 %v7882_v18, %v1226_v42  ;;  %v6098_v24 = vpop.f32.mrb[28].mxu1  ;;  %v3532_v35 = vsel %vm3505_vm5, %v3529_v58, %v3531_v7  ;;  %v4034_v47 = vsel %vm4009_vm6, %v4031_v23, %v4033_v55  ;;  %v4039_v19 = vrot.slane %v7605_v51, 6 }
 0x121   : > { %1693 = vst.msk [vmem:[#allocation2 + $0x28] sm:$0xff] %vm171_vm1, %v1657_v16  ;;  %v1159_v26 = vadd.f32 %v6098_v24, %v728_v25  ;;  %v1019_v20 = vpop.f32.mrb[29].mxu1  ;;  %6430 = vmatmul.mubr.msk.f32.gmra.mrb[134].mxu1 %vm171_vm1, %v3526_v56  ;;  %v3534_v23 = vsel %vm3505_vm5, %v3531_v7, %v3533_v39  ;;  %v3537_v56 = vrot.slane %v7619_v59, 5  ;;  %v3536_v42 = vsel %vm3505_vm5, %v3533_v39, %v3535_v0 }
 0x122   : > { %6483 = vmatmul.mubr.msk.f32.gmra.mrb[132].mxu0 %vm171_vm1, %v4026_v60  ;;  %1692 = vst.msk [vmem:[#allocation2 + $0x20] sm:$0xff] %vm171_vm1, %v1656_v4  ;;  %v1158_v18 = vadd.f32 %v1019_v20, %v727_v6  ;;  %v1229_v31 = vld [vmem:[#allocation2 + $0x38] sm:$0xff]  ;;  %6432 = vmatprep.mubr.msk.f32.mxu1 %vm171_vm1, %v3528_v21  ;;  %v6154_v32 = vpop.f32.mrb[28].mxu0  ;;  %v730_v60 = vld [vmem:[#allocation2 + $0x68] sm:$0xff]  ;;  %v3539_v51 = vrot.slane %v7625_v61, 5  ;;  %v4038_v7 = vsel %vm4009_vm6, %v4035_v29, %v4037_v13  ;;  %v4041_v24 = vrot.slane %v7619_v59, 6 }
 0x123   : > { %6485 = vmatprep.mubr.msk.f32.mxu0 %vm171_vm1, %v4028_v49  ;;  %1195 = vst.msk [vmem:[#allocation2 + $0x58] sm:$0xff] %vm171_vm1, %v1159_v26  ;;  %v1659_v44 = vadd.f32 %v6148_v3, %v1229_v31  ;;  %v1228_v5 = vld [vmem:[#allocation2 + $0x30] sm:$0xff]  ;;  %v1523_v54 = vpop.f32.mrb[29].mxu0  ;;  %v4036_v49 = vsel %vm4009_vm6, %v4033_v55, %v4035_v29  ;;  %v732_v4 = vld [vmem:[#allocation2 + $0x78] sm:$0xff]  ;;  %v4040_v26 = vsel %vm4009_vm6, %v4037_v13, %v4039_v19  ;;  %v4043_v6 = vrot.slane %v7625_v61, 6 }
 0x124   : > { %1194 = vst.msk [vmem:[#allocation2 + $0x50] sm:$0xff] %vm171_vm1, %v1158_v18  ;;  %v1658_v12 = vadd.f32 %v1503_v43, %v1228_v5  ;;  %v6101_v30 = vpop.f32.mrb[30].mxu1  ;;  %v3541_v29 = vrot.slane %v7639_v63, 5  ;;  %v3543_v61 = vrot.slane %v7645_v53, 5  ;;  %v734_v5 = vld [vmem:[#allocation2 + $0x88] sm:$0xff]  ;;  %v4047_v13 = vrot.slane %v7645_v53, 6 }
 0x125   : > { %1695 = vst.msk [vmem:[#allocation2 + $0x38] sm:$0xff] %vm171_vm1, %v1659_v44  ;;  %v1161_v3 = vadd.f32 %v6101_v30, %v730_v60  ;;  %v1029_v11 = vpop.f32.mrb[31].mxu1  ;;  %6433 = vmatmul.mubr.msk.f32.gmra.mrb[136].mxu1 %vm171_vm1, %v3530_v62  ;;  %v3540_v62 = vsel %vm3505_vm5, %v3537_v56, %v3539_v51  ;;  %v733_v60 = vld [vmem:[#allocation2 + $0x80] sm:$0xff]  ;;  %v3547_v53 = vrot.slane %v7666_v9, 5 }
 0x126   : > { %6486 = vmatmul.mubr.msk.f32.gmra.mrb[134].mxu0 %vm171_vm1, %v4030_v34  ;;  %1694 = vst.msk [vmem:[#allocation2 + $0x30] sm:$0xff] %vm171_vm1, %v1658_v12  ;;  %v1160_v43 = vadd.f32 %v1029_v11, %v729_v15  ;;  %v1231_v14 = vld [vmem:[#allocation2 + $0x48] sm:$0xff]  ;;  %6435 = vmatprep.mubr.msk.f32.mxu1 %vm171_vm1, %v3532_v35  ;;  %v6157_v45 = vpop.f32.mrb[30].mxu0  ;;  %v731_v34 = vld [vmem:[#allocation2 + $0x70] sm:$0xff]  ;;  %v4045_v12 = vrot.slane %v7639_v63, 6  ;;  %v3542_v15 = vsel %vm3505_vm5, %v3539_v51, %v3541_v29  ;;  %v3545_v11 = vrot.slane %v7659_v8, 5 }
 0x127   : > { %6488 = vmatprep.mubr.msk.f32.mxu0 %vm171_vm1, %v4032_v33  ;;  %1197 = vst.msk [vmem:[#allocation2 + $0x68] sm:$0xff] %vm171_vm1, %v1161_v3  ;;  %v1661_v58 = vadd.f32 %v6151_v46, %v1231_v14  ;;  %v1230_v16 = vld [vmem:[#allocation2 + $0x40] sm:$0xff]  ;;  %v1533_v21 = vpop.f32.mrb[31].mxu0  ;;  %v3538_v33 = vsel %vm3505_vm5, %v3535_v0, %v3537_v56  ;;  %v4042_v0 = vsel %vm4009_vm6, %v4039_v19, %v4041_v24  ;;  %v736_v56 = vld [vmem:[#allocation2 + $0x98] sm:$0xff]  ;;  %v735_v51 = vld [vmem:[#allocation2 + $0x90] sm:$0xff] }
 0x128   : > { %1196 = vst.msk [vmem:[#allocation2 + $0x60] sm:$0xff] %vm171_vm1, %v1160_v43  ;;  %v1660_v37 = vadd.f32 %v1513_v57, %v1230_v16  ;;  %v6104_v25 = vpop.f32.mrb[32].mxu1  ;;  %v3544_v43 = vsel %vm3505_vm5, %v3541_v29, %v3543_v61  ;;  %v4046_v16 = vsel %vm4009_vm6, %v4043_v6, %v4045_v12 }
 0x129   : > { %1697 = vst.msk [vmem:[#allocation2 + $0x48] sm:$0xff] %vm171_vm1, %v1661_v58  ;;  %v1163_v46 = vadd.f32 %v6104_v25, %v732_v4  ;;  %v1039_v55 = vpop.f32.mrb[33].mxu1  ;;  %6436 = vmatmul.mubr.msk.f32.gmra.mrb[138].mxu1 %vm171_vm1, %v3534_v23  ;;  %v4048_v4 = vsel %vm4009_vm6, %v4045_v12, %v4047_v13  ;;  %v4051_v25 = vrot.slane %v7666_v9, 6  ;;  %v3551_v9 = vrot.slane %v7690_v38, 5 }
 0x12a   : > { %6489 = vmatmul.mubr.msk.f32.gmra.mrb[136].mxu0 %vm171_vm1, %v4034_v47  ;;  %1696 = vst.msk [vmem:[#allocation2 + $0x40] sm:$0xff] %vm171_vm1, %v1660_v37  ;;  %v1162_v57 = vadd.f32 %v1039_v55, %v731_v34  ;;  %v1233_v20 = vld [vmem:[#allocation2 + $0x58] sm:$0xff]  ;;  %6438 = vmatprep.mubr.msk.f32.mxu1 %vm171_vm1, %v3536_v42  ;;  %v6160_v59 = vpop.f32.mrb[32].mxu0  ;;  %v4044_v47 = vsel %vm4009_vm6, %v4041_v24, %v4043_v6  ;;  %v4049_v42 = vrot.slane %v7659_v8, 6 }
 0x12b   : > { %6491 = vmatprep.mubr.msk.f32.mxu0 %vm171_vm1, %v4036_v49  ;;  %1199 = vst.msk [vmem:[#allocation2 + $0x78] sm:$0xff] %vm171_vm1, %v1163_v46  ;;  %v1663_v18 = vadd.f32 %v6154_v32, %v1233_v20  ;;  %v1232_v31 = vld [vmem:[#allocation2 + $0x50] sm:$0xff]  ;;  %v1543_v39 = vpop.f32.mrb[33].mxu0  ;;  %v3546_v24 = vsel %vm3505_vm5, %v3543_v61, %v3545_v11  ;;  %v3549_v46 = vrot.slane %v7683_v2, 5  ;;  %v738_v20 = vld [vmem:[#allocation2 + $0xa8] sm:$0xff] }
 0x12c   : > { %1198 = vst.msk [vmem:[#allocation2 + $0x70] sm:$0xff] %vm171_vm1, %v1162_v57  ;;  %v1662_v44 = vadd.f32 %v1523_v54, %v1232_v31  ;;  %v6107_v35 = vpop.f32.mrb[34].mxu1  ;;  %v4050_v29 = vsel %vm4009_vm6, %v4047_v13, %v4049_v42  ;;  %v737_v31 = vld [vmem:[#allocation2 + $0xa0] sm:$0xff]  ;;  %v4052_v61 = vsel %vm4009_vm6, %v4049_v42, %v4051_v25  ;;  %v740_v13 = vld [vmem:[#allocation2 + $0xb8] sm:$0xff] }
 0x12d   : > { %1699 = vst.msk [vmem:[#allocation2 + $0x58] sm:$0xff] %vm171_vm1, %v1663_v18  ;;  %v1165_v32 = vadd.f32 %v6107_v35, %v734_v5  ;;  %v1049_v30 = vpop.f32.mrb[35].mxu1  ;;  %6439 = vmatmul.mubr.msk.f32.gmra.mrb[140].mxu1 %vm171_vm1, %v3538_v33  ;;  %v4053_v18 = vrot.slane %v7683_v2, 6  ;;  %v3550_v35 = vsel %vm3505_vm5, %v3547_v53, %v3549_v46 }
 0x12e   : > { %6492 = vmatmul.mubr.msk.f32.gmra.mrb[138].mxu0 %vm171_vm1, %v4038_v7  ;;  %1698 = vst.msk [vmem:[#allocation2 + $0x50] sm:$0xff] %vm171_vm1, %v1662_v44  ;;  %v1164_v54 = vadd.f32 %v1049_v30, %v733_v60  ;;  %v1235_v3 = vld [vmem:[#allocation2 + $0x68] sm:$0xff]  ;;  %6441 = vmatprep.mubr.msk.f32.mxu1 %vm171_vm1, %v3540_v62  ;;  %v6163_v63 = vpop.f32.mrb[34].mxu0  ;;  %v4055_v44 = vrot.slane %v7690_v38, 6  ;;  %v3552_v60 = vsel %vm3505_vm5, %v3549_v46, %v3551_v9  ;;  %v3555_v38 = vrot.slane %v7714_v17, 5 }
 0x12f   : > { %6494 = vmatprep.mubr.msk.f32.mxu0 %vm171_vm1, %v4040_v26  ;;  %1201 = vst.msk [vmem:[#allocation2 + $0x88] sm:$0xff] %vm171_vm1, %v1165_v32  ;;  %v1665_v49 = vadd.f32 %v6157_v45, %v1235_v3  ;;  %v1234_v19 = vld [vmem:[#allocation2 + $0x60] sm:$0xff]  ;;  %v1553_v14 = vpop.f32.mrb[35].mxu0  ;;  %v3548_v26 = vsel %vm3505_vm5, %v3545_v11, %v3547_v53  ;;  %v4054_v3 = vsel %vm4009_vm6, %v4051_v25, %v4053_v18  ;;  %v739_v11 = vld [vmem:[#allocation2 + $0xb0] sm:$0xff] }
 0x130   : > { %1200 = vst.msk [vmem:[#allocation2 + $0x80] sm:$0xff] %vm171_vm1, %v1164_v54  ;;  %v1664_v23 = vadd.f32 %v1533_v21, %v1234_v19  ;;  %v6110_v58 = vpop.f32.mrb[36].mxu1  ;;  %v4056_v19 = vsel %vm4009_vm6, %v4053_v18, %v4055_v44 }
 0x131   : > { %1701 = vst.msk [vmem:[#allocation2 + $0x68] sm:$0xff] %vm171_vm1, %v1665_v49  ;;  %v1167_v45 = vadd.f32 %v6110_v58, %v736_v56  ;;  %v1059_v37 = vpop.f32.mrb[37].mxu1  ;;  %6442 = vmatmul.mubr.msk.f32.gmra.mrb[142].mxu1 %vm171_vm1, %v3542_v15  ;;  %v4057_v15 = vrot.slane %v7707_v27, 6  ;;  %v3557_v56 = vrot.slane %v7731_v1, 5 }
 0x132   : > { %6495 = vmatmul.mubr.msk.f32.gmra.mrb[140].mxu0 %vm171_vm1, %v4042_v0  ;;  %1700 = vst.msk [vmem:[#allocation2 + $0x60] sm:$0xff] %vm171_vm1, %v1664_v23  ;;  %v1166_v21 = vadd.f32 %v1059_v37, %v735_v51  ;;  %v1237_v7 = vld [vmem:[#allocation2 + $0x78] sm:$0xff]  ;;  %6444 = vmatprep.mubr.msk.f32.mxu1 %vm171_vm1, %v3544_v43  ;;  %v6166_v8 = vpop.f32.mrb[36].mxu0  ;;  %v3553_v0 = vrot.slane %v7707_v27, 5  ;;  %v4059_v43 = vrot.slane %v7714_v17, 6  ;;  %v3559_v17 = vrot.slane %v7738_v28, 5 }
 0x133   : > { %6497 = vmatprep.mubr.msk.f32.mxu0 %vm171_vm1, %v4044_v47  ;;  %1203 = vst.msk [vmem:[#allocation2 + $0x98] sm:$0xff] %vm171_vm1, %v1167_v45  ;;  %v1667_v34 = vadd.f32 %v6160_v59, %v1237_v7  ;;  %v1236_v55 = vld [vmem:[#allocation2 + $0x70] sm:$0xff]  ;;  %v1563_v6 = vpop.f32.mrb[37].mxu0  ;;  %v742_v37 = vld [vmem:[#allocation2 + $0xc8] sm:$0xff]  ;;  %v4058_v25 = vsel %vm4009_vm6, %v4055_v44, %v4057_v15 }
 0x134   : > { %1202 = vst.msk [vmem:[#allocation2 + $0x90] sm:$0xff] %vm171_vm1, %v1166_v21  ;;  %v1666_v57 = vadd.f32 %v1543_v39, %v1236_v55  ;;  %v6113_v33 = vpop.f32.mrb[38].mxu1  ;;  %v3554_v23 = vsel %vm3505_vm5, %v3551_v9, %v3553_v0  ;;  %v3556_v42 = vsel %vm3505_vm5, %v3553_v0, %v3555_v38  ;;  %v4061_v21 = vrot.slane %v7731_v1, 6 }
 0x135   : > { %1703 = vst.msk [vmem:[#allocation2 + $0x78] sm:$0xff] %vm171_vm1, %v1667_v34  ;;  %v1169_v59 = vadd.f32 %v6113_v33, %v738_v20  ;;  %v1069_v62 = vpop.f32.mrb[39].mxu1  ;;  %6445 = vmatmul.mubr.msk.f32.gmra.mrb[144].mxu1 %vm171_vm1, %v3546_v24  ;;  %v741_v24 = vld [vmem:[#allocation2 + $0xc0] sm:$0xff]  ;;  %v4060_v46 = vsel %vm4009_vm6, %v4057_v15, %v4059_v43  ;;  %v4063_v34 = vrot.slane %v7738_v28, 6  ;;  %v3561_v9 = vrot.slane %v7755_v48, 5 }
 0x136   : > { %6498 = vmatmul.mubr.msk.f32.gmra.mrb[142].mxu0 %vm171_vm1, %v4046_v16  ;;  %1702 = vst.msk [vmem:[#allocation2 + $0x70] sm:$0xff] %vm171_vm1, %v1666_v57  ;;  %v1168_v39 = vadd.f32 %v1069_v62, %v737_v31  ;;  %v1239_v5 = vld [vmem:[#allocation2 + $0x88] sm:$0xff]  ;;  %6447 = vmatprep.mubr.msk.f32.mxu1 %vm171_vm1, %v3548_v26  ;;  %v6169_v2 = vpop.f32.mrb[38].mxu0  ;;  %v3560_v33 = vsel %vm3505_vm5, %v3557_v56, %v3559_v17  ;;  %v3563_v28 = vrot.slane %v7762_v36, 5 }
 0x137   : > { %6500 = vmatprep.mubr.msk.f32.mxu0 %vm171_vm1, %v4048_v4  ;;  %1205 = vst.msk [vmem:[#allocation2 + $0xa8] sm:$0xff] %vm171_vm1, %v1169_v59  ;;  %v1669_v12 = vadd.f32 %v6163_v63, %v1239_v5  ;;  %v1238_v32 = vld [vmem:[#allocation2 + $0x80] sm:$0xff]  ;;  %v1573_v30 = vpop.f32.mrb[39].mxu0  ;;  %v744_v59 = vld [vmem:[#allocation2 + $0xd8] sm:$0xff]  ;;  %v4062_v62 = vsel %vm4009_vm6, %v4059_v43, %v4061_v21 }
 0x138   : > { %1204 = vst.msk [vmem:[#allocation2 + $0xa0] sm:$0xff] %vm171_vm1, %v1168_v39  ;;  %v1668_v47 = vadd.f32 %v1553_v14, %v1238_v32  ;;  %v6116_v54 = vpop.f32.mrb[40].mxu1  ;;  %v743_v39 = vld [vmem:[#allocation2 + $0xd0] sm:$0xff]  ;;  %v3562_v32 = vsel %vm3505_vm5, %v3559_v17, %v3561_v9 }
 0x139   : > { %1705 = vst.msk [vmem:[#allocation2 + $0x88] sm:$0xff] %vm171_vm1, %v1669_v12  ;;  %v1171_v63 = vadd.f32 %v6116_v54, %v740_v13  ;;  %v1079_v49 = vpop.f32.mrb[41].mxu1  ;;  %6448 = vmatmul.mubr.msk.f32.gmra.mrb[146].mxu1 %vm171_vm1, %v3550_v35  ;;  %v4064_v35 = vsel %vm4009_vm6, %v4061_v21, %v4063_v34  ;;  %v4073_v21 = vrot.slane %v7794_v52, 6 }
 0x13a   : > { %6501 = vmatmul.mubr.msk.f32.gmra.mrb[144].mxu0 %vm171_vm1, %v4050_v29  ;;  %1704 = vst.msk [vmem:[#allocation2 + $0x80] sm:$0xff] %vm171_vm1, %v1668_v47  ;;  %v1170_v14 = vadd.f32 %v1079_v49, %v739_v11  ;;  %v1241_v53 = vld [vmem:[#allocation2 + $0x98] sm:$0xff]  ;;  %6450 = vmatprep.mubr.msk.f32.mxu1 %vm171_vm1, %v3552_v60  ;;  %v6172_v27 = vpop.f32.mrb[40].mxu0  ;;  %v3565_v60 = vrot.slane %v7776_v50, 5  ;;  %v3564_v47 = vsel %vm3505_vm5, %v3561_v9, %v3563_v28  ;;  %v4069_v11 = vrot.slane %v7776_v50, 6 }
 0x13b   : > { %6503 = vmatprep.mubr.msk.f32.mxu0 %vm171_vm1, %v4052_v61  ;;  %1207 = vst.msk [vmem:[#allocation2 + $0xb8] sm:$0xff] %vm171_vm1, %v1171_v63  ;;  %v1671_v58 = vadd.f32 %v6166_v8, %v1241_v53  ;;  %v1240_v16 = vld [vmem:[#allocation2 + $0x90] sm:$0xff]  ;;  %v1583_v45 = vpop.f32.mrb[41].mxu0  ;;  %v4065_v61 = vrot.slane %v7755_v48, 6  ;;  %v4071_v53 = vrot.slane %v7783_v22, 6 }
 0x13c   : > { %1206 = vst.msk [vmem:[#allocation2 + $0xb0] sm:$0xff] %vm171_vm1, %v1170_v14  ;;  %v1670_v51 = vadd.f32 %v1563_v6, %v1240_v16  ;;  %v6119_v4 = vpop.f32.mrb[42].mxu1  ;;  %v3558_v6 = vsel %vm3505_vm5, %v3555_v38, %v3557_v56  ;;  %v3566_v56 = vsel %vm3505_vm5, %v3563_v28, %v3565_v60 }
 0x13d   : > { %1707 = vst.msk [vmem:[#allocation2 + $0x98] sm:$0xff] %vm171_vm1, %v1671_v58  ;;  %v1173_v7 = vadd.f32 %v6119_v4, %v742_v37  ;;  %v1089_v8 = vpop.f32.mrb[43].mxu1  ;;  %6451 = vmatmul.mubr.msk.f32.gmra.mrb[148].mxu1 %vm171_vm1, %v3554_v23  ;;  %v4066_v63 = vsel %vm4009_vm6, %v4063_v34, %v4065_v61  ;;  %v3569_v58 = vrot.slane %v7794_v52, 5  ;;  %v748_v37 = vld [vmem:[#allocation2 + $0xf8] sm:$0xff]  ;;  %v4075_v34 = vrot.slane %v7804_v41, 6 }
 0x13e   : > { %6504 = vmatmul.mubr.msk.f32.gmra.mrb[146].mxu0 %vm171_vm1, %v4054_v3  ;;  %1706 = vst.msk [vmem:[#allocation2 + $0x90] sm:$0xff] %vm171_vm1, %v1670_v51  ;;  %v1172_v55 = vadd.f32 %v1089_v8, %v741_v24  ;;  %v1243_v26 = vld [vmem:[#allocation2 + $0xa8] sm:$0xff]  ;;  %6453 = vmatprep.mubr.msk.f32.mxu1 %vm171_vm1, %v3556_v42  ;;  %v747_v24 = vld [vmem:[#allocation2 + $0xf0] sm:$0xff] }
 0x13f   : > { %6506 = vmatprep.mubr.msk.f32.mxu0 %vm171_vm1, %v4056_v19  ;;  %1209 = vst.msk [vmem:[#allocation2 + $0xc8] sm:$0xff] %vm171_vm1, %v1173_v7  ;;  %v1673_v57 = vadd.f32 %v6169_v2, %v1243_v26  ;;  %v1242_v20 = vld [vmem:[#allocation2 + $0xa0] sm:$0xff]  ;;  %v4067_v2 = vrot.slane %v7762_v36, 6  ;;  %v3567_v36 = vrot.slane %v7783_v22, 5  ;;  %v746_v3 = vld [vmem:[#allocation2 + $0xe8] sm:$0xff]  ;;  %v3571_v22 = vrot.slane %v7804_v41, 5 }
 0x140   : > { %1208 = vst.msk [vmem:[#allocation2 + $0xc0] sm:$0xff] %vm171_vm1, %v1172_v55  ;;  %v1672_v18 = vadd.f32 %v1573_v30, %v1242_v20  ;;  %v6122_v31 = vpop.f32.mrb[44].mxu1  ;;  %v745_v19 = vld [vmem:[#allocation2 + $0xe0] sm:$0xff]  ;;  %v3575_v41 = vrot.slane %v7798_v40, 5  ;;  %v6580_v40 = vld [vmem:[%s6678_s23 + $0x138] sm:$0xff] }
 0x141   : > { %v6175_v1 = vpop.f32.mrb[42].mxu0  ;;  %1709 = vst.msk [vmem:[#allocation2 + $0xa8] sm:$0xff] %vm171_vm1, %v1673_v57  ;;  %v1175_v44 = vadd.f32 %v6122_v31, %v744_v59  ;;  %v1099_v5 = vpop.f32.mrb[45].mxu1  ;;  %6454 = vmatmul.mubr.msk.f32.gmra.mrb[150].mxu1 %vm171_vm1, %v3558_v6  ;;  %v4068_v14 = vsel %vm4009_vm6, %v4065_v61, %v4067_v2  ;;  %v3570_v6 = vsel %vm3505_vm5, %v3567_v36, %v3569_v58 }
 0x142   : > { %v1593_v29 = vpop.f32.mrb[43].mxu0  ;;  %6507 = vmatmul.mubr.msk.f32.gmra.mrb[148].mxu0 %vm171_vm1, %v4058_v25  ;;  %1708 = vst.msk [vmem:[#allocation2 + $0xa0] sm:$0xff] %vm171_vm1, %v1672_v18  ;;  %v1174_v0 = vadd.f32 %v1099_v5, %v743_v39  ;;  %v1245_v12 = vld [vmem:[#allocation2 + $0xb8] sm:$0xff]  ;;  %6456 = vmatprep.mubr.msk.f32.mxu1 %vm171_vm1, %v3560_v33  ;;  %v4070_v25 = vsel %vm4009_vm6, %v4067_v2, %v4069_v11  ;;  %v750_v18 = vld [vmem:[#allocation2 + $0x108] sm:$0xff] }
 0x143   : > { %6509 = vmatprep.mubr.msk.f32.mxu0 %vm171_vm1, %v4060_v46  ;;  %1211 = vst.msk [vmem:[#allocation2 + $0xd8] sm:$0xff] %vm171_vm1, %v1175_v44  ;;  %v1675_v30 = vadd.f32 %v6172_v27, %v1245_v12  ;;  %v1244_v38 = vld [vmem:[#allocation2 + $0xb0] sm:$0xff]  ;;  %v4072_v46 = vsel %vm4009_vm6, %v4069_v11, %v4071_v53  ;;  %v3572_v33 = vsel %vm3505_vm5, %v3569_v58, %v3571_v22  ;;  %v749_v44 = vld [vmem:[#allocation2 + $0x100] sm:$0xff] }
 0x144   : > { %1210 = vst.msk [vmem:[#allocation2 + $0xd0] sm:$0xff] %vm171_vm1, %v1174_v0  ;;  %v1674_v54 = vadd.f32 %v1583_v45, %v1244_v38  ;;  %v6125_v15 = vpop.f32.mrb[46].mxu1  ;;  %v3568_v45 = vsel %vm3505_vm5, %v3565_v60, %v3567_v36  ;;  %v4074_v31 = vsel %vm4009_vm6, %v4071_v53, %v4073_v21  ;;  %v4076_v5 = vsel %vm4009_vm6, %v4073_v21, %v4075_v34  ;;  %v752_v36 = vld [vmem:[#allocation2 + $0x118] sm:$0xff]  ;;  %v751_v11 = vld [vmem:[#allocation2 + $0x110] sm:$0xff] }
 0x145   : > { %v6178_v48 = vpop.f32.mrb[44].mxu0  ;;  %1711 = vst.msk [vmem:[#allocation2 + $0xb8] sm:$0xff] %vm171_vm1, %v1675_v30  ;;  %v1177_v49 = vadd.f32 %v6125_v15, %v746_v3  ;;  %v1109_v43 = vpop.f32.mrb[47].mxu1  ;;  %6457 = vmatmul.mubr.msk.f32.gmra.mrb[152].mxu1 %vm171_vm1, %v3562_v32  ;;  %v6581_v15 = vld [vmem:[%s6678_s23 + $0x140] sm:$0xff] }
 0x146   : > { %v1603_v13 = vpop.f32.mrb[45].mxu0  ;;  %6510 = vmatmul.mubr.msk.f32.gmra.mrb[150].mxu0 %vm171_vm1, %v4062_v62  ;;  %1710 = vst.msk [vmem:[#allocation2 + $0xb0] sm:$0xff] %vm171_vm1, %v1674_v54  ;;  %v1176_v23 = vadd.f32 %v1109_v43, %v745_v19  ;;  %v1247_v27 = vld [vmem:[#allocation2 + $0xc8] sm:$0xff]  ;;  %6459 = vmatprep.mubr.msk.f32.mxu1 %vm171_vm1, %v3564_v47 }
 0x147   : > { %6512 = vmatprep.mubr.msk.f32.mxu0 %vm171_vm1, %v4064_v35  ;;  %1213 = vst.msk [vmem:[#allocation2 + $0xe8] sm:$0xff] %vm171_vm1, %v1177_v49  ;;  %v1677_v16 = vadd.f32 %v6175_v1, %v1247_v27  ;;  %v1246_v42 = vld [vmem:[#allocation2 + $0xc0] sm:$0xff]  ;;  %v6579_v1 = vld [vmem:[%s6678_s23 + $0x130] sm:$0xff]  ;;  %v4079_v35 = vrot.slane %v6580_v40, 6 }
 0x148   : > { %1212 = vst.msk [vmem:[#allocation2 + $0xe0] sm:$0xff] %vm171_vm1, %v1176_v23  ;;  %v1676_v51 = vadd.f32 %v1593_v29, %v1246_v42  ;;  %v6128_v4 = vpop.f32.mrb[48].mxu1  ;;  %v3573_v9 = vrot.slane %v6579_v1, 5  ;;  %v4077_v62 = vrot.slane %v6579_v1, 6 }
 0x149   : > { %v6181_v50 = vpop.f32.mrb[46].mxu0  ;;  %1713 = vst.msk [vmem:[#allocation2 + $0xc8] sm:$0xff] %vm171_vm1, %v1677_v16  ;;  %v1179_v7 = vadd.f32 %v6128_v4, %v748_v37  ;;  %v1119_v8 = vpop.f32.mrb[49].mxu1  ;;  %6460 = vmatmul.mubr.msk.f32.gmra.mrb[154].mxu1 %vm171_vm1, %v3566_v56  ;;  %v1727_v16 = vld [vmem:[#allocation2 + $0x8] sm:$0xff] }
 0x14a   : > { %v1613_v17 = vpop.f32.mrb[47].mxu0  ;;  %6513 = vmatmul.mubr.msk.f32.gmra.mrb[152].mxu0 %vm171_vm1, %v4066_v63  ;;  %1712 = vst.msk [vmem:[#allocation2 + $0xc0] sm:$0xff] %vm171_vm1, %v1676_v51  ;;  %v1178_v55 = vadd.f32 %v1119_v8, %v747_v24  ;;  %v1249_v26 = vld [vmem:[#allocation2 + $0xd8] sm:$0xff]  ;;  %6462 = vmatprep.mubr.msk.f32.mxu1 %vm171_vm1, %v3568_v45  ;;  %v3574_v12 = vsel %vm3505_vm5, %v3571_v22, %v3573_v9  ;;  %v1726_v22 = vld [vmem:[#allocation2] sm:$0xff] }
 0x14b   : > { %6515 = vmatprep.mubr.msk.f32.mxu0 %vm171_vm1, %v4068_v14  ;;  %1215 = vst.msk [vmem:[#allocation2 + $0xf8] sm:$0xff] %vm171_vm1, %v1179_v7  ;;  %v1679_v57 = vadd.f32 %v6178_v48, %v1249_v26  ;;  %v1248_v20 = vld [vmem:[#allocation2 + $0xd0] sm:$0xff]  ;;  %v3577_v48 = vrot.slane %v7813_v10, 5  ;;  %v3576_v38 = vsel %vm3505_vm5, %v3573_v9, %v3575_v41  ;;  %v4078_v3 = vsel %vm4009_vm6, %v4075_v34, %v4077_v62 }
 0x14c   : > { %1214 = vst.msk [vmem:[#allocation2 + $0xf0] sm:$0xff] %vm171_vm1, %v1178_v55  ;;  %v1678_v28 = vadd.f32 %v1603_v13, %v1248_v20  ;;  %v6131_v59 = vpop.f32.mrb[50].mxu1  ;;  %v4081_v10 = vrot.slane %v6581_v15, 6  ;;  %v4080_v19 = vsel %vm4009_vm6, %v4077_v62, %v4079_v35  ;;  %v1728_v26 = vld [vmem:[#allocation2 + $0x10] sm:$0xff] }
 0x14d   : > { %v6184_v52 = vpop.f32.mrb[48].mxu0  ;;  %1715 = vst.msk [vmem:[#allocation2 + $0xd8] sm:$0xff] %vm171_vm1, %v1679_v57  ;;  %v1181_v61 = vadd.f32 %v6131_v59, %v750_v18  ;;  %v1129_v39 = vpop.f32.mrb[51].mxu1  ;;  %6463 = vmatmul.mubr.msk.f32.gmra.mrb[156].mxu1 %vm171_vm1, %v3570_v6  ;;  %v3578_v53 = vsel %vm3505_vm5, %v3575_v41, %v3577_v48  ;;  %v1731_v41 = vld [vmem:[#allocation2 + $0x28] sm:$0xff]  ;;  %v1730_v59 = vld [vmem:[#allocation2 + $0x20] sm:$0xff] }
 0x14e   : > { %v1623_v29 = vpop.f32.mrb[49].mxu0  ;;  %6516 = vmatmul.mubr.msk.f32.gmra.mrb[154].mxu0 %vm171_vm1, %v4070_v25  ;;  %1714 = vst.msk [vmem:[#allocation2 + $0xd0] sm:$0xff] %vm171_vm1, %v1678_v28  ;;  %v1180_v2 = vadd.f32 %v1129_v39, %v749_v44  ;;  %v1251_v0 = vld [vmem:[#allocation2 + $0xe8] sm:$0xff]  ;;  %6465 = vmatprep.mubr.msk.f32.mxu1 %vm171_vm1, %v3572_v33  ;;  %v4082_v45 = vsel %vm4009_vm6, %v4079_v35, %v4081_v10 }
 0x14f   : > { %6518 = vmatprep.mubr.msk.f32.mxu0 %vm171_vm1, %v4072_v46  ;;  %1217 = vst.msk [vmem:[#allocation2 + $0x108] sm:$0xff] %vm171_vm1, %v1181_v61  ;;  %v1681_v60 = vadd.f32 %v6181_v50, %v1251_v0  ;;  %v1250_v30 = vld [vmem:[#allocation2 + $0xe0] sm:$0xff]  ;;  %v1729_v46 = vld [vmem:[#allocation2 + $0x18] sm:$0xff] }
 0x150   : > { %1216 = vst.msk [vmem:[#allocation2 + $0x100] sm:$0xff] %vm171_vm1, %v1180_v2  ;;  %v1680_v13 = vadd.f32 %v1613_v17, %v1250_v30  ;;  %v6134_v54 = vpop.f32.mrb[52].mxu1  ;;  %v1733_v2 = vld [vmem:[#allocation2 + $0x38] sm:$0xff] }
 0x151   : > { %v6187_v32 = vpop.f32.mrb[50].mxu0  ;;  %1717 = vst.msk [vmem:[#allocation2 + $0xe8] sm:$0xff] %vm171_vm1, %v1681_v60  ;;  %v1183_v63 = vadd.f32 %v6134_v54, %v752_v36  ;;  %v1139_v49 = vpop.f32.mrb[53].mxu1  ;;  %6466 = vmatmul.mubr.msk.f32.gmra.mrb[158].mxu1 %vm171_vm1, %v3574_v12 }
 0x152   : > { %v1633_v47 = vpop.f32.mrb[51].mxu0  ;;  %6519 = vmatmul.mubr.msk.f32.gmra.mrb[156].mxu0 %vm171_vm1, %v4074_v31  ;;  %1716 = vst.msk [vmem:[#allocation2 + $0xe0] sm:$0xff] %vm171_vm1, %v1680_v13  ;;  %v1182_v43 = vadd.f32 %v1139_v49, %v751_v11  ;;  %v1253_v14 = vld [vmem:[#allocation2 + $0xf8] sm:$0xff]  ;;  %6468 = vmatprep.mubr.msk.f32.mxu1 %vm171_vm1, %v3576_v38 }
 0x153   : > { %6521 = vmatprep.mubr.msk.f32.mxu0 %vm171_vm1, %v4076_v5  ;;  %1219 = vst.msk [vmem:[#allocation2 + $0x118] sm:$0xff] %vm171_vm1, %v1183_v63  ;;  %v1683_v27 = vadd.f32 %v6184_v52, %v1253_v14  ;;  %v1252_v56 = vld [vmem:[#allocation2 + $0xf0] sm:$0xff]  ;;  %v1734_v63 = vld [vmem:[#allocation2 + $0x40] sm:$0xff] }
 0x154   : > { %1218 = vst.msk [vmem:[#allocation2 + $0x110] sm:$0xff] %vm171_vm1, %v1182_v43  ;;  %v1682_v58 = vadd.f32 %v1623_v29, %v1252_v56  ;;  %v6195_v42 = vpop.f32.mrb[54].mxu1  ;;  %v1737_v56 = vld [vmem:[#allocation2 + $0x58] sm:$0xff] }
 0x155   : > { %v6190_v23 = vpop.f32.mrb[52].mxu0  ;;  %1719 = vst.msk [vmem:[#allocation2 + $0xf8] sm:$0xff] %vm171_vm1, %v1683_v27  ;;  %v2021_v17 = vadd.f32 %v6195_v42, %v1727_v16  ;;  %v1841_v51 = vpop.f32.mrb[55].mxu1  ;;  %6469 = vmatmul.mubr.msk.f32.gmra.mrb[160].mxu1 %vm171_vm1, %v3578_v53  ;;  %v1736_v16 = vld [vmem:[#allocation2 + $0x50] sm:$0xff] }
 0x156   : > { %v1643_v50 = vpop.f32.mrb[53].mxu0  ;;  %6522 = vmatmul.mubr.msk.f32.gmra.mrb[158].mxu0 %vm171_vm1, %v4078_v3  ;;  %1718 = vst.msk [vmem:[#allocation2 + $0xf0] sm:$0xff] %vm171_vm1, %v1682_v58  ;;  %v1255_v37 = vld [vmem:[#allocation2 + $0x108] sm:$0xff]  ;;  %v2020_v4 = vadd.f32 %v1841_v51, %v1726_v22 }
 0x157   : > { %6524 = vmatprep.mubr.msk.f32.mxu0 %vm171_vm1, %v4080_v19  ;;  %2057 = vst.msk [vmem:[#allocation2 + $0x8] sm:$0xff] %vm171_vm1, %v2021_v17  ;;  %v1685_v21 = vadd.f32 %v6187_v32, %v1255_v37  ;;  %v1254_v7 = vld [vmem:[#allocation2 + $0x100] sm:$0xff]  ;;  %v1732_v32 = vld [vmem:[#allocation2 + $0x30] sm:$0xff]  ;;  %v1735_v3 = vld [vmem:[#allocation2 + $0x48] sm:$0xff] }
 0x158   : > { %2056 = vst.msk [vmem:[#allocation2] sm:$0xff] %vm171_vm1, %v2020_v4  ;;  %v1684_v8 = vadd.f32 %v1633_v47, %v1254_v7  ;;  %v6198_v34 = vpop.f32.mrb[56].mxu1 }
 0x159   : > { %v6251_v25 = vpop.f32.mrb[54].mxu0  ;;  %1721 = vst.msk [vmem:[#allocation2 + $0x108] sm:$0xff] %vm171_vm1, %v1685_v21  ;;  %v2023_v55 = vadd.f32 %v6198_v34, %v1729_v46  ;;  %v1851_v6 = vpop.f32.mrb[57].mxu1  ;;  %v1739_v21 = vld [vmem:[#allocation2 + $0x68] sm:$0xff] }
 0x15a   : > { %v2345_v24 = vpop.f32.mrb[55].mxu0  ;;  %6525 = vmatmul.mubr.msk.f32.gmra.mrb[160].mxu0 %vm171_vm1, %v4082_v45  ;;  %1720 = vst.msk [vmem:[#allocation2 + $0x100] sm:$0xff] %vm171_vm1, %v1684_v8  ;;  %v1257_v52 = vld [vmem:[#allocation2 + $0x118] sm:$0xff]  ;;  %v2022_v1 = vadd.f32 %v1851_v6, %v1728_v26  ;;  %v1738_v8 = vld [vmem:[#allocation2 + $0x60] sm:$0xff] }
 0x15b   : > { %2059 = vst.msk [vmem:[#allocation2 + $0x18] sm:$0xff] %vm171_vm1, %v2023_v55  ;;  %v1687_v57 = vadd.f32 %v6190_v23, %v1257_v52  ;;  %v1256_v20 = vld [vmem:[#allocation2 + $0x110] sm:$0xff] }
 0x15c   : > { %2058 = vst.msk [vmem:[#allocation2 + $0x10] sm:$0xff] %vm171_vm1, %v2022_v1  ;;  %v1686_v29 = vadd.f32 %v1643_v50, %v1256_v20  ;;  %v6201_v28 = vpop.f32.mrb[58].mxu1 }
 0x15d   : > { %v6254_v9 = vpop.f32.mrb[56].mxu0  ;;  %1723 = vst.msk [vmem:[#allocation2 + $0x118] sm:$0xff] %vm171_vm1, %v1687_v57  ;;  %v2025_v18 = vadd.f32 %v6201_v28, %v1731_v41  ;;  %v1861_v31 = vpop.f32.mrb[59].mxu1  ;;  %v1741_v57 = vld [vmem:[#allocation2 + $0x78] sm:$0xff] }
 0x15e   : > { %v2355_v33 = vpop.f32.mrb[57].mxu0  ;;  %1722 = vst.msk [vmem:[#allocation2 + $0x110] sm:$0xff] %vm171_vm1, %v1686_v29  ;;  %v2024_v62 = vadd.f32 %v1861_v31, %v1730_v59  ;;  %v2095_v61 = vld [vmem:[#allocation2 + $0x8] sm:$0xff]  ;;  %v1740_v29 = vld [vmem:[#allocation2 + $0x70] sm:$0xff] }
 0x15f   : > { %2061 = vst.msk [vmem:[#allocation2 + $0x28] sm:$0xff] %vm171_vm1, %v2025_v18  ;;  %v2525_v39 = vadd.f32 %v6251_v25, %v2095_v61  ;;  %v2094_v5 = vld [vmem:[#allocation2] sm:$0xff] }
 0x160   : > { %2060 = vst.msk [vmem:[#allocation2 + $0x20] sm:$0xff] %vm171_vm1, %v2024_v62  ;;  %v2524_v35 = vadd.f32 %v2345_v24, %v2094_v5  ;;  %v6204_v0 = vpop.f32.mrb[60].mxu1 }
 0x161   : > { %v6257_v44 = vpop.f32.mrb[58].mxu0  ;;  %2561 = vst.msk [vmem:[#allocation2 + $0x8] sm:$0xff] %vm171_vm1, %v2525_v39  ;;  %v2027_v12 = vadd.f32 %v6204_v0, %v1733_v2  ;;  %v1871_v48 = vpop.f32.mrb[61].mxu1  ;;  %v1743_v39 = vld [vmem:[#allocation2 + $0x88] sm:$0xff] }
 0x162   : > { %v2365_v40 = vpop.f32.mrb[59].mxu0  ;;  %2560 = vst.msk [vmem:[#allocation2] sm:$0xff] %vm171_vm1, %v2524_v35  ;;  %v2026_v60 = vadd.f32 %v1871_v48, %v1732_v32  ;;  %v2097_v30 = vld [vmem:[#allocation2 + $0x18] sm:$0xff]  ;;  %v1742_v35 = vld [vmem:[#allocation2 + $0x80] sm:$0xff] }
 0x163   : > { %2063 = vst.msk [vmem:[#allocation2 + $0x38] sm:$0xff] %vm171_vm1, %v2027_v12  ;;  %v2527_v47 = vadd.f32 %v6254_v9, %v2097_v30  ;;  %v2096_v13 = vld [vmem:[#allocation2 + $0x10] sm:$0xff] }
 0x164   : > { %2062 = vst.msk [vmem:[#allocation2 + $0x30] sm:$0xff] %vm171_vm1, %v2026_v60  ;;  %v2526_v54 = vadd.f32 %v2355_v33, %v2096_v13  ;;  %v6207_v15 = vpop.f32.mrb[62].mxu1 }
 0x165   : > { %v6260_v38 = vpop.f32.mrb[60].mxu0  ;;  %2563 = vst.msk [vmem:[#allocation2 + $0x18] sm:$0xff] %vm171_vm1, %v2527_v47  ;;  %v2029_v10 = vadd.f32 %v6207_v15, %v1735_v3  ;;  %v1881_v11 = vpop.f32.mrb[63].mxu1  ;;  %v1745_v47 = vld [vmem:[#allocation2 + $0x98] sm:$0xff] }
 0x166   : > { %v2375_v36 = vpop.f32.mrb[61].mxu0  ;;  %2562 = vst.msk [vmem:[#allocation2 + $0x10] sm:$0xff] %vm171_vm1, %v2526_v54  ;;  %v2028_v49 = vadd.f32 %v1881_v11, %v1734_v63  ;;  %v2099_v19 = vld [vmem:[#allocation2 + $0x28] sm:$0xff]  ;;  %v1744_v54 = vld [vmem:[#allocation2 + $0x90] sm:$0xff] }
 0x167   : > { %2065 = vst.msk [vmem:[#allocation2 + $0x48] sm:$0xff] %vm171_vm1, %v2029_v10  ;;  %v2529_v14 = vadd.f32 %v6257_v44, %v2099_v19  ;;  %v2098_v53 = vld [vmem:[#allocation2 + $0x20] sm:$0xff] }
 0x168   : > { %2064 = vst.msk [vmem:[#allocation2 + $0x40] sm:$0xff] %vm171_vm1, %v2028_v49  ;;  %v2528_v27 = vadd.f32 %v2365_v40, %v2098_v53  ;;  %v6210_v50 = vpop.f32.mrb[64].mxu1 }
 0x169   : > { %v6263_v43 = vpop.f32.mrb[62].mxu0  ;;  %2565 = vst.msk [vmem:[#allocation2 + $0x28] sm:$0xff] %vm171_vm1, %v2529_v14  ;;  %v2031_v58 = vadd.f32 %v6210_v50, %v1737_v56  ;;  %v1891_v42 = vpop.f32.mrb[65].mxu1  ;;  %v1747_v14 = vld [vmem:[#allocation2 + $0xa8] sm:$0xff] }
 0x16a   : > { %v2385_v23 = vpop.f32.mrb[63].mxu0  ;;  %2564 = vst.msk [vmem:[#allocation2 + $0x20] sm:$0xff] %vm171_vm1, %v2528_v27  ;;  %v2030_v45 = vadd.f32 %v1891_v42, %v1736_v16  ;;  %v2101_v17 = vld [vmem:[#allocation2 + $0x38] sm:$0xff]  ;;  %v1746_v27 = vld [vmem:[#allocation2 + $0xa0] sm:$0xff] }
 0x16b   : > { %2067 = vst.msk [vmem:[#allocation2 + $0x58] sm:$0xff] %vm171_vm1, %v2031_v58  ;;  %v2531_v51 = vadd.f32 %v6260_v38, %v2101_v17  ;;  %v2100_v37 = vld [vmem:[#allocation2 + $0x30] sm:$0xff] }
 0x16c   : > { %2066 = vst.msk [vmem:[#allocation2 + $0x50] sm:$0xff] %vm171_vm1, %v2030_v45  ;;  %v2530_v25 = vadd.f32 %v2375_v36, %v2100_v37  ;;  %v6213_v7 = vpop.f32.mrb[66].mxu1 }
 0x16d   : > { %v6266_v22 = vpop.f32.mrb[64].mxu0  ;;  %2567 = vst.msk [vmem:[#allocation2 + $0x38] sm:$0xff] %vm171_vm1, %v2531_v51  ;;  %v2033_v24 = vadd.f32 %v6213_v7, %v1739_v21  ;;  %v1901_v46 = vpop.f32.mrb[67].mxu1  ;;  %v1749_v51 = vld [vmem:[#allocation2 + $0xb8] sm:$0xff] }
 0x16e   : > { %v2395_v4 = vpop.f32.mrb[65].mxu0  ;;  %2566 = vst.msk [vmem:[#allocation2 + $0x30] sm:$0xff] %vm171_vm1, %v2530_v25  ;;  %v2032_v34 = vadd.f32 %v1901_v46, %v1738_v8  ;;  %v2103_v55 = vld [vmem:[#allocation2 + $0x48] sm:$0xff]  ;;  %v1748_v25 = vld [vmem:[#allocation2 + $0xb0] sm:$0xff] }
 0x16f   : > { %2069 = vst.msk [vmem:[#allocation2 + $0x68] sm:$0xff] %vm171_vm1, %v2033_v24  ;;  %v2533_v6 = vadd.f32 %v6263_v43, %v2103_v55  ;;  %v2102_v52 = vld [vmem:[#allocation2 + $0x40] sm:$0xff] }
 0x170   : > { %2068 = vst.msk [vmem:[#allocation2 + $0x60] sm:$0xff] %vm171_vm1, %v2032_v34  ;;  %v2532_v9 = vadd.f32 %v2385_v23, %v2102_v52  ;;  %v6216_v20 = vpop.f32.mrb[68].mxu1 }
 0x171   : > { %v6269_v26 = vpop.f32.mrb[66].mxu0  ;;  %2569 = vst.msk [vmem:[#allocation2 + $0x48] sm:$0xff] %vm171_vm1, %v2533_v6  ;;  %v2035_v33 = vadd.f32 %v6216_v20, %v1741_v57  ;;  %v1911_v41 = vpop.f32.mrb[69].mxu1  ;;  %v1751_v6 = vld [vmem:[#allocation2 + $0xc8] sm:$0xff] }
 0x172   : > { %v2405_v1 = vpop.f32.mrb[67].mxu0  ;;  %2568 = vst.msk [vmem:[#allocation2 + $0x40] sm:$0xff] %vm171_vm1, %v2532_v9  ;;  %v2034_v28 = vadd.f32 %v1911_v41, %v1740_v29  ;;  %v2105_v18 = vld [vmem:[#allocation2 + $0x58] sm:$0xff]  ;;  %v1750_v9 = vld [vmem:[#allocation2 + $0xc0] sm:$0xff] }
 0x173   : > { %2071 = vst.msk [vmem:[#allocation2 + $0x78] sm:$0xff] %vm171_vm1, %v2035_v33  ;;  %v2535_v31 = vadd.f32 %v6266_v22, %v2105_v18  ;;  %v2104_v62 = vld [vmem:[#allocation2 + $0x50] sm:$0xff] }
 0x174   : > { %2070 = vst.msk [vmem:[#allocation2 + $0x70] sm:$0xff] %vm171_vm1, %v2034_v28  ;;  %v2534_v44 = vadd.f32 %v2395_v4, %v2104_v62  ;;  %v6219_v5 = vpop.f32.mrb[70].mxu1 }
 0x175   : > { %v6272_v59 = vpop.f32.mrb[68].mxu0  ;;  %2571 = vst.msk [vmem:[#allocation2 + $0x58] sm:$0xff] %vm171_vm1, %v2535_v31  ;;  %v2037_v40 = vadd.f32 %v6219_v5, %v1743_v39  ;;  %v1921_v2 = vpop.f32.mrb[71].mxu1  ;;  %v1753_v31 = vld [vmem:[#allocation2 + $0xd8] sm:$0xff] }
 0x176   : > { %v2415_v61 = vpop.f32.mrb[69].mxu0  ;;  %2570 = vst.msk [vmem:[#allocation2 + $0x50] sm:$0xff] %vm171_vm1, %v2534_v44  ;;  %v2036_v0 = vadd.f32 %v1921_v2, %v1742_v35  ;;  %v2107_v12 = vld [vmem:[#allocation2 + $0x68] sm:$0xff]  ;;  %v1752_v44 = vld [vmem:[#allocation2 + $0xd0] sm:$0xff] }
 0x177   : > { %2073 = vst.msk [vmem:[#allocation2 + $0x88] sm:$0xff] %vm171_vm1, %v2037_v40  ;;  %v2537_v48 = vadd.f32 %v6269_v26, %v2107_v12  ;;  %v2106_v60 = vld [vmem:[#allocation2 + $0x60] sm:$0xff] }
 0x178   : > { %2072 = vst.msk [vmem:[#allocation2 + $0x80] sm:$0xff] %vm171_vm1, %v2036_v0  ;;  %v2536_v38 = vadd.f32 %v2405_v1, %v2106_v60  ;;  %v6222_v13 = vpop.f32.mrb[72].mxu1 }
 0x179   : > { %v6275_v32 = vpop.f32.mrb[70].mxu0  ;;  %2573 = vst.msk [vmem:[#allocation2 + $0x68] sm:$0xff] %vm171_vm1, %v2537_v48  ;;  %v2039_v36 = vadd.f32 %v6222_v13, %v1745_v47  ;;  %v1931_v3 = vpop.f32.mrb[73].mxu1  ;;  %v1755_v48 = vld [vmem:[#allocation2 + $0xe8] sm:$0xff] }
 0x17a   : > { %v2425_v30 = vpop.f32.mrb[71].mxu0  ;;  %2572 = vst.msk [vmem:[#allocation2 + $0x60] sm:$0xff] %vm171_vm1, %v2536_v38  ;;  %v2038_v15 = vadd.f32 %v1931_v3, %v1744_v54  ;;  %v2109_v10 = vld [vmem:[#allocation2 + $0x78] sm:$0xff]  ;;  %v1754_v38 = vld [vmem:[#allocation2 + $0xe0] sm:$0xff] }
 0x17b   : > { %2075 = vst.msk [vmem:[#allocation2 + $0x98] sm:$0xff] %vm171_vm1, %v2039_v36  ;;  %v2539_v11 = vadd.f32 %v6272_v59, %v2109_v10  ;;  %v2108_v49 = vld [vmem:[#allocation2 + $0x70] sm:$0xff] }
 0x17c   : > { %2074 = vst.msk [vmem:[#allocation2 + $0x90] sm:$0xff] %vm171_vm1, %v2038_v15  ;;  %v2538_v43 = vadd.f32 %v2415_v61, %v2108_v49  ;;  %v6225_v53 = vpop.f32.mrb[74].mxu1 }
 0x17d   : > { %v6278_v63 = vpop.f32.mrb[72].mxu0  ;;  %2575 = vst.msk [vmem:[#allocation2 + $0x78] sm:$0xff] %vm171_vm1, %v2539_v11  ;;  %v2041_v23 = vadd.f32 %v6225_v53, %v1747_v14  ;;  %v1941_v56 = vpop.f32.mrb[75].mxu1  ;;  %v1757_v11 = vld [vmem:[#allocation2 + $0xf8] sm:$0xff] }
 0x17e   : > { %v2435_v19 = vpop.f32.mrb[73].mxu0  ;;  %2574 = vst.msk [vmem:[#allocation2 + $0x70] sm:$0xff] %vm171_vm1, %v2538_v43  ;;  %v2040_v50 = vadd.f32 %v1941_v56, %v1746_v27  ;;  %v2111_v58 = vld [vmem:[#allocation2 + $0x88] sm:$0xff]  ;;  %v1756_v43 = vld [vmem:[#allocation2 + $0xf0] sm:$0xff] }
 0x17f   : > { %2077 = vst.msk [vmem:[#allocation2 + $0xa8] sm:$0xff] %vm171_vm1, %v2041_v23  ;;  %v2541_v42 = vadd.f32 %v6275_v32, %v2111_v58  ;;  %v2110_v45 = vld [vmem:[#allocation2 + $0x80] sm:$0xff] }
 0x180   : > { %2076 = vst.msk [vmem:[#allocation2 + $0xa0] sm:$0xff] %vm171_vm1, %v2040_v50  ;;  %v2540_v22 = vadd.f32 %v2425_v30, %v2110_v45  ;;  %v6228_v37 = vpop.f32.mrb[76].mxu1 }
 0x181   : > { %v6281_v16 = vpop.f32.mrb[74].mxu0  ;;  %2577 = vst.msk [vmem:[#allocation2 + $0x88] sm:$0xff] %vm171_vm1, %v2541_v42  ;;  %v2043_v4 = vadd.f32 %v6228_v37, %v1749_v51  ;;  %v1951_v21 = vpop.f32.mrb[77].mxu1  ;;  %v1759_v42 = vld [vmem:[#allocation2 + $0x108] sm:$0xff] }
 0x182   : > { %v2445_v17 = vpop.f32.mrb[75].mxu0  ;;  %2576 = vst.msk [vmem:[#allocation2 + $0x80] sm:$0xff] %vm171_vm1, %v2540_v22  ;;  %v2042_v7 = vadd.f32 %v1951_v21, %v1748_v25  ;;  %v2113_v24 = vld [vmem:[#allocation2 + $0x98] sm:$0xff]  ;;  %v1758_v22 = vld [vmem:[#allocation2 + $0x100] sm:$0xff] }
 0x183   : > { %2079 = vst.msk [vmem:[#allocation2 + $0xb8] sm:$0xff] %vm171_vm1, %v2043_v4  ;;  %v2543_v46 = vadd.f32 %v6278_v63, %v2113_v24  ;;  %v2112_v34 = vld [vmem:[#allocation2 + $0x90] sm:$0xff] }
 0x184   : > { %2078 = vst.msk [vmem:[#allocation2 + $0xb0] sm:$0xff] %vm171_vm1, %v2042_v7  ;;  %v2542_v26 = vadd.f32 %v2435_v19, %v2112_v34  ;;  %v6231_v52 = vpop.f32.mrb[78].mxu1 }
 0x185   : > { %v6284_v8 = vpop.f32.mrb[76].mxu0  ;;  %2579 = vst.msk [vmem:[#allocation2 + $0x98] sm:$0xff] %vm171_vm1, %v2543_v46  ;;  %v2045_v1 = vadd.f32 %v6231_v52, %v1751_v6  ;;  %v1961_v57 = vpop.f32.mrb[79].mxu1  ;;  %v1761_v46 = vld [vmem:[#allocation2 + $0x118] sm:$0xff] }
 0x186   : > { %v2455_v55 = vpop.f32.mrb[77].mxu0  ;;  %2578 = vst.msk [vmem:[#allocation2 + $0x90] sm:$0xff] %vm171_vm1, %v2542_v26  ;;  %v2044_v20 = vadd.f32 %v1961_v57, %v1750_v9  ;;  %v2115_v33 = vld [vmem:[#allocation2 + $0xa8] sm:$0xff]  ;;  %v1760_v26 = vld [vmem:[#allocation2 + $0x110] sm:$0xff] }
 0x187   : > { %2081 = vst.msk [vmem:[#allocation2 + $0xc8] sm:$0xff] %vm171_vm1, %v2045_v1  ;;  %v2545_v41 = vadd.f32 %v6281_v16, %v2115_v33  ;;  %v2114_v28 = vld [vmem:[#allocation2 + $0xa0] sm:$0xff] }
 0x188   : > { %2080 = vst.msk [vmem:[#allocation2 + $0xc0] sm:$0xff] %vm171_vm1, %v2044_v20  ;;  %v2544_v59 = vadd.f32 %v2445_v17, %v2114_v28  ;;  %v6234_v62 = vpop.f32.mrb[80].mxu1 }
 0x189   : > { %v6287_v29 = vpop.f32.mrb[78].mxu0  ;;  %2581 = vst.msk [vmem:[#allocation2 + $0xa8] sm:$0xff] %vm171_vm1, %v2545_v41  ;;  %v2047_v61 = vadd.f32 %v6234_v62, %v1753_v31  ;;  %v1971_v39 = vpop.f32.mrb[81].mxu1  ;;  %v2599_v41 = vld [vmem:[#allocation2 + $0x8] sm:$0xff] }
 0x18a   : > { %v2465_v18 = vpop.f32.mrb[79].mxu0  ;;  %2580 = vst.msk [vmem:[#allocation2 + $0xa0] sm:$0xff] %vm171_vm1, %v2544_v59  ;;  %v2046_v5 = vadd.f32 %v1971_v39, %v1752_v44  ;;  %v2117_v40 = vld [vmem:[#allocation2 + $0xb8] sm:$0xff]  ;;  %v2598_v59 = vld [vmem:[#allocation2] sm:$0xff] }
 0x18b   : > { %2083 = vst.msk [vmem:[#allocation2 + $0xd8] sm:$0xff] %vm171_vm1, %v2047_v61  ;;  %v2547_v2 = vadd.f32 %v6284_v8, %v2117_v40  ;;  %v2116_v0 = vld [vmem:[#allocation2 + $0xb0] sm:$0xff] }
 0x18c   : > { %2082 = vst.msk [vmem:[#allocation2 + $0xd0] sm:$0xff] %vm171_vm1, %v2046_v5  ;;  %v2546_v32 = vadd.f32 %v2455_v55, %v2116_v0  ;;  %v6237_v60 = vpop.f32.mrb[82].mxu1 }
 0x18d   : > { %v6290_v35 = vpop.f32.mrb[80].mxu0  ;;  %2583 = vst.msk [vmem:[#allocation2 + $0xb8] sm:$0xff] %vm171_vm1, %v2547_v2  ;;  %v2049_v30 = vadd.f32 %v6237_v60, %v1755_v48  ;;  %v1981_v47 = vpop.f32.mrb[83].mxu1  ;;  %v2601_v2 = vld [vmem:[#allocation2 + $0x18] sm:$0xff] }
 0x18e   : > { %v2475_v12 = vpop.f32.mrb[81].mxu0  ;;  %2582 = vst.msk [vmem:[#allocation2 + $0xb0] sm:$0xff] %vm171_vm1, %v2546_v32  ;;  %v2048_v13 = vadd.f32 %v1981_v47, %v1754_v38  ;;  %v2119_v36 = vld [vmem:[#allocation2 + $0xc8] sm:$0xff]  ;;  %v2600_v32 = vld [vmem:[#allocation2 + $0x10] sm:$0xff] }
 0x18f   : > { %2085 = vst.msk [vmem:[#allocation2 + $0xe8] sm:$0xff] %vm171_vm1, %v2049_v30  ;;  %v2549_v3 = vadd.f32 %v6287_v29, %v2119_v36  ;;  %v2118_v15 = vld [vmem:[#allocation2 + $0xc0] sm:$0xff] }
 0x190   : > { %2084 = vst.msk [vmem:[#allocation2 + $0xe0] sm:$0xff] %vm171_vm1, %v2048_v13  ;;  %v2548_v63 = vadd.f32 %v2465_v18, %v2118_v15  ;;  %v6240_v49 = vpop.f32.mrb[84].mxu1 }
 0x191   : > { %v6293_v54 = vpop.f32.mrb[82].mxu0  ;;  %2585 = vst.msk [vmem:[#allocation2 + $0xc8] sm:$0xff] %vm171_vm1, %v2549_v3  ;;  %v2051_v19 = vadd.f32 %v6240_v49, %v1757_v11  ;;  %v1991_v14 = vpop.f32.mrb[85].mxu1  ;;  %v2603_v3 = vld [vmem:[#allocation2 + $0x28] sm:$0xff] }
 0x192   : > { %v2485_v10 = vpop.f32.mrb[83].mxu0  ;;  %2584 = vst.msk [vmem:[#allocation2 + $0xc0] sm:$0xff] %vm171_vm1, %v2548_v63  ;;  %v2050_v53 = vadd.f32 %v1991_v14, %v1756_v43  ;;  %v2121_v23 = vld [vmem:[#allocation2 + $0xd8] sm:$0xff]  ;;  %v2602_v63 = vld [vmem:[#allocation2 + $0x20] sm:$0xff] }
 0x193   : > { %2087 = vst.msk [vmem:[#allocation2 + $0xf8] sm:$0xff] %vm171_vm1, %v2051_v19  ;;  %v2551_v56 = vadd.f32 %v6290_v35, %v2121_v23  ;;  %v2120_v50 = vld [vmem:[#allocation2 + $0xd0] sm:$0xff] }
 0x194   : > { %2086 = vst.msk [vmem:[#allocation2 + $0xf0] sm:$0xff] %vm171_vm1, %v2050_v53  ;;  %v2550_v16 = vadd.f32 %v2475_v12, %v2120_v50  ;;  %v6243_v45 = vpop.f32.mrb[86].mxu1 }
 0x195   : > { %v6296_v27 = vpop.f32.mrb[84].mxu0  ;;  %2587 = vst.msk [vmem:[#allocation2 + $0xd8] sm:$0xff] %vm171_vm1, %v2551_v56  ;;  %v2053_v17 = vadd.f32 %v6243_v45, %v1759_v42  ;;  %v2001_v51 = vpop.f32.mrb[87].mxu1  ;;  %v2605_v56 = vld [vmem:[#allocation2 + $0x38] sm:$0xff] }
 0x196   : > { %v2495_v58 = vpop.f32.mrb[85].mxu0  ;;  %2586 = vst.msk [vmem:[#allocation2 + $0xd0] sm:$0xff] %vm171_vm1, %v2550_v16  ;;  %v2052_v37 = vadd.f32 %v2001_v51, %v1758_v22  ;;  %v2123_v4 = vld [vmem:[#allocation2 + $0xe8] sm:$0xff]  ;;  %v2604_v16 = vld [vmem:[#allocation2 + $0x30] sm:$0xff] }
 0x197   : > { %2089 = vst.msk [vmem:[#allocation2 + $0x108] sm:$0xff] %vm171_vm1, %v2053_v17  ;;  %v2553_v21 = vadd.f32 %v6293_v54, %v2123_v4  ;;  %v2122_v7 = vld [vmem:[#allocation2 + $0xe0] sm:$0xff] }
 0x198   : > { %2088 = vst.msk [vmem:[#allocation2 + $0x100] sm:$0xff] %vm171_vm1, %v2052_v37  ;;  %v2552_v8 = vadd.f32 %v2485_v10, %v2122_v7  ;;  %v6246_v34 = vpop.f32.mrb[88].mxu1 }
 0x199   : > { %v6299_v25 = vpop.f32.mrb[86].mxu0  ;;  %2589 = vst.msk [vmem:[#allocation2 + $0xe8] sm:$0xff] %vm171_vm1, %v2553_v21  ;;  %v2055_v55 = vadd.f32 %v6246_v34, %v1761_v46  ;;  %v2011_v6 = vpop.f32.mrb[89].mxu1  ;;  %v2607_v21 = vld [vmem:[#allocation2 + $0x48] sm:$0xff] }
 0x19a   : > { %v2505_v24 = vpop.f32.mrb[87].mxu0  ;;  %2588 = vst.msk [vmem:[#allocation2 + $0xe0] sm:$0xff] %vm171_vm1, %v2552_v8  ;;  %v2054_v52 = vadd.f32 %v2011_v6, %v1760_v26  ;;  %v2125_v1 = vld [vmem:[#allocation2 + $0xf8] sm:$0xff]  ;;  %v2606_v8 = vld [vmem:[#allocation2 + $0x40] sm:$0xff] }
 0x19b   : > { %2091 = vst.msk [vmem:[#allocation2 + $0x118] sm:$0xff] %vm171_vm1, %v2055_v55  ;;  %v2555_v57 = vadd.f32 %v6296_v27, %v2125_v1  ;;  %v2124_v20 = vld [vmem:[#allocation2 + $0xf0] sm:$0xff] }
 0x19c   : > { %2090 = vst.msk [vmem:[#allocation2 + $0x110] sm:$0xff] %vm171_vm1, %v2054_v52  ;;  %v2554_v29 = vadd.f32 %v2495_v58, %v2124_v20  ;;  %v6307_v28 = vpop.f32.mrb[90].mxu1 }
 0x19d   : > { %v6302_v9 = vpop.f32.mrb[88].mxu0  ;;  %2591 = vst.msk [vmem:[#allocation2 + $0xf8] sm:$0xff] %vm171_vm1, %v2555_v57  ;;  %v3028_v18 = vadd.f32 %v6307_v28, %v2599_v41  ;;  %v2848_v31 = vpop.f32.mrb[91].mxu1  ;;  %v2609_v57 = vld [vmem:[#allocation2 + $0x58] sm:$0xff] }
 0x19e   : > { %v2515_v33 = vpop.f32.mrb[89].mxu0  ;;  %2590 = vst.msk [vmem:[#allocation2 + $0xf0] sm:$0xff] %vm171_vm1, %v2554_v29  ;;  %v2127_v62 = vld [vmem:[#allocation2 + $0x108] sm:$0xff]  ;;  %v3027_v61 = vadd.f32 %v2848_v31, %v2598_v59  ;;  %v2608_v29 = vld [vmem:[#allocation2 + $0x50] sm:$0xff] }
 0x19f   : > { %3064 = vst.msk [vmem:[#allocation2 + $0x8] sm:$0xff] %vm171_vm1, %v3028_v18  ;;  %v2557_v39 = vadd.f32 %v6299_v25, %v2127_v62  ;;  %v2126_v5 = vld [vmem:[#allocation2 + $0x100] sm:$0xff] }
 0x1a0   : > { %3063 = vst.msk [vmem:[#allocation2] sm:$0xff] %vm171_vm1, %v3027_v61  ;;  %v2556_v35 = vadd.f32 %v2505_v24, %v2126_v5  ;;  %v6310_v0 = vpop.f32.mrb[92].mxu1 }
 0x1a1   : > { %v6363_v44 = vpop.f32.mrb[90].mxu0  ;;  %2593 = vst.msk [vmem:[#allocation2 + $0x108] sm:$0xff] %vm171_vm1, %v2557_v39  ;;  %v3030_v12 = vadd.f32 %v6310_v0, %v2601_v2  ;;  %v2858_v48 = vpop.f32.mrb[93].mxu1  ;;  %v2611_v39 = vld [vmem:[#allocation2 + $0x68] sm:$0xff] }
 0x1a2   : > { %v3216_v40 = vpop.f32.mrb[91].mxu0  ;;  %2592 = vst.msk [vmem:[#allocation2 + $0x100] sm:$0xff] %vm171_vm1, %v2556_v35  ;;  %v2129_v60 = vld [vmem:[#allocation2 + $0x118] sm:$0xff]  ;;  %v3029_v30 = vadd.f32 %v2858_v48, %v2600_v32  ;;  %v2610_v35 = vld [vmem:[#allocation2 + $0x60] sm:$0xff] }
 0x1a3   : > { %3066 = vst.msk [vmem:[#allocation2 + $0x18] sm:$0xff] %vm171_vm1, %v3030_v12  ;;  %v2559_v47 = vadd.f32 %v6302_v9, %v2129_v60  ;;  %v2128_v13 = vld [vmem:[#allocation2 + $0x110] sm:$0xff] }
 0x1a4   : > { %3065 = vst.msk [vmem:[#allocation2 + $0x10] sm:$0xff] %vm171_vm1, %v3029_v30  ;;  %v2558_v54 = vadd.f32 %v2515_v33, %v2128_v13  ;;  %v6313_v15 = vpop.f32.mrb[94].mxu1 }
 0x1a5   : > { %v6366_v38 = vpop.f32.mrb[92].mxu0  ;;  %2595 = vst.msk [vmem:[#allocation2 + $0x118] sm:$0xff] %vm171_vm1, %v2559_v47  ;;  %v3032_v10 = vadd.f32 %v6313_v15, %v2603_v3  ;;  %v2868_v11 = vpop.f32.mrb[95].mxu1  ;;  %v2613_v47 = vld [vmem:[#allocation2 + $0x78] sm:$0xff] }
 0x1a6   : > { %v3226_v36 = vpop.f32.mrb[93].mxu0  ;;  %2594 = vst.msk [vmem:[#allocation2 + $0x110] sm:$0xff] %vm171_vm1, %v2558_v54  ;;  %v3031_v49 = vadd.f32 %v2868_v11, %v2602_v63  ;;  %v3102_v19 = vld [vmem:[#allocation2 + $0x8] sm:$0xff]  ;;  %v2612_v54 = vld [vmem:[#allocation2 + $0x70] sm:$0xff] }
 0x1a7   : > { %3068 = vst.msk [vmem:[#allocation2 + $0x28] sm:$0xff] %vm171_vm1, %v3032_v10  ;;  %v3396_v14 = vadd.f32 %v6363_v44, %v3102_v19  ;;  %v3101_v53 = vld [vmem:[#allocation2] sm:$0xff] }
 0x1a8   : > { %3067 = vst.msk [vmem:[#allocation2 + $0x20] sm:$0xff] %vm171_vm1, %v3031_v49  ;;  %v3395_v27 = vadd.f32 %v3216_v40, %v3101_v53  ;;  %v6316_v50 = vpop.f32.mrb[96].mxu1 }
 0x1a9   : > { %v6369_v43 = vpop.f32.mrb[94].mxu0  ;;  %3432 = vst.msk [vmem:[#allocation2 + $0x8] sm:$0xff] %vm171_vm1, %v3396_v14  ;;  %v3034_v58 = vadd.f32 %v6316_v50, %v2605_v56  ;;  %v2878_v42 = vpop.f32.mrb[97].mxu1  ;;  %v2615_v14 = vld [vmem:[#allocation2 + $0x88] sm:$0xff] }
 0x1aa   : > { %v3236_v23 = vpop.f32.mrb[95].mxu0  ;;  %3431 = vst.msk [vmem:[#allocation2] sm:$0xff] %vm171_vm1, %v3395_v27  ;;  %v3033_v45 = vadd.f32 %v2878_v42, %v2604_v16  ;;  %v3104_v17 = vld [vmem:[#allocation2 + $0x18] sm:$0xff]  ;;  %v2614_v27 = vld [vmem:[#allocation2 + $0x80] sm:$0xff] }
 0x1ab   : > { %3070 = vst.msk [vmem:[#allocation2 + $0x38] sm:$0xff] %vm171_vm1, %v3034_v58  ;;  %v3398_v51 = vadd.f32 %v6366_v38, %v3104_v17  ;;  %v3103_v37 = vld [vmem:[#allocation2 + $0x10] sm:$0xff] }
 0x1ac   : > { %3069 = vst.msk [vmem:[#allocation2 + $0x30] sm:$0xff] %vm171_vm1, %v3033_v45  ;;  %v3397_v25 = vadd.f32 %v3226_v36, %v3103_v37  ;;  %v6319_v7 = vpop.f32.mrb[98].mxu1 }
 0x1ad   : > { %v6372_v22 = vpop.f32.mrb[96].mxu0  ;;  %3434 = vst.msk [vmem:[#allocation2 + $0x18] sm:$0xff] %vm171_vm1, %v3398_v51  ;;  %v3036_v24 = vadd.f32 %v6319_v7, %v2607_v21  ;;  %v2888_v46 = vpop.f32.mrb[99].mxu1  ;;  %v2617_v51 = vld [vmem:[#allocation2 + $0x98] sm:$0xff] }
 0x1ae   : > { %v3246_v4 = vpop.f32.mrb[97].mxu0  ;;  %3433 = vst.msk [vmem:[#allocation2 + $0x10] sm:$0xff] %vm171_vm1, %v3397_v25  ;;  %v3035_v34 = vadd.f32 %v2888_v46, %v2606_v8  ;;  %v3106_v55 = vld [vmem:[#allocation2 + $0x28] sm:$0xff]  ;;  %v2616_v25 = vld [vmem:[#allocation2 + $0x90] sm:$0xff] }
 0x1af   : > { %3072 = vst.msk [vmem:[#allocation2 + $0x48] sm:$0xff] %vm171_vm1, %v3036_v24  ;;  %v3400_v6 = vadd.f32 %v6369_v43, %v3106_v55  ;;  %v3105_v52 = vld [vmem:[#allocation2 + $0x20] sm:$0xff] }
 0x1b0   : > { %3071 = vst.msk [vmem:[#allocation2 + $0x40] sm:$0xff] %vm171_vm1, %v3035_v34  ;;  %v3399_v9 = vadd.f32 %v3236_v23, %v3105_v52  ;;  %v6322_v20 = vpop.f32.mrb[100].mxu1 }
 0x1b1   : > { %v6375_v26 = vpop.f32.mrb[98].mxu0  ;;  %3436 = vst.msk [vmem:[#allocation2 + $0x28] sm:$0xff] %vm171_vm1, %v3400_v6  ;;  %v3038_v33 = vadd.f32 %v6322_v20, %v2609_v57  ;;  %v2898_v41 = vpop.f32.mrb[101].mxu1  ;;  %v2619_v6 = vld [vmem:[#allocation2 + $0xa8] sm:$0xff] }
 0x1b2   : > { %v3256_v1 = vpop.f32.mrb[99].mxu0  ;;  %3435 = vst.msk [vmem:[#allocation2 + $0x20] sm:$0xff] %vm171_vm1, %v3399_v9  ;;  %v3037_v28 = vadd.f32 %v2898_v41, %v2608_v29  ;;  %v3108_v18 = vld [vmem:[#allocation2 + $0x38] sm:$0xff]  ;;  %v2618_v9 = vld [vmem:[#allocation2 + $0xa0] sm:$0xff] }
 0x1b3   : > { %3074 = vst.msk [vmem:[#allocation2 + $0x58] sm:$0xff] %vm171_vm1, %v3038_v33  ;;  %v3402_v31 = vadd.f32 %v6372_v22, %v3108_v18  ;;  %v3107_v62 = vld [vmem:[#allocation2 + $0x30] sm:$0xff] }
 0x1b4   : > { %3073 = vst.msk [vmem:[#allocation2 + $0x50] sm:$0xff] %vm171_vm1, %v3037_v28  ;;  %v3401_v44 = vadd.f32 %v3246_v4, %v3107_v62  ;;  %v6325_v5 = vpop.f32.mrb[102].mxu1 }
 0x1b5   : > { %v6378_v59 = vpop.f32.mrb[100].mxu0  ;;  %3438 = vst.msk [vmem:[#allocation2 + $0x38] sm:$0xff] %vm171_vm1, %v3402_v31  ;;  %v3040_v40 = vadd.f32 %v6325_v5, %v2611_v39  ;;  %v2908_v2 = vpop.f32.mrb[103].mxu1  ;;  %v2621_v31 = vld [vmem:[#allocation2 + $0xb8] sm:$0xff] }
 0x1b6   : > { %v3266_v61 = vpop.f32.mrb[101].mxu0  ;;  %3437 = vst.msk [vmem:[#allocation2 + $0x30] sm:$0xff] %vm171_vm1, %v3401_v44  ;;  %v3039_v0 = vadd.f32 %v2908_v2, %v2610_v35  ;;  %v3110_v12 = vld [vmem:[#allocation2 + $0x48] sm:$0xff]  ;;  %v2620_v44 = vld [vmem:[#allocation2 + $0xb0] sm:$0xff] }
 0x1b7   : > { %3076 = vst.msk [vmem:[#allocation2 + $0x68] sm:$0xff] %vm171_vm1, %v3040_v40  ;;  %v3404_v48 = vadd.f32 %v6375_v26, %v3110_v12  ;;  %v3109_v60 = vld [vmem:[#allocation2 + $0x40] sm:$0xff] }
 0x1b8   : > { %3075 = vst.msk [vmem:[#allocation2 + $0x60] sm:$0xff] %vm171_vm1, %v3039_v0  ;;  %v3403_v38 = vadd.f32 %v3256_v1, %v3109_v60  ;;  %v6328_v13 = vpop.f32.mrb[104].mxu1 }
 0x1b9   : > { %v6381_v32 = vpop.f32.mrb[102].mxu0  ;;  %3440 = vst.msk [vmem:[#allocation2 + $0x48] sm:$0xff] %vm171_vm1, %v3404_v48  ;;  %v3042_v36 = vadd.f32 %v6328_v13, %v2613_v47  ;;  %v2918_v3 = vpop.f32.mrb[105].mxu1  ;;  %v2623_v48 = vld [vmem:[#allocation2 + $0xc8] sm:$0xff] }
 0x1ba   : > { %v3276_v30 = vpop.f32.mrb[103].mxu0  ;;  %3439 = vst.msk [vmem:[#allocation2 + $0x40] sm:$0xff] %vm171_vm1, %v3403_v38  ;;  %v3041_v15 = vadd.f32 %v2918_v3, %v2612_v54  ;;  %v3112_v10 = vld [vmem:[#allocation2 + $0x58] sm:$0xff]  ;;  %v2622_v38 = vld [vmem:[#allocation2 + $0xc0] sm:$0xff] }
 0x1bb   : > { %3078 = vst.msk [vmem:[#allocation2 + $0x78] sm:$0xff] %vm171_vm1, %v3042_v36  ;;  %v3406_v11 = vadd.f32 %v6378_v59, %v3112_v10  ;;  %v3111_v49 = vld [vmem:[#allocation2 + $0x50] sm:$0xff] }
 0x1bc   : > { %3077 = vst.msk [vmem:[#allocation2 + $0x70] sm:$0xff] %vm171_vm1, %v3041_v15  ;;  %v3405_v43 = vadd.f32 %v3266_v61, %v3111_v49  ;;  %v6331_v53 = vpop.f32.mrb[106].mxu1 }
 0x1bd   : > { %v6384_v63 = vpop.f32.mrb[104].mxu0  ;;  %3442 = vst.msk [vmem:[#allocation2 + $0x58] sm:$0xff] %vm171_vm1, %v3406_v11  ;;  %v3044_v23 = vadd.f32 %v6331_v53, %v2615_v14  ;;  %v2928_v56 = vpop.f32.mrb[107].mxu1  ;;  %v2625_v11 = vld [vmem:[#allocation2 + $0xd8] sm:$0xff] }
 0x1be   : > { %v3286_v19 = vpop.f32.mrb[105].mxu0  ;;  %3441 = vst.msk [vmem:[#allocation2 + $0x50] sm:$0xff] %vm171_vm1, %v3405_v43  ;;  %v3043_v50 = vadd.f32 %v2928_v56, %v2614_v27  ;;  %v3114_v58 = vld [vmem:[#allocation2 + $0x68] sm:$0xff]  ;;  %v2624_v43 = vld [vmem:[#allocation2 + $0xd0] sm:$0xff] }
 0x1bf   : > { %3080 = vst.msk [vmem:[#allocation2 + $0x88] sm:$0xff] %vm171_vm1, %v3044_v23  ;;  %v3408_v42 = vadd.f32 %v6381_v32, %v3114_v58  ;;  %v3113_v45 = vld [vmem:[#allocation2 + $0x60] sm:$0xff] }
 0x1c0   : > { %3079 = vst.msk [vmem:[#allocation2 + $0x80] sm:$0xff] %vm171_vm1, %v3043_v50  ;;  %v3407_v22 = vadd.f32 %v3276_v30, %v3113_v45  ;;  %v6334_v37 = vpop.f32.mrb[108].mxu1 }
 0x1c1   : > { %v6387_v16 = vpop.f32.mrb[106].mxu0  ;;  %3444 = vst.msk [vmem:[#allocation2 + $0x68] sm:$0xff] %vm171_vm1, %v3408_v42  ;;  %v3046_v4 = vadd.f32 %v6334_v37, %v2617_v51  ;;  %v2938_v21 = vpop.f32.mrb[109].mxu1  ;;  %v2627_v42 = vld [vmem:[#allocation2 + $0xe8] sm:$0xff] }
 0x1c2   : > { %v3296_v17 = vpop.f32.mrb[107].mxu0  ;;  %3443 = vst.msk [vmem:[#allocation2 + $0x60] sm:$0xff] %vm171_vm1, %v3407_v22  ;;  %v3045_v7 = vadd.f32 %v2938_v21, %v2616_v25  ;;  %v3116_v24 = vld [vmem:[#allocation2 + $0x78] sm:$0xff]  ;;  %v2626_v22 = vld [vmem:[#allocation2 + $0xe0] sm:$0xff]  ;;  %v8263_v37 = vpop.permute.xlu0 %4549 }
 0x1c3   : > { %3082 = vst.msk [vmem:[#allocation2 + $0x98] sm:$0xff] %vm171_vm1, %v3046_v4  ;;  %v3410_v46 = vadd.f32 %v6384_v63, %v3116_v24  ;;  %v3115_v34 = vld [vmem:[#allocation2 + $0x70] sm:$0xff] }
 0x1c4   : > { %3081 = vst.msk [vmem:[#allocation2 + $0x90] sm:$0xff] %vm171_vm1, %v3045_v7  ;;  %v3409_v26 = vadd.f32 %v3286_v19, %v3115_v34  ;;  %v6337_v52 = vpop.f32.mrb[110].mxu1  ;;  %v8266_v7 = vpop.permute.xlu1 %4559 }
 0x1c5   : > { %v6390_v8 = vpop.f32.mrb[108].mxu0  ;;  %3446 = vst.msk [vmem:[#allocation2 + $0x78] sm:$0xff] %vm171_vm1, %v3410_v46  ;;  %v3048_v1 = vadd.f32 %v6337_v52, %v2619_v6  ;;  %v2948_v57 = vpop.f32.mrb[111].mxu1  ;;  %v2628_v52 = vld [vmem:[#allocation2 + $0xf0] sm:$0xff] }
 0x1c6   : > { %v3306_v55 = vpop.f32.mrb[109].mxu0  ;;  %3445 = vst.msk [vmem:[#allocation2 + $0x70] sm:$0xff] %vm171_vm1, %v3409_v26  ;;  %v3047_v20 = vadd.f32 %v2948_v57, %v2618_v9  ;;  %v3118_v33 = vld [vmem:[#allocation2 + $0x88] sm:$0xff] }
 0x1c7   : > { %3084 = vst.msk [vmem:[#allocation2 + $0xa8] sm:$0xff] %vm171_vm1, %v3048_v1  ;;  %v3412_v41 = vadd.f32 %v6387_v16, %v3118_v33  ;;  %v3117_v28 = vld [vmem:[#allocation2 + $0x80] sm:$0xff] }
 0x1c8   : > { %3083 = vst.msk [vmem:[#allocation2 + $0xa0] sm:$0xff] %vm171_vm1, %v3047_v20  ;;  %v3411_v59 = vadd.f32 %v3296_v17, %v3117_v28  ;;  %v6340_v62 = vpop.f32.mrb[112].mxu1  ;;  %v8273_v28 = vpop.permute.xlu0 %4554 }
 0x1c9   : > { %v6393_v29 = vpop.f32.mrb[110].mxu0  ;;  %3448 = vst.msk [vmem:[#allocation2 + $0x88] sm:$0xff] %vm171_vm1, %v3412_v41  ;;  %v3050_v61 = vadd.f32 %v6340_v62, %v2621_v31  ;;  %v2958_v39 = vpop.f32.mrb[113].mxu1 }
 0x1ca   : > { %v3316_v18 = vpop.f32.mrb[111].mxu0  ;;  %3447 = vst.msk [vmem:[#allocation2 + $0x80] sm:$0xff] %vm171_vm1, %v3411_v59  ;;  %v3049_v5 = vadd.f32 %v2958_v39, %v2620_v44  ;;  %v3120_v40 = vld [vmem:[#allocation2 + $0x98] sm:$0xff]  ;;  %v2631_v59 = vld [vmem:[#allocation2 + $0x108] sm:$0xff]  ;;  %v8276_v62 = vpop.permute.xlu1 %4564  ;;  %v2630_v44 = vld [vmem:[#allocation2 + $0x100] sm:$0xff] }
 0x1cb   : > { %3086 = vst.msk [vmem:[#allocation2 + $0xb8] sm:$0xff] %vm171_vm1, %v3050_v61  ;;  %v3414_v2 = vadd.f32 %v6390_v8, %v3120_v40  ;;  %v3119_v0 = vld [vmem:[#allocation2 + $0x90] sm:$0xff] }
 0x1cc   : > { %3085 = vst.msk [vmem:[#allocation2 + $0xb0] sm:$0xff] %vm171_vm1, %v3049_v5  ;;  %v3413_v32 = vadd.f32 %v3306_v55, %v3119_v0  ;;  %v6343_v60 = vpop.f32.mrb[114].mxu1  ;;  %v2629_v55 = vld [vmem:[#allocation2 + $0xf8] sm:$0xff] }
 0x1cd   : > { %v6396_v35 = vpop.f32.mrb[112].mxu0  ;;  %3450 = vst.msk [vmem:[#allocation2 + $0x98] sm:$0xff] %vm171_vm1, %v3414_v2  ;;  %v3052_v30 = vadd.f32 %v6343_v60, %v2623_v48  ;;  %v2968_v47 = vpop.f32.mrb[115].mxu1  ;;  %v2633_v48 = vld [vmem:[#allocation2 + $0x118] sm:$0xff] }
 0x1ce   : > { %v3326_v12 = vpop.f32.mrb[113].mxu0  ;;  %3449 = vst.msk [vmem:[#allocation2 + $0x90] sm:$0xff] %vm171_vm1, %v3413_v32  ;;  %v3051_v13 = vadd.f32 %v2968_v47, %v2622_v38  ;;  %v3122_v36 = vld [vmem:[#allocation2 + $0xa8] sm:$0xff]  ;;  %v2632_v38 = vld [vmem:[#allocation2 + $0x110] sm:$0xff] }
 0x1cf   : > { %3088 = vst.msk [vmem:[#allocation2 + $0xc8] sm:$0xff] %vm171_vm1, %v3052_v30  ;;  %v3416_v3 = vadd.f32 %v6393_v29, %v3122_v36  ;;  %v3121_v15 = vld [vmem:[#allocation2 + $0xa0] sm:$0xff] }
 0x1d0   : > { %3087 = vst.msk [vmem:[#allocation2 + $0xc0] sm:$0xff] %vm171_vm1, %v3051_v13  ;;  %v3415_v63 = vadd.f32 %v3316_v18, %v3121_v15  ;;  %v6346_v49 = vpop.f32.mrb[116].mxu1  ;;  %v8283_v13 = vpop.permute.xlu0 %4569 }
 0x1d1   : > { %v6399_v54 = vpop.f32.mrb[114].mxu0  ;;  %3452 = vst.msk [vmem:[#allocation2 + $0xa8] sm:$0xff] %vm171_vm1, %v3416_v3  ;;  %v3054_v19 = vadd.f32 %v6346_v49, %v2625_v11  ;;  %v2978_v14 = vpop.f32.mrb[117].mxu1 }
 0x1d2   : > { %v3336_v10 = vpop.f32.mrb[115].mxu0  ;;  %3451 = vst.msk [vmem:[#allocation2 + $0xa0] sm:$0xff] %vm171_vm1, %v3415_v63  ;;  %v3053_v53 = vadd.f32 %v2978_v14, %v2624_v43  ;;  %v3124_v23 = vld [vmem:[#allocation2 + $0xb8] sm:$0xff]  ;;  %v8286_v15 = vpop.permute.xlu1 %4574 }
 0x1d3   : > { %3090 = vst.msk [vmem:[#allocation2 + $0xd8] sm:$0xff] %vm171_vm1, %v3054_v19  ;;  %v3418_v56 = vadd.f32 %v6396_v35, %v3124_v23  ;;  %v3123_v50 = vld [vmem:[#allocation2 + $0xb0] sm:$0xff]  ;;  %v3470_v19 = vld [vmem:[#allocation2 + $0x8] sm:$0xff] }
 0x1d4   : > { %3089 = vst.msk [vmem:[#allocation2 + $0xd0] sm:$0xff] %vm171_vm1, %v3053_v53  ;;  %v3417_v16 = vadd.f32 %v3326_v12, %v3123_v50  ;;  %v6349_v45 = vpop.f32.mrb[118].mxu1  ;;  %v3469_v53 = vld [vmem:[#allocation2] sm:$0xff] }
 0x1d5   : > { %v6402_v27 = vpop.f32.mrb[116].mxu0  ;;  %3454 = vst.msk [vmem:[#allocation2 + $0xb8] sm:$0xff] %vm171_vm1, %v3418_v56  ;;  %v3056_v17 = vadd.f32 %v6349_v45, %v2627_v42  ;;  %v2988_v51 = vpop.f32.mrb[119].mxu1 }
 0x1d6   : > { %v3346_v58 = vpop.f32.mrb[117].mxu0  ;;  %3453 = vst.msk [vmem:[#allocation2 + $0xb0] sm:$0xff] %vm171_vm1, %v3417_v16  ;;  %v3055_v4 = vadd.f32 %v2988_v51, %v2626_v22  ;;  %v3126_v25 = vld [vmem:[#allocation2 + $0xc8] sm:$0xff]  ;;  %v8293_v45 = vpop.permute.xlu0 %4579  ;;  %v3472_v22 = vld [vmem:[#allocation2 + $0x18] sm:$0xff] }
 0x1d7   : > { %3092 = vst.msk [vmem:[#allocation2 + $0xe8] sm:$0xff] %vm171_vm1, %v3056_v17  ;;  %v3420_v24 = vadd.f32 %v6399_v54, %v3126_v25  ;;  %v3125_v8 = vld [vmem:[#allocation2 + $0xc0] sm:$0xff] }
 0x1d8   : > { %3091 = vst.msk [vmem:[#allocation2 + $0xe0] sm:$0xff] %vm171_vm1, %v3055_v4  ;;  %v3419_v34 = vadd.f32 %v3336_v10, %v3125_v8  ;;  %v6352_v26 = vpop.f32.mrb[120].mxu1  ;;  %v8296_v4 = vpop.permute.xlu1 %4584 }
 0x1d9   : > { %v6405_v21 = vpop.f32.mrb[118].mxu0  ;;  %3456 = vst.msk [vmem:[#allocation2 + $0xc8] sm:$0xff] %vm171_vm1, %v3420_v24  ;;  %v3058_v6 = vadd.f32 %v6352_v26, %v2629_v55  ;;  %v2998_v1 = vpop.f32.mrb[121].mxu1 }
 0x1da   : > { %v3356_v46 = vpop.f32.mrb[119].mxu0  ;;  %3455 = vst.msk [vmem:[#allocation2 + $0xc0] sm:$0xff] %vm171_vm1, %v3419_v34  ;;  %v3057_v9 = vadd.f32 %v2998_v1, %v2628_v52  ;;  %v3128_v57 = vld [vmem:[#allocation2 + $0xd8] sm:$0xff]  ;;  %v3474_v1 = vld [vmem:[#allocation2 + $0x28] sm:$0xff] }
 0x1db   : > { %3094 = vst.msk [vmem:[#allocation2 + $0xf8] sm:$0xff] %vm171_vm1, %v3058_v6  ;;  %v3422_v33 = vadd.f32 %v6402_v27, %v3128_v57  ;;  %v3127_v29 = vld [vmem:[#allocation2 + $0xd0] sm:$0xff] }
 0x1dc   : > { %3093 = vst.msk [vmem:[#allocation2 + $0xf0] sm:$0xff] %vm171_vm1, %v3057_v9  ;;  %v3421_v18 = vadd.f32 %v3346_v58, %v3127_v29  ;;  %v6355_v31 = vpop.f32.mrb[122].mxu1  ;;  %v8303_v29 = vpop.permute.xlu0 %4589 }
 0x1dd   : > { %v6408_v20 = vpop.f32.mrb[120].mxu0  ;;  %3458 = vst.msk [vmem:[#allocation2 + $0xd8] sm:$0xff] %vm171_vm1, %v3422_v33  ;;  %v3060_v61 = vadd.f32 %v6355_v31, %v2631_v59  ;;  %v3008_v39 = vpop.f32.mrb[123].mxu1 }
 0x1de   : > { %v3366_v41 = vpop.f32.mrb[121].mxu0  ;;  %3457 = vst.msk [vmem:[#allocation2 + $0xd0] sm:$0xff] %vm171_vm1, %v3421_v18  ;;  %v3059_v5 = vadd.f32 %v3008_v39, %v2630_v44  ;;  %v3130_v40 = vld [vmem:[#allocation2 + $0xe8] sm:$0xff]  ;;  %v8306_v31 = vpop.permute.xlu1 %4594 }
 0x1df   : > { %3096 = vst.msk [vmem:[#allocation2 + $0x108] sm:$0xff] %vm171_vm1, %v3060_v61  ;;  %v3424_v2 = vadd.f32 %v6405_v21, %v3130_v40  ;;  %v3129_v0 = vld [vmem:[#allocation2 + $0xe0] sm:$0xff]  ;;  %v3471_v21 = vld [vmem:[#allocation2 + $0x10] sm:$0xff]  ;;  %v3476_v40 = vld [vmem:[#allocation2 + $0x38] sm:$0xff] }
 0x1e0   : > { %3095 = vst.msk [vmem:[#allocation2 + $0x100] sm:$0xff] %vm171_vm1, %v3059_v5  ;;  %v3423_v32 = vadd.f32 %v3356_v46, %v3129_v0  ;;  %v6358_v60 = vpop.f32.mrb[124].mxu1  ;;  %v3475_v0 = vld [vmem:[#allocation2 + $0x30] sm:$0xff] }
 0x1e1   : > { %v6411_v35 = vpop.f32.mrb[122].mxu0  ;;  %3460 = vst.msk [vmem:[#allocation2 + $0xe8] sm:$0xff] %vm171_vm1, %v3424_v2  ;;  %v3062_v30 = vadd.f32 %v6358_v60, %v2633_v48  ;;  %v3018_v47 = vpop.f32.mrb[125].mxu1 }
 0x1e2   : > { %v3376_v12 = vpop.f32.mrb[123].mxu0  ;;  %3459 = vst.msk [vmem:[#allocation2 + $0xe0] sm:$0xff] %vm171_vm1, %v3423_v32  ;;  %v3061_v36 = vadd.f32 %v3018_v47, %v2632_v38  ;;  %v3132_v54 = vld [vmem:[#allocation2 + $0xf8] sm:$0xff] }
 0x1e3   : > { %3098 = vst.msk [vmem:[#allocation2 + $0x118] sm:$0xff] %vm171_vm1, %v3062_v30  ;;  %v3426_v10 = vadd.f32 %v6408_v20, %v3132_v54  ;;  %v3131_v63 = vld [vmem:[#allocation2 + $0xf0] sm:$0xff]  ;;  %v3473_v20 = vld [vmem:[#allocation2 + $0x20] sm:$0xff] }
 0x1e4   : > { %3097 = vst.msk [vmem:[#allocation2 + $0x110] sm:$0xff] %vm171_vm1, %v3061_v36  ;;  %v3425_v49 = vadd.f32 %v3366_v41, %v3131_v63  ;;  %v6419_v43 = vpop.f32.mrb[126].mxu1  ;;  %v8313_v36 = vpop.permute.xlu0 %4599 }
 0x1e5   : > { %v6414_v3 = vpop.f32.mrb[124].mxu0  ;;  %3462 = vst.msk [vmem:[#allocation2 + $0xf8] sm:$0xff] %vm171_vm1, %v3426_v10  ;;  %v3900_v14 = vadd.f32 %v6419_v43, %v3470_v19  ;;  %v3720_v23 = vpop.f32.mrb[127].mxu1 }
 0x1e6   : > { %v3386_v11 = vpop.f32.mrb[125].mxu0  ;;  %3461 = vst.msk [vmem:[#allocation2 + $0xf0] sm:$0xff] %vm171_vm1, %v3425_v49  ;;  %v3134_v27 = vld [vmem:[#allocation2 + $0x108] sm:$0xff]  ;;  %v3899_v56 = vadd.f32 %v3720_v23, %v3469_v53  ;;  %v8316_v63 = vpop.permute.xlu1 %4604  ;;  %v3477_v49 = vld [vmem:[#allocation2 + $0x40] sm:$0xff] }
 0x1e7   : > { %3936 = vst.msk [vmem:[#allocation2 + $0x8] sm:$0xff] %vm171_vm1, %v3900_v14  ;;  %v3428_v58 = vadd.f32 %v6411_v35, %v3134_v27  ;;  %v3133_v16 = vld [vmem:[#allocation2 + $0x100] sm:$0xff] }
 0x1e8   : > { %3935 = vst.msk [vmem:[#allocation2] sm:$0xff] %vm171_vm1, %v3899_v56  ;;  %v3427_v17 = vadd.f32 %v3376_v12, %v3133_v16  ;;  %v6422_v51 = vpop.f32.mrb[128].mxu1  ;;  %v3480_v16 = vld [vmem:[#allocation2 + $0x58] sm:$0xff] }
 0x1e9   : > { %v6475_v50 = vpop.f32.mrb[126].mxu0  ;;  %3464 = vst.msk [vmem:[#allocation2 + $0x108] sm:$0xff] %vm171_vm1, %v3428_v58  ;;  %v3902_v25 = vadd.f32 %v6422_v51, %v3472_v22  ;;  %v3730_v24 = vpop.f32.mrb[129].mxu1 }
 0x1ea   : > { %v4224_v42 = vpop.f32.mrb[127].mxu0  ;;  %3463 = vst.msk [vmem:[#allocation2 + $0x100] sm:$0xff] %vm171_vm1, %v3427_v17  ;;  %v3136_v8 = vld [vmem:[#allocation2 + $0x118] sm:$0xff]  ;;  %v3901_v46 = vadd.f32 %v3730_v24, %v3471_v21  ;;  %v8329_v24 = vpop.permute.xlu0 %4609 }
 0x1eb   : > { %3938 = vst.msk [vmem:[#allocation2 + $0x18] sm:$0xff] %vm171_vm1, %v3902_v25  ;;  %v3430_v55 = vadd.f32 %v6414_v3, %v3136_v8  ;;  %v3135_v26 = vld [vmem:[#allocation2 + $0x110] sm:$0xff]  ;;  %v3478_v3 = vld [vmem:[#allocation2 + $0x48] sm:$0xff] }
 0x1ec   : > { %3937 = vst.msk [vmem:[#allocation2 + $0x10] sm:$0xff] %vm171_vm1, %v3901_v46  ;;  %v3429_v52 = vadd.f32 %v3386_v11, %v3135_v26  ;;  %v6425_v9 = vpop.f32.mrb[130].mxu1  ;;  %v3479_v25 = vld [vmem:[#allocation2 + $0x50] sm:$0xff]  ;;  %v8334_v26 = vpop.permute.xlu1 %4614 }
 0x1ed   : > { %v6478_v34 = vpop.f32.mrb[128].mxu0  ;;  %3466 = vst.msk [vmem:[#allocation2 + $0x118] sm:$0xff] %vm171_vm1, %v3430_v55  ;;  %v3904_v57 = vadd.f32 %v6425_v9, %v3474_v1  ;;  %v3740_v33 = vpop.f32.mrb[131].mxu1 }
 0x1ee   : > { %v4234_v6 = vpop.f32.mrb[129].mxu0  ;;  %3465 = vst.msk [vmem:[#allocation2 + $0x110] sm:$0xff] %vm171_vm1, %v3429_v52  ;;  %v3903_v41 = vadd.f32 %v3740_v33, %v3473_v20  ;;  %v3974_v18 = vld [vmem:[#allocation2 + $0x8] sm:$0xff] }
 0x1ef   : > { %3940 = vst.msk [vmem:[#allocation2 + $0x28] sm:$0xff] %vm171_vm1, %v3904_v57  ;;  %v4404_v61 = vadd.f32 %v6475_v50, %v3974_v18  ;;  %v3973_v44 = vld [vmem:[#allocation2] sm:$0xff] }
 0x1f0   : > { %3939 = vst.msk [vmem:[#allocation2 + $0x20] sm:$0xff] %vm171_vm1, %v3903_v41  ;;  %v4403_v5 = vadd.f32 %v4224_v42, %v3973_v44  ;;  %v6428_v35 = vpop.f32.mrb[132].mxu1  ;;  %v3482_v41 = vld [vmem:[#allocation2 + $0x68] sm:$0xff]  ;;  %v3481_v44 = vld [vmem:[#allocation2 + $0x60] sm:$0xff] }
 0x1f1   : > { %v6481_v59 = vpop.f32.mrb[130].mxu0  ;;  %4440 = vst.msk [vmem:[#allocation2 + $0x8] sm:$0xff] %vm171_vm1, %v4404_v61  ;;  %v3906_v2 = vadd.f32 %v6428_v35, %v3476_v40  ;;  %v3750_v12 = vpop.f32.mrb[133].mxu1 }
 0x1f2   : > { %v4244_v39 = vpop.f32.mrb[131].mxu0  ;;  %4439 = vst.msk [vmem:[#allocation2] sm:$0xff] %vm171_vm1, %v4403_v5  ;;  %v3905_v32 = vadd.f32 %v3750_v12, %v3475_v0  ;;  %v3976_v48 = vld [vmem:[#allocation2 + $0x18] sm:$0xff] }
 0x1f3   : > { %3942 = vst.msk [vmem:[#allocation2 + $0x38] sm:$0xff] %vm171_vm1, %v3906_v2  ;;  %v4406_v30 = vadd.f32 %v6478_v34, %v3976_v48  ;;  %v3975_v38 = vld [vmem:[#allocation2 + $0x10] sm:$0xff] }
 0x1f4   : > { %3941 = vst.msk [vmem:[#allocation2 + $0x30] sm:$0xff] %vm171_vm1, %v3905_v32  ;;  %v4405_v54 = vadd.f32 %v4234_v6, %v3975_v38  ;;  %v6431_v10 = vpop.f32.mrb[134].mxu1 }
 0x1f5   : > { %v6484_v60 = vpop.f32.mrb[132].mxu0  ;;  %4442 = vst.msk [vmem:[#allocation2 + $0x18] sm:$0xff] %vm171_vm1, %v4406_v30  ;;  %v3908_v11 = vadd.f32 %v6431_v10, %v3478_v3  ;;  %v3760_v19 = vpop.f32.mrb[135].mxu1  ;;  %v3484_v3 = vld [vmem:[#allocation2 + $0x78] sm:$0xff] }
 0x1f6   : > { %v4254_v47 = vpop.f32.mrb[133].mxu0  ;;  %4441 = vst.msk [vmem:[#allocation2 + $0x10] sm:$0xff] %vm171_vm1, %v4405_v54  ;;  %v3907_v43 = vadd.f32 %v3760_v19, %v3477_v49  ;;  %v3978_v14 = vld [vmem:[#allocation2 + $0x28] sm:$0xff]  ;;  %v8351_v30 = vpop.permute.xlu0 %4619 }
 0x1f7   : > { %3944 = vst.msk [vmem:[#allocation2 + $0x48] sm:$0xff] %vm171_vm1, %v3908_v11  ;;  %v4408_v23 = vadd.f32 %v6481_v59, %v3978_v14  ;;  %v3977_v27 = vld [vmem:[#allocation2 + $0x20] sm:$0xff]  ;;  %v8357_v11 = vpop.permute.xlu1 %4624  ;;  %v3483_v14 = vld [vmem:[#allocation2 + $0x70] sm:$0xff] }
 0x1f8   : > { %v8321_v50 = vld [vmem:[#allocation2 + $0x8] sm:$0xff]  ;;  %3943 = vst.msk [vmem:[#allocation2 + $0x40] sm:$0xff] %vm171_vm1, %v3907_v43  ;;  %v4407_v58 = vadd.f32 %v4244_v39, %v3977_v27  ;;  %v6434_v42 = vpop.f32.mrb[136].mxu1  ;;  %9309 = vst [vmem:[#allocation13_spill] sm:$0xff] %v8357_v11 }
 0x1f9   : > { %v6487_v53 = vpop.f32.mrb[134].mxu0  ;;  %v4728_v17 = vmul.f32 %v8273_v28, %v8321_v50  ;;  %v8326_v22 = vld [vmem:[#allocation2] sm:$0xff]  ;;  %4444 = vst.msk [vmem:[#allocation2 + $0x28] sm:$0xff] %vm171_vm1, %v4408_v23  ;;  %v3910_v51 = vadd.f32 %v6434_v42, %v3480_v16  ;;  %v3770_v21 = vpop.f32.mrb[137].mxu1 }
 0x1fa   : > { %v4264_v56 = vpop.f32.mrb[135].mxu0  ;;  %v4727_v8 = vmul.f32 %v8263_v37, %v8326_v22  ;;  %4443 = vst.msk [vmem:[#allocation2 + $0x20] sm:$0xff] %vm171_vm1, %v4407_v58  ;;  %v3909_v46 = vadd.f32 %v3770_v21, %v3479_v25  ;;  %v3980_v34 = vld [vmem:[#allocation2 + $0x38] sm:$0xff] }
 0x1fb   : > { %3946 = vst.msk [vmem:[#allocation2 + $0x58] sm:$0xff] %vm171_vm1, %v3910_v51  ;;  %v4410_v6 = vadd.f32 %v6484_v60, %v3980_v34  ;;  %v3979_v52 = vld [vmem:[#allocation2 + $0x30] sm:$0xff]  ;;  %v4764_v9 = vsel %vm171_vm1, %v4728_v17, 0.0 }
 0x1fc   : > { %v4763_v57 = vsel %vm171_vm1, %v4727_v8, 0.0  ;;  %v8339_v20 = vld [vmem:[#allocation2 + $0x18] sm:$0xff]  ;;  %3945 = vst.msk [vmem:[#allocation2 + $0x50] sm:$0xff] %vm171_vm1, %v3909_v46  ;;  %v4409_v33 = vadd.f32 %v4254_v47, %v3979_v52  ;;  %v6437_v18 = vpop.f32.mrb[138].mxu1 }
 0x1fd   : > { %v6490_v55 = vpop.f32.mrb[136].mxu0  ;;  %v8342_v59 = vld [vmem:[#allocation2 + $0x10] sm:$0xff]  ;;  %4446 = vst.msk [vmem:[#allocation2 + $0x38] sm:$0xff] %vm171_vm1, %v4410_v6  ;;  %v3912_v61 = vadd.f32 %v6437_v18, %v3482_v41  ;;  %v3780_v39 = vpop.f32.mrb[139].mxu1  ;;  %v4730_v5 = vmul.f32 %v8276_v62, %v8339_v20  ;;  %v4765_v12 = vadd.f32 %v4764_v9, %v4763_v57  ;;  %v3486_v6 = vld [vmem:[#allocation2 + $0x88] sm:$0xff]  ;;  %v3485_v41 = vld [vmem:[#allocation2 + $0x80] sm:$0xff] }
 0x1fe   : > { %v4274_v1 = vpop.f32.mrb[137].mxu0  ;;  %v4729_v40 = vmul.f32 %v8266_v7, %v8342_v59  ;;  %4445 = vst.msk [vmem:[#allocation2 + $0x30] sm:$0xff] %vm171_vm1, %v4409_v33  ;;  %v3911_v35 = vadd.f32 %v3780_v39, %v3481_v44  ;;  %v3982_v2 = vld [vmem:[#allocation2 + $0x48] sm:$0xff] }
 0x1ff   : > { %3948 = vst.msk [vmem:[#allocation2 + $0x68] sm:$0xff] %vm171_vm1, %v3912_v61  ;;  %v4412_v32 = vadd.f32 %v6487_v53, %v3982_v2  ;;  %v3981_v48 = vld [vmem:[#allocation2 + $0x40] sm:$0xff]  ;;  %v4768_v23 = vsel %vm171_vm1, %v4730_v5, 0.0 }
 0x200   : > { %v4766_v38 = vsel %vm171_vm1, %v4729_v40, 0.0  ;;  %v8354_v47 = vld [vmem:[#allocation2 + $0x28] sm:$0xff]  ;;  %3947 = vst.msk [vmem:[#allocation2 + $0x60] sm:$0xff] %vm171_vm1, %v3911_v35  ;;  %v4411_v54 = vadd.f32 %v4264_v56, %v3981_v48  ;;  %v6440_v10 = vpop.f32.mrb[140].mxu1  ;;  %v8384_v35 = vpop.permute.xlu1 %4634 }
 0x201   : > { %v6493_v0 = vpop.f32.mrb[138].mxu0  ;;  %v4767_v49 = vadd.f32 %v4766_v38, %v4765_v12  ;;  %v8359_v19 = vld [vmem:[#allocation2 + $0x20] sm:$0xff]  ;;  %4448 = vst.msk [vmem:[#allocation2 + $0x48] sm:$0xff] %vm171_vm1, %v4412_v32  ;;  %v3914_v43 = vadd.f32 %v6440_v10, %v3484_v3  ;;  %v3790_v53 = vpop.f32.mrb[141].mxu1  ;;  %v4732_v27 = vmul.f32 %v8286_v15, %v8354_v47  ;;  %9311 = vst [vmem:[#allocation14_spill] sm:$0xff] %v8384_v35  ;;  %v3488_v10 = vld [vmem:[#allocation2 + $0x98] sm:$0xff] }
 0x202   : > { %v4284_v60 = vpop.f32.mrb[139].mxu0  ;;  %v4731_v56 = vmul.f32 %v8283_v13, %v8359_v19  ;;  %4447 = vst.msk [vmem:[#allocation2 + $0x40] sm:$0xff] %vm171_vm1, %v4411_v54  ;;  %v3913_v58 = vadd.f32 %v3790_v53, %v3483_v14  ;;  %v3984_v16 = vld [vmem:[#allocation2 + $0x58] sm:$0xff] }
 0x203   : > { %v4769_v17 = vadd.f32 %v4768_v23, %v4767_v49  ;;  %3950 = vst.msk [vmem:[#allocation2 + $0x78] sm:$0xff] %vm171_vm1, %v3914_v43  ;;  %v4414_v51 = vadd.f32 %v6490_v55, %v3984_v16  ;;  %v3983_v25 = vld [vmem:[#allocation2 + $0x50] sm:$0xff]  ;;  %v8376_v55 = vpop.permute.xlu0 %4629  ;;  %v4772_v61 = vsel %vm171_vm1, %v4732_v27, 0.0 }
 0x204   : > { %v4770_v8 = vsel %vm171_vm1, %v4731_v56, 0.0  ;;  %v8370_v46 = vld [vmem:[#allocation2 + $0x38] sm:$0xff]  ;;  %3949 = vst.msk [vmem:[#allocation2 + $0x70] sm:$0xff] %vm171_vm1, %v3913_v58  ;;  %v4413_v34 = vadd.f32 %v4274_v1, %v3983_v25  ;;  %v6443_v52 = vpop.f32.mrb[142].mxu1  ;;  %9310 = vst [vmem:[#allocation3_spill] sm:$0xff] %v8376_v55  ;;  %v3487_v23 = vld [vmem:[#allocation2 + $0x90] sm:$0xff] }
 0x205   : > { %v6496_v42 = vpop.f32.mrb[140].mxu0  ;;  %v4771_v9 = vadd.f32 %v4770_v8, %v4769_v17  ;;  %v8373_v57 = vld [vmem:[#allocation2 + $0x30] sm:$0xff]  ;;  %4450 = vst.msk [vmem:[#allocation2 + $0x58] sm:$0xff] %vm171_vm1, %v4414_v51  ;;  %v3916_v33 = vadd.f32 %v6443_v52, %v3486_v6  ;;  %v3800_v18 = vpop.f32.mrb[143].mxu1  ;;  %v4734_v44 = vmul.f32 %v8296_v4, %v8370_v46 }
 0x206   : > { %v4294_v21 = vpop.f32.mrb[141].mxu0  ;;  %v4733_v1 = vmul.f32 %v8293_v45, %v8373_v57  ;;  %4449 = vst.msk [vmem:[#allocation2 + $0x50] sm:$0xff] %vm171_vm1, %v4413_v34  ;;  %v3915_v39 = vadd.f32 %v3800_v18, %v3485_v41  ;;  %v3986_v5 = vld [vmem:[#allocation2 + $0x68] sm:$0xff] }
 0x207   : > { %v4773_v2 = vadd.f32 %v4772_v61, %v4771_v9  ;;  %3952 = vst.msk [vmem:[#allocation2 + $0x88] sm:$0xff] %vm171_vm1, %v3916_v33  ;;  %v4416_v12 = vadd.f32 %v6493_v0, %v3986_v5  ;;  %v3985_v32 = vld [vmem:[#allocation2 + $0x60] sm:$0xff]  ;;  %v4776_v0 = vsel %vm171_vm1, %v4734_v44, 0.0  ;;  %v8401_v6 = vpop.permute.xlu0 %4639  ;;  %v3490_v41 = vld [vmem:[#allocation2 + $0xa8] sm:$0xff]  ;;  %v8407_v61 = vpop.permute.xlu1 %4644 }
 0x208   : > { %v4774_v38 = vsel %vm171_vm1, %v4733_v1, 0.0  ;;  %v8388_v54 = vld [vmem:[#allocation2 + $0x48] sm:$0xff]  ;;  %3951 = vst.msk [vmem:[#allocation2 + $0x80] sm:$0xff] %vm171_vm1, %v3915_v39  ;;  %v4415_v3 = vadd.f32 %v4284_v60, %v3985_v32  ;;  %v6446_v49 = vpop.f32.mrb[144].mxu1  ;;  %9312 = vst [vmem:[#allocation4_spill] sm:$0xff] %v8401_v6  ;;  %v3489_v39 = vld [vmem:[#allocation2 + $0xa0] sm:$0xff] }
 0x209   : > { %v6499_v40 = vpop.f32.mrb[142].mxu0  ;;  %v4775_v43 = vadd.f32 %v4774_v38, %v4773_v2  ;;  %v8391_v14 = vld [vmem:[#allocation2 + $0x40] sm:$0xff]  ;;  %4452 = vst.msk [vmem:[#allocation2 + $0x68] sm:$0xff] %vm171_vm1, %v4416_v12  ;;  %v3918_v53 = vadd.f32 %v6446_v49, %v3488_v10  ;;  %v3810_v27 = vpop.f32.mrb[145].mxu1  ;;  %v4736_v56 = vmul.f32 %v8306_v31, %v8388_v54  ;;  %9313 = vst [vmem:[#allocation15_spill] sm:$0xff] %v8407_v61 }
 0x20a   : > { %v4304_v48 = vpop.f32.mrb[143].mxu0  ;;  %v4735_v58 = vmul.f32 %v8303_v29, %v8391_v14  ;;  %4451 = vst.msk [vmem:[#allocation2 + $0x60] sm:$0xff] %vm171_vm1, %v4415_v3  ;;  %v3917_v60 = vadd.f32 %v3810_v27, %v3487_v23  ;;  %v3988_v16 = vld [vmem:[#allocation2 + $0x78] sm:$0xff] }
 0x20b   : > { %v4777_v51 = vadd.f32 %v4776_v0, %v4775_v43  ;;  %3954 = vst.msk [vmem:[#allocation2 + $0x98] sm:$0xff] %vm171_vm1, %v3918_v53  ;;  %v4418_v25 = vadd.f32 %v6496_v42, %v3988_v16  ;;  %v3987_v8 = vld [vmem:[#allocation2 + $0x70] sm:$0xff]  ;;  %v4780_v2 = vsel %vm171_vm1, %v4736_v56, 0.0  ;;  %v3492_v56 = vld [vmem:[#allocation2 + $0xb8] sm:$0xff] }
 0x20c   : > { %v4778_v52 = vsel %vm171_vm1, %v4735_v58, 0.0  ;;  %v8404_v9 = vld [vmem:[#allocation2 + $0x58] sm:$0xff]  ;;  %3953 = vst.msk [vmem:[#allocation2 + $0x90] sm:$0xff] %vm171_vm1, %v3917_v60  ;;  %v4417_v33 = vadd.f32 %v4294_v21, %v3987_v8  ;;  %v6449_v18 = vpop.f32.mrb[146].mxu1 }
 0x20d   : > { %v6502_v17 = vpop.f32.mrb[144].mxu0  ;;  %v4779_v44 = vadd.f32 %v4778_v52, %v4777_v51  ;;  %v8409_v1 = vld [vmem:[#allocation2 + $0x50] sm:$0xff]  ;;  %4454 = vst.msk [vmem:[#allocation2 + $0x78] sm:$0xff] %vm171_vm1, %v4418_v25  ;;  %v3920_v42 = vadd.f32 %v6449_v18, %v3490_v41  ;;  %v3820_v5 = vpop.f32.mrb[147].mxu1  ;;  %v4738_v12 = vmul.f32 %v8316_v63, %v8404_v9 }
 0x20e   : > { %v4314_v34 = vpop.f32.mrb[145].mxu0  ;;  %v4737_v21 = vmul.f32 %v8313_v36, %v8409_v1  ;;  %4453 = vst.msk [vmem:[#allocation2 + $0x70] sm:$0xff] %vm171_vm1, %v4417_v33  ;;  %v3919_v32 = vadd.f32 %v3820_v5, %v3489_v39  ;;  %v3990_v38 = vld [vmem:[#allocation2 + $0x88] sm:$0xff]  ;;  %v3491_v25 = vld [vmem:[#allocation2 + $0xb0] sm:$0xff] }
 0x20f   : > { %v4781_v10 = vadd.f32 %v4780_v2, %v4779_v44  ;;  %3956 = vst.msk [vmem:[#allocation2 + $0xa8] sm:$0xff] %vm171_vm1, %v3920_v42  ;;  %v4420_v49 = vadd.f32 %v6499_v40, %v3990_v38  ;;  %v3989_v43 = vld [vmem:[#allocation2 + $0x80] sm:$0xff]  ;;  %v8426_v40 = vpop.permute.xlu0 %4649  ;;  %v4784_v52 = vsel %vm171_vm1, %v4738_v12, 0.0  ;;  %v8434_v42 = vpop.permute.xlu1 %4654 }
 0x210   : > { %v4782_v23 = vsel %vm171_vm1, %v4737_v21, 0.0  ;;  %v8420_v27 = vld [vmem:[#allocation2 + $0x68] sm:$0xff]  ;;  %3955 = vst.msk [vmem:[#allocation2 + $0xa0] sm:$0xff] %vm171_vm1, %v3919_v32  ;;  %v4419_v0 = vadd.f32 %v4304_v48, %v3989_v43  ;;  %v6452_v58 = vpop.f32.mrb[148].mxu1  ;;  %9314 = vst [vmem:[#allocation5_spill] sm:$0xff] %v8426_v40 }
 0x211   : > { %v6505_v3 = vpop.f32.mrb[146].mxu0  ;;  %v4783_v60 = vadd.f32 %v4782_v23, %v4781_v10  ;;  %v8423_v16 = vld [vmem:[#allocation2 + $0x60] sm:$0xff]  ;;  %4456 = vst.msk [vmem:[#allocation2 + $0x88] sm:$0xff] %vm171_vm1, %v4420_v49  ;;  %v3922_v51 = vadd.f32 %v6452_v58, %v3492_v56  ;;  %v3830_v8 = vpop.f32.mrb[149].mxu1  ;;  %v4740_v33 = vmul.f32 %v8334_v26, %v8420_v27  ;;  %9315 = vst [vmem:[#allocation16_spill] sm:$0xff] %v8434_v42  ;;  %v3494_v10 = vld [vmem:[#allocation2 + $0xc8] sm:$0xff] }
 0x212   : > { %v4324_v53 = vpop.f32.mrb[147].mxu0  ;;  %v4739_v48 = vmul.f32 %v8329_v24, %v8423_v16  ;;  %4455 = vst.msk [vmem:[#allocation2 + $0x80] sm:$0xff] %vm171_vm1, %v4419_v0  ;;  %v3921_v41 = vadd.f32 %v3830_v8, %v3491_v25  ;;  %v3992_v18 = vld [vmem:[#allocation2 + $0x98] sm:$0xff]  ;;  %v3493_v56 = vld [vmem:[#allocation2 + $0xc0] sm:$0xff] }
 0x213   : > { %v4785_v39 = vadd.f32 %v4784_v52, %v4783_v60  ;;  %3958 = vst.msk [vmem:[#allocation2 + $0xb8] sm:$0xff] %vm171_vm1, %v3922_v51  ;;  %v4422_v5 = vadd.f32 %v6502_v17, %v3992_v18  ;;  %v3991_v2 = vld [vmem:[#allocation2 + $0x90] sm:$0xff]  ;;  %v4788_v17 = vsel %vm171_vm1, %v4740_v33, 0.0 }
 0x214   : > { %v4786_v12 = vsel %vm171_vm1, %v4739_v48, 0.0  ;;  %v8438_v32 = vld [vmem:[#allocation2 + $0x78] sm:$0xff]  ;;  %3957 = vst.msk [vmem:[#allocation2 + $0xb0] sm:$0xff] %vm171_vm1, %v3921_v41  ;;  %v4421_v38 = vadd.f32 %v4314_v34, %v3991_v2  ;;  %v6455_v49 = vpop.f32.mrb[150].mxu1 }
 0x215   : > { %v6508_v44 = vpop.f32.mrb[148].mxu0  ;;  %v4787_v43 = vadd.f32 %v4786_v12, %v4785_v39  ;;  %v8441_v23 = vld [vmem:[#allocation2 + $0x70] sm:$0xff]  ;;  %4458 = vst.msk [vmem:[#allocation2 + $0x98] sm:$0xff] %vm171_vm1, %v4422_v5  ;;  %v3924_v0 = vadd.f32 %v6455_v49, %v3494_v10  ;;  %v3840_v58 = vpop.f32.mrb[151].mxu1  ;;  %v4742_v60 = vmul.f32 %v8357_v11, %v8438_v32  ;;  %v3496_v12 = vld [vmem:[#allocation2 + $0xd8] sm:$0xff] }
 0x216   : > { %v4334_v21 = vpop.f32.mrb[149].mxu0  ;;  %v4741_v51 = vmul.f32 %v8351_v30, %v8441_v23  ;;  %4457 = vst.msk [vmem:[#allocation2 + $0x90] sm:$0xff] %vm171_vm1, %v4421_v38  ;;  %v3923_v34 = vadd.f32 %v3840_v58, %v3493_v56  ;;  %v3994_v25 = vld [vmem:[#allocation2 + $0xa8] sm:$0xff]  ;;  %v8451_v39 = vpop.permute.xlu0 %4659 }
 0x217   : > { %v4789_v52 = vadd.f32 %v4788_v17, %v4787_v43  ;;  %3960 = vst.msk [vmem:[#allocation2 + $0xc8] sm:$0xff] %vm171_vm1, %v3924_v0  ;;  %v4424_v48 = vadd.f32 %v6505_v3, %v3994_v25  ;;  %v3993_v41 = vld [vmem:[#allocation2 + $0xa0] sm:$0xff]  ;;  %9316 = vst [vmem:[#allocation6_spill] sm:$0xff] %v8451_v39  ;;  %v8457_v10 = vpop.permute.xlu1 %4664  ;;  %v3495_v0 = vld [vmem:[#allocation2 + $0xd0] sm:$0xff]  ;;  %v4792_v58 = vsel %vm171_vm1, %v4742_v60, 0.0 }
 0x218   : > { %v4790_v33 = vsel %vm171_vm1, %v4741_v51, 0.0  ;;  %v8454_v5 = vld [vmem:[#allocation2 + $0x88] sm:$0xff]  ;;  %3959 = vst.msk [vmem:[#allocation2 + $0xc0] sm:$0xff] %vm171_vm1, %v3923_v34  ;;  %v4423_v2 = vadd.f32 %v4324_v53, %v3993_v41  ;;  %v6458_v38 = vpop.f32.mrb[152].mxu1  ;;  %9317 = vst [vmem:[#allocation17_spill] sm:$0xff] %v8457_v10 }
 0x219   : > { %v6511_v8 = vpop.f32.mrb[150].mxu0  ;;  %v4791_v49 = vadd.f32 %v4790_v33, %v4789_v52  ;;  %v8459_v43 = vld [vmem:[#allocation2 + $0x80] sm:$0xff]  ;;  %4460 = vst.msk [vmem:[#allocation2 + $0xa8] sm:$0xff] %vm171_vm1, %v4424_v48  ;;  %v3926_v3 = vadd.f32 %v6458_v38, %v3496_v12  ;;  %v3850_v56 = vpop.f32.mrb[153].mxu1  ;;  %v4744_v17 = vmul.f32 %v8384_v35, %v8454_v5  ;;  %v3498_v35 = vld [vmem:[#allocation2 + $0xe8] sm:$0xff] }
 0x21a   : > { %v4344_v18 = vpop.f32.mrb[151].mxu0  ;;  %v4743_v53 = vmul.f32 %v8376_v55, %v8459_v43  ;;  %4459 = vst.msk [vmem:[#allocation2 + $0xa0] sm:$0xff] %vm171_vm1, %v4423_v2  ;;  %v3925_v51 = vadd.f32 %v3850_v56, %v3495_v0  ;;  %v3996_v34 = vld [vmem:[#allocation2 + $0xb8] sm:$0xff]  ;;  %v3497_v0 = vld [vmem:[#allocation2 + $0xe0] sm:$0xff] }
 0x21b   : > { %v4793_v52 = vadd.f32 %v4792_v58, %v4791_v49  ;;  %3962 = vst.msk [vmem:[#allocation2 + $0xd8] sm:$0xff] %vm171_vm1, %v3926_v3  ;;  %v4426_v48 = vadd.f32 %v6508_v44, %v3996_v34  ;;  %v3995_v41 = vld [vmem:[#allocation2 + $0xb0] sm:$0xff]  ;;  %v8476_v44 = vpop.permute.xlu0 %4669  ;;  %v4796_v56 = vsel %vm171_vm1, %v4744_v17, 0.0 }
 0x21c   : > { %v4794_v12 = vsel %vm171_vm1, %v4743_v53, 0.0  ;;  %v8470_v60 = vld [vmem:[#allocation2 + $0x98] sm:$0xff]  ;;  %3961 = vst.msk [vmem:[#allocation2 + $0xd0] sm:$0xff] %vm171_vm1, %v3925_v51  ;;  %v4425_v38 = vadd.f32 %v4334_v21, %v3995_v41  ;;  %v6461_v55 = vpop.f32.mrb[154].mxu1  ;;  %9319 = vst [vmem:[#allocation18_spill] sm:$0xff] %v8476_v44 }
 0x21d   : > { %v6514_v25 = vpop.f32.mrb[152].mxu0  ;;  %9318 = vst [vmem:[#allocation7_spill] sm:$0xff] %v8470_v60  ;;  %v4795_v11 = vadd.f32 %v4794_v12, %v4793_v52  ;;  %v8473_v2 = vld [vmem:[#allocation2 + $0x90] sm:$0xff]  ;;  %4462 = vst.msk [vmem:[#allocation2 + $0xb8] sm:$0xff] %vm171_vm1, %v4426_v48  ;;  %v3928_v49 = vadd.f32 %v6461_v55, %v3498_v35  ;;  %v3860_v3 = vpop.f32.mrb[155].mxu1  ;;  %v4746_v58 = vmul.f32 %v8407_v61, %v8470_v60 }
 0x21e   : > { %v4354_v33 = vpop.f32.mrb[153].mxu0  ;;  %v4745_v21 = vmul.f32 %v8401_v6, %v8473_v2  ;;  %4461 = vst.msk [vmem:[#allocation2 + $0xb0] sm:$0xff] %vm171_vm1, %v4425_v38  ;;  %v3927_v53 = vadd.f32 %v3860_v3, %v3497_v0  ;;  %v3998_v51 = vld [vmem:[#allocation2 + $0xc8] sm:$0xff]  ;;  %v8484_v52 = vpop.permute.xlu1 %4674  ;;  %v3500_v6 = vld [vmem:[#allocation2 + $0xf8] sm:$0xff] }
 0x21f   : > { %9320 = vst [vmem:[#allocation8_spill] sm:$0xff] %v8484_v52  ;;  %v4797_v55 = vadd.f32 %v4796_v56, %v4795_v11  ;;  %3964 = vst.msk [vmem:[#allocation2 + $0xe8] sm:$0xff] %vm171_vm1, %v3928_v49  ;;  %v4428_v35 = vadd.f32 %v6511_v8, %v3998_v51  ;;  %v3997_v48 = vld [vmem:[#allocation2 + $0xc0] sm:$0xff]  ;;  %v3499_v56 = vld [vmem:[#allocation2 + $0xf0] sm:$0xff]  ;;  %v4800_v8 = vsel %vm171_vm1, %v4746_v58, 0.0 }
 0x220   : > { %v4798_v17 = vsel %vm171_vm1, %v4745_v21, 0.0  ;;  %v8488_v12 = vld [vmem:[#allocation2 + $0xa8] sm:$0xff]  ;;  %3963 = vst.msk [vmem:[#allocation2 + $0xe0] sm:$0xff] %vm171_vm1, %v3927_v53  ;;  %v4427_v61 = vadd.f32 %v4344_v18, %v3997_v48  ;;  %v6464_v38 = vpop.f32.mrb[156].mxu1 }
 0x221   : > { %v6517_v34 = vpop.f32.mrb[154].mxu0  ;;  %9321 = vst [vmem:[#allocation19_spill] sm:$0xff] %v8488_v12  ;;  %v4799_v0 = vadd.f32 %v4798_v17, %v4797_v55  ;;  %v8491_v3 = vld [vmem:[#allocation2 + $0xa0] sm:$0xff]  ;;  %4464 = vst.msk [vmem:[#allocation2 + $0xc8] sm:$0xff] %vm171_vm1, %v4428_v35  ;;  %v3930_v11 = vadd.f32 %v6464_v38, %v3500_v6  ;;  %v3870_v49 = vpop.f32.mrb[157].mxu1  ;;  %v4748_v21 = vmul.f32 %v8434_v42, %v8488_v12 }
 0x222   : > { %v4364_v41 = vpop.f32.mrb[155].mxu0  ;;  %v4747_v51 = vmul.f32 %v8426_v40, %v8491_v3  ;;  %4463 = vst.msk [vmem:[#allocation2 + $0xc0] sm:$0xff] %vm171_vm1, %v4427_v61  ;;  %v3929_v18 = vadd.f32 %v3870_v49, %v3499_v56  ;;  %v4000_v53 = vld [vmem:[#allocation2 + $0xd8] sm:$0xff]  ;;  %v8501_v38 = vpop.permute.xlu0 %4679  ;;  %v3502_v40 = vld [vmem:[#allocation2 + $0x108] sm:$0xff] }
 0x223   : > { %v4801_v48 = vadd.f32 %v4800_v8, %v4799_v0  ;;  %3966 = vst.msk [vmem:[#allocation2 + $0xf8] sm:$0xff] %vm171_vm1, %v3930_v11  ;;  %v4430_v35 = vadd.f32 %v6514_v25, %v4000_v53  ;;  %v3999_v6 = vld [vmem:[#allocation2 + $0xd0] sm:$0xff]  ;;  %9322 = vst [vmem:[#allocation9_spill] sm:$0xff] %v8501_v38  ;;  %v8507_v56 = vpop.permute.xlu1 %4684  ;;  %v3501_v11 = vld [vmem:[#allocation2 + $0x100] sm:$0xff]  ;;  %v4804_v53 = vsel %vm171_vm1, %v4748_v21, 0.0 }
 0x224   : > { %v4802_v58 = vsel %vm171_vm1, %v4747_v51, 0.0  ;;  %v8504_v60 = vld [vmem:[#allocation2 + $0xb8] sm:$0xff]  ;;  %3965 = vst.msk [vmem:[#allocation2 + $0xf0] sm:$0xff] %vm171_vm1, %v3929_v18  ;;  %v4429_v42 = vadd.f32 %v4354_v33, %v3999_v6  ;;  %v6467_v61 = vpop.f32.mrb[158].mxu1  ;;  %9324 = vst [vmem:[#allocation10_spill] sm:$0xff] %v8507_v56 }
 0x225   : > { %v6520_v55 = vpop.f32.mrb[156].mxu0  ;;  %9323 = vst [vmem:[#allocation20_spill] sm:$0xff] %v8504_v60  ;;  %v4803_v49 = vadd.f32 %v4802_v58, %v4801_v48  ;;  %v8509_v0 = vld [vmem:[#allocation2 + $0xb0] sm:$0xff]  ;;  %4466 = vst.msk [vmem:[#allocation2 + $0xd8] sm:$0xff] %vm171_vm1, %v4430_v35  ;;  %v3932_v25 = vadd.f32 %v6467_v61, %v3502_v40  ;;  %v3880_v8 = vpop.f32.mrb[159].mxu1  ;;  %v4750_v51 = vmul.f32 %v8457_v10, %v8504_v60  ;;  %v3504_v60 = vld [vmem:[#allocation2 + $0x118] sm:$0xff] }
 0x226   : > { %v4374_v17 = vpop.f32.mrb[157].mxu0  ;;  %9325 = vst [vmem:[#allocation21_spill] sm:$0xff] %v8509_v0  ;;  %v4749_v33 = vmul.f32 %v8451_v39, %v8509_v0  ;;  %4465 = vst.msk [vmem:[#allocation2 + $0xd0] sm:$0xff] %vm171_vm1, %v4429_v42  ;;  %v3931_v18 = vadd.f32 %v3880_v8, %v3501_v11  ;;  %v4002_v6 = vld [vmem:[#allocation2 + $0xe8] sm:$0xff]  ;;  %v3503_v11 = vld [vmem:[#allocation2 + $0x110] sm:$0xff] }
 0x227   : > { %v4805_v58 = vadd.f32 %v4804_v53, %v4803_v49  ;;  %3968 = vst.msk [vmem:[#allocation2 + $0x108] sm:$0xff] %vm171_vm1, %v3932_v25  ;;  %v4432_v35 = vadd.f32 %v6517_v34, %v4002_v6  ;;  %v4001_v40 = vld [vmem:[#allocation2 + $0xe0] sm:$0xff]  ;;  %v8526_v34 = vpop.permute.xlu0 %4689  ;;  %v4808_v8 = vsel %vm171_vm1, %v4750_v51, 0.0  ;;  %v8534_v6 = vpop.permute.xlu1 %4694 }
 0x228   : > { %v4806_v12 = vsel %vm171_vm1, %v4749_v33, 0.0  ;;  %v8520_v21 = vld [vmem:[#allocation2 + $0xc8] sm:$0xff]  ;;  %3967 = vst.msk [vmem:[#allocation2 + $0x100] sm:$0xff] %vm171_vm1, %v3931_v18  ;;  %v4431_v10 = vadd.f32 %v4364_v41, %v4001_v40  ;;  %v6470_v39 = vpop.f32.mrb[160].mxu1  ;;  %9326 = vst [vmem:[#allocation11_spill] sm:$0xff] %v8526_v34 }
 0x229   : > { %v6523_v48 = vpop.f32.mrb[158].mxu0  ;;  %v4807_v0 = vadd.f32 %v4806_v12, %v4805_v58  ;;  %v8523_v42 = vld [vmem:[#allocation2 + $0xc0] sm:$0xff]  ;;  %4468 = vst.msk [vmem:[#allocation2 + $0xe8] sm:$0xff] %vm171_vm1, %v4432_v35  ;;  %v3934_v49 = vadd.f32 %v6470_v39, %v3504_v60  ;;  %v3890_v25 = vpop.f32.mrb[161].mxu1  ;;  %v4752_v53 = vmul.f32 %v8484_v52, %v8520_v21  ;;  %9327 = vst [vmem:[#allocation12_spill] sm:$0xff] %v8534_v6 }
 0x22a   : > { %v4384_v61 = vpop.f32.mrb[159].mxu0  ;;  %v4751_v41 = vmul.f32 %v8476_v44, %v8523_v42  ;;  %4467 = vst.msk [vmem:[#allocation2 + $0xe0] sm:$0xff] %vm171_vm1, %v4431_v10  ;;  %v3933_v12 = vadd.f32 %v3890_v25, %v3503_v11  ;;  %v4004_v33 = vld [vmem:[#allocation2 + $0xf8] sm:$0xff] }
 0x22b   : > { %v4809_v39 = vadd.f32 %v4808_v8, %v4807_v0  ;;  %3970 = vst.msk [vmem:[#allocation2 + $0x118] sm:$0xff] %vm171_vm1, %v3934_v49  ;;  %v4434_v60 = vadd.f32 %v6520_v55, %v4004_v33  ;;  %v4003_v58 = vld [vmem:[#allocation2 + $0xf0] sm:$0xff]  ;;  %v4812_v11 = vsel %vm171_vm1, %v4752_v53, 0.0  ;;  %v8555_v53 = vpop.permute.xlu1 %4704 }
 0x22c   : > { %v4810_v51 = vsel %vm171_vm1, %v4751_v41, 0.0  ;;  %v8538_v40 = vld [vmem:[#allocation2 + $0xd8] sm:$0xff]  ;;  %3969 = vst.msk [vmem:[#allocation2 + $0x110] sm:$0xff] %vm171_vm1, %v3933_v12  ;;  %v4433_v52 = vadd.f32 %v4374_v17, %v4003_v58  ;;  %9330 = vst [vmem:[#allocation24_spill] sm:$0xff] %v8555_v53 }
 0x22d   : > { %v6526_v18 = vpop.f32.mrb[160].mxu0  ;;  %v4811_v44 = vadd.f32 %v4810_v51, %v4809_v39  ;;  %v8541_v10 = vld [vmem:[#allocation2 + $0xd0] sm:$0xff]  ;;  %4470 = vst.msk [vmem:[#allocation2 + $0xf8] sm:$0xff] %vm171_vm1, %v4434_v60  ;;  %v4754_v0 = vmul.f32 %v8507_v56, %v8538_v40  ;;  %v8553_v39 = vpop.permute.xlu0 %4699 }
 0x22e   : > { %v4394_v35 = vpop.f32.mrb[161].mxu0  ;;  %v4753_v55 = vmul.f32 %v8501_v38, %v8541_v10  ;;  %4469 = vst.msk [vmem:[#allocation2 + $0xf0] sm:$0xff] %vm171_vm1, %v4433_v52  ;;  %v4006_v49 = vld [vmem:[#allocation2 + $0x108] sm:$0xff]  ;;  %9329 = vst [vmem:[#allocation23_spill] sm:$0xff] %v8553_v39 }
 0x22f   : > { %v4813_v25 = vadd.f32 %v4812_v11, %v4811_v44  ;;  %v4436_v8 = vadd.f32 %v6523_v48, %v4006_v49  ;;  %v4005_v41 = vld [vmem:[#allocation2 + $0x100] sm:$0xff]  ;;  %v4816_v52 = vsel %vm171_vm1, %v4754_v0, 0.0 }
 0x230   : > { %v4814_v17 = vsel %vm171_vm1, %v4753_v55, 0.0  ;;  %v8551_v12 = vld [vmem:[#allocation2 + $0xe8] sm:$0xff]  ;;  %v4435_v33 = vadd.f32 %v4384_v61, %v4005_v41 }
 0x231   : > { %9328 = vst [vmem:[#allocation22_spill] sm:$0xff] %v8551_v12  ;;  %v4815_v60 = vadd.f32 %v4814_v17, %v4813_v25  ;;  %v8557_v58 = vld [vmem:[#allocation2 + $0xe0] sm:$0xff]  ;;  %4472 = vst.msk [vmem:[#allocation2 + $0x108] sm:$0xff] %vm171_vm1, %v4436_v8  ;;  %v4756_v44 = vmul.f32 %v8534_v6, %v8551_v12 }
 0x232   : > { %v4755_v48 = vmul.f32 %v8526_v34, %v8557_v58  ;;  %4471 = vst.msk [vmem:[#allocation2 + $0x100] sm:$0xff] %vm171_vm1, %v4435_v33  ;;  %v4008_v61 = vld [vmem:[#allocation2 + $0x118] sm:$0xff] }
 0x233   : > { %v4817_v51 = vadd.f32 %v4816_v52, %v4815_v60  ;;  %v4438_v11 = vadd.f32 %v6526_v18, %v4008_v61  ;;  %v4007_v55 = vld [vmem:[#allocation2 + $0x110] sm:$0xff]  ;;  %v4820_v0 = vsel %vm171_vm1, %v4756_v44, 0.0  ;;  %v8578_v18 = vpop.permute.xlu0 %4709  ;;  %v8580_v60 = vpop.permute.xlu1 %4714 }
 0x234   : > { %v4818_v49 = vsel %vm171_vm1, %v4755_v48, 0.0  ;;  %v8567_v25 = vld [vmem:[#allocation2 + $0xf8] sm:$0xff]  ;;  %v4437_v41 = vadd.f32 %v4394_v35, %v4007_v55  ;;  %9333 = vst [vmem:[#allocation27_spill] sm:$0xff] %v8578_v18  ;;  %9334 = vst [vmem:[#allocation28_spill] sm:$0xff] %v8580_v60 }
 0x235   : > { %9331 = vst [vmem:[#allocation25_spill] sm:$0xff] %v8567_v25  ;;  %v4819_v8 = vadd.f32 %v4818_v49, %v4817_v51  ;;  %v8569_v17 = vld [vmem:[#allocation2 + $0xf0] sm:$0xff]  ;;  %4474 = vst.msk [vmem:[#allocation2 + $0x118] sm:$0xff] %vm171_vm1, %v4438_v11  ;;  %v4758_v6 = vmul.f32 %v8555_v53, %v8567_v25 }
 0x236   : > { %9332 = vst [vmem:[#allocation26_spill] sm:$0xff] %v8569_v17  ;;  %v4757_v33 = vmul.f32 %v8553_v39, %v8569_v17  ;;  %4473 = vst.msk [vmem:[#allocation2 + $0x110] sm:$0xff] %vm171_vm1, %v4437_v41 }
 0x237   : > { %v4821_v35 = vadd.f32 %v4820_v0, %v4819_v8  ;;  %v4824_v44 = vsel %vm171_vm1, %v4758_v6, 0.0  ;;  %v4720_v39 = vpop.permute.xlu0 %4719  ;;  %v4725_v25 = vpop.permute.xlu1 %4724 }
 0x238   : > { %v4822_v52 = vsel %vm171_vm1, %v4757_v33, 0.0  ;;  %v4508_v48 = vld [vmem:[#allocation2 + $0x108] sm:$0xff] }
 0x239   : > { %v4823_v61 = vadd.f32 %v4822_v52, %v4821_v35  ;;  %v8583_v51 = vld [vmem:[#allocation2 + $0x100] sm:$0xff]  ;;  %v4760_v11 = vmul.f32 %v8580_v60, %v4508_v48 }
 0x23a   : > { %9335 = vst [vmem:[#allocation29_spill] sm:$0xff] %v8583_v51  ;;  %v4759_v55 = vmul.f32 %v8578_v18, %v8583_v51 }
 0x23b   : > { %v4825_v49 = vadd.f32 %v4824_v44, %v4823_v61  ;;  %v4828_v33 = vsel %vm171_vm1, %v4760_v11, 0.0 }
 0x23c   : > { %v4826_v41 = vsel %vm171_vm1, %v4759_v55, 0.0  ;;  %v4510_v53 = vld [vmem:[#allocation2 + $0x118] sm:$0xff] }
 0x23d   : > { %v4827_v8 = vadd.f32 %v4826_v41, %v4825_v49  ;;  %v4509_v0 = vld [vmem:[#allocation2 + $0x110] sm:$0xff]  ;;  %v4762_v35 = vmul.f32 %v4725_v25, %v4510_v53 }
 0x23e   : > { %v4761_v52 = vmul.f32 %v4720_v39, %v4509_v0 }
 0x23f   : > { %v4829_v34 = vadd.f32 %v4828_v33, %v4827_v8  ;;  %v4832_v60 = vsel %vm171_vm1, %v4762_v35, 0.0 }
 0x240   : > { %v4830_v6 = vsel %vm171_vm1, %v4761_v52, 0.0 }
 0x241   : > { %v4831_v17 = vadd.f32 %v4830_v6, %v4829_v34 }
 0x243   : > { %v4833_v56 = vadd.f32 %v4832_v60, %v4831_v17 }
 0x245   : > { %v4834_v18 = vrot.slane %v4833_v56, 4 }
 0x247   : > { %v4835_v61 = vadd.f32 %v4834_v18, %v4833_v56 }
 0x249   : > { %v4836_v44 = vrot.slane %v4835_v61, 2 }
 0x24b   : > { %v4837_v55 = vadd.f32 %v4836_v44, %v4835_v61 }
 0x24d   : > { %v4838_v51 = vrot.slane %v4837_v55, 1 }
 0x24f   : > { %v4839_v12 = vadd.f32 %v4838_v51, %v4837_v55 }
 0x251   : > { %v8593_v38 = vmul.f32 0.00390625, %v4839_v12 }
 0x253   : > { %v8596_v49 = vsub.f32 %v4508_v48, %v8593_v38  ;;  %v8599_v11 = vsub.f32 %v4509_v0, %v8593_v38  ;;  %v8602_v41 = vsub.f32 %v4510_v53, %v8593_v38  ;;  %v8606_v34 = vsub.f32 %v8326_v22, %v8593_v38 }
 0x254   : > { %v8610_v56 = vsub.f32 %v8321_v50, %v8593_v38  ;;  %v8614_v12 = vsub.f32 %v8342_v59, %v8593_v38  ;;  %v8624_v53 = vsub.f32 %v8339_v20, %v8593_v38  ;;  %v8632_v59 = vsub.f32 %v8359_v19, %v8593_v38 }
 0x255   : > { %v8617_v17 = vmul.f32 %v8599_v11, %v4720_v39  ;;  %v8620_v18 = vmul.f32 %v8602_v41, %v4725_v25  ;;  %v4877_v22 = vmul.f32 %v8606_v34, %v8263_v37  ;;  %v8638_v25 = vsub.f32 %v8354_v47, %v8593_v38 }
 0x256   : > { %v4878_v50 = vmul.f32 %v8610_v56, %v8273_v28  ;;  %v4879_v39 = vmul.f32 %v8614_v12, %v8266_v7  ;;  %v4880_v20 = vmul.f32 %v8624_v53, %v8276_v62  ;;  %v8644_v37 = vsub.f32 %v8373_v57, %v8593_v38 }
 0x257   : > { %v4913_v60 = vmul.f32 %v4877_v22, %v4877_v22  ;;  %v4881_v28 = vmul.f32 %v8632_v59, %v8283_v13  ;;  %v8650_v7 = vsub.f32 %v8370_v46, %v8593_v38  ;;  %v4882_v47 = vmul.f32 %v8638_v25, %v8286_v15 }
 0x258   : > { %v4914_v48 = vmul.f32 %v4878_v50, %v4878_v50  ;;  %v4915_v19 = vmul.f32 %v4879_v39, %v4879_v39  ;;  %v4916_v51 = vmul.f32 %v4880_v20, %v4880_v20  ;;  %v8658_v57 = vsub.f32 %v8391_v14, %v8593_v38 }
 0x259   : > { %v4949_v62 = vsel %vm171_vm1, %v4913_v60, 0.0  ;;  %v4883_v13 = vmul.f32 %v8644_v37, %v8293_v45  ;;  %v4917_v33 = vmul.f32 %v4881_v28, %v4881_v28  ;;  %v8665_v15 = vsub.f32 %v8388_v54, %v8593_v38 }
 0x25a   : > { %v4950_v8 = vsel %vm171_vm1, %v4914_v48, 0.0  ;;  %v4952_v46 = vsel %vm171_vm1, %v4915_v19, 0.0  ;;  %v4884_v52 = vmul.f32 %v8650_v7, %v8296_v4  ;;  %v4918_v6 = vmul.f32 %v4882_v47, %v4882_v47 }
 0x25b   : > { %v4951_v0 = vadd.f32 %v4950_v8, %v4949_v62  ;;  %v4954_v61 = vsel %vm171_vm1, %v4916_v51, 0.0  ;;  %v8672_v14 = vsub.f32 %v8409_v1, %v8593_v38  ;;  %v4885_v45 = vmul.f32 %v8658_v57, %v8303_v29 }
 0x25c   : > { %v4919_v55 = vmul.f32 %v4883_v13, %v4883_v13  ;;  %v4956_v22 = vsel %vm171_vm1, %v4917_v33, 0.0  ;;  %v8679_v54 = vsub.f32 %v8404_v9, %v8593_v38  ;;  %v4886_v4 = vmul.f32 %v8665_v15, %v8306_v31 }
 0x25d   : > { %v4953_v35 = vadd.f32 %v4952_v46, %v4951_v0  ;;  %v4920_v39 = vmul.f32 %v4884_v52, %v4884_v52  ;;  %v4958_v20 = vsel %vm171_vm1, %v4918_v6, 0.0  ;;  %v8686_v1 = vsub.f32 %v8423_v16, %v8593_v38 }
 0x25e   : > { %v4887_v29 = vmul.f32 %v8672_v14, %v8313_v36  ;;  %v4921_v48 = vmul.f32 %v4885_v45, %v4885_v45  ;;  %v4960_v28 = vsel %vm171_vm1, %v4919_v55, 0.0  ;;  %v8693_v9 = vsub.f32 %v8420_v27, %v8593_v38 }
 0x25f   : > { %v4955_v44 = vadd.f32 %v4954_v61, %v4953_v35  ;;  %v4888_v31 = vmul.f32 %v8679_v54, %v8316_v63  ;;  %v4922_v47 = vmul.f32 %v4886_v4, %v4886_v4  ;;  %v4962_v51 = vsel %vm171_vm1, %v4920_v39, 0.0 }
 0x260   : > { %v8700_v16 = vsub.f32 %v8441_v23, %v8593_v38  ;;  %v4889_v36 = vmul.f32 %v8686_v1, %v8329_v24  ;;  %v4923_v8 = vmul.f32 %v4887_v29, %v4887_v29  ;;  %v4964_v0 = vsel %vm171_vm1, %v4921_v48, 0.0  ;;  %v9339_v29 = vld [vmem:[#allocation14_spill] sm:$0xff] }
 0x261   : > { %v4957_v50 = vadd.f32 %v4956_v22, %v4955_v44  ;;  %v8707_v27 = vsub.f32 %v8438_v32, %v8593_v38  ;;  %v4890_v63 = vmul.f32 %v8693_v9, %v8334_v26  ;;  %v4924_v33 = vmul.f32 %v4888_v31, %v4888_v31  ;;  %v9336_v26 = vld [vmem:[#allocation13_spill] sm:$0xff] }
 0x262   : > { %v4966_v46 = vsel %vm171_vm1, %v4922_v47, 0.0  ;;  %v8714_v23 = vsub.f32 %v8459_v43, %v8593_v38  ;;  %v4891_v24 = vmul.f32 %v8700_v16, %v8351_v30  ;;  %v4925_v52 = vmul.f32 %v4889_v36, %v4889_v36  ;;  %v9337_v30 = vld [vmem:[#allocation3_spill] sm:$0xff]  ;;  %v9340_v47 = vld [vmem:[#allocation4_spill] sm:$0xff] }
 0x263   : > { %v4959_v60 = vadd.f32 %v4958_v20, %v4957_v50  ;;  %v4968_v6 = vsel %vm171_vm1, %v4923_v8, 0.0  ;;  %v8721_v32 = vsub.f32 %v8454_v5, %v8593_v38  ;;  %v4892_v44 = vmul.f32 %v8707_v27, %v9336_v26  ;;  %v9338_v5 = vld [vmem:[#allocation7_spill] sm:$0xff] }
 0x264   : > { %v4926_v45 = vmul.f32 %v4890_v63, %v4890_v63  ;;  %v4970_v55 = vsel %vm171_vm1, %v4924_v33, 0.0  ;;  %v8728_v43 = vsub.f32 %v8473_v2, %v8593_v38  ;;  %v4893_v50 = vmul.f32 %v8714_v23, %v9337_v30  ;;  %v9342_v63 = vld [vmem:[#allocation15_spill] sm:$0xff]  ;;  %v9346_v30 = vld [vmem:[#allocation16_spill] sm:$0xff] }
 0x265   : > { %v4961_v19 = vadd.f32 %v4960_v28, %v4959_v60  ;;  %v4927_v4 = vmul.f32 %v4891_v24, %v4891_v24  ;;  %v4972_v39 = vsel %vm171_vm1, %v4925_v52, 0.0  ;;  %v8735_v60 = vsub.f32 %v9338_v5, %v8593_v38 }
 0x266   : > { %v4894_v48 = vmul.f32 %v8721_v32, %v9339_v29  ;;  %v4928_v28 = vmul.f32 %v4892_v44, %v4892_v44  ;;  %v8742_v2 = vsub.f32 %v8491_v3, %v8593_v38  ;;  %v9343_v3 = vld [vmem:[#allocation21_spill] sm:$0xff]  ;;  %v8770_v5 = vsub.f32 %v8523_v42, %v8593_v38  ;;  %v9347_v29 = vld [vmem:[#allocation6_spill] sm:$0xff] }
 0x267   : > { %v4963_v62 = vadd.f32 %v4962_v51, %v4961_v19  ;;  %v4974_v19 = vsel %vm171_vm1, %v4926_v45, 0.0  ;;  %v4895_v51 = vmul.f32 %v8728_v43, %v9340_v47  ;;  %v4976_v36 = vsel %vm171_vm1, %v4927_v4, 0.0 }
 0x268   : > { %v4896_v33 = vmul.f32 %v8735_v60, %v9342_v63  ;;  %v8756_v52 = vsub.f32 %v9343_v3, %v8593_v38  ;;  %v8777_v47 = vsub.f32 %v8520_v21, %v8593_v38  ;;  %v8784_v42 = vsub.f32 %v8541_v10, %v8593_v38  ;;  %v9349_v63 = vld [vmem:[#allocation18_spill] sm:$0xff]  ;;  %v9350_v3 = vld [vmem:[#allocation8_spill] sm:$0xff] }
 0x269   : > { %v4965_v13 = vadd.f32 %v4964_v0, %v4963_v62  ;;  %v4929_v62 = vmul.f32 %v4893_v50, %v4893_v50  ;;  %v9341_v0 = vld [vmem:[#allocation19_spill] sm:$0xff]  ;;  %v4931_v26 = vmul.f32 %v4895_v51, %v4895_v51  ;;  %v9348_v51 = vld [vmem:[#allocation17_spill] sm:$0xff]  ;;  %v8791_v21 = vsub.f32 %v8538_v40, %v8593_v38  ;;  %v9352_v40 = vld [vmem:[#allocation22_spill] sm:$0xff] }
 0x26a   : > { %v4932_v4 = vmul.f32 %v4896_v33, %v4896_v33  ;;  %v4901_v33 = vmul.f32 %v8770_v5, %v9349_v63  ;;  %v8798_v10 = vsub.f32 %v8557_v58, %v8593_v38  ;;  %v9354_v58 = vld [vmem:[#allocation26_spill] sm:$0xff]  ;;  %v9356_v63 = vld [vmem:[#allocation25_spill] sm:$0xff] }
 0x26b   : > { %v4967_v35 = vadd.f32 %v4966_v46, %v4965_v13  ;;  %v8749_v13 = vsub.f32 %v9341_v0, %v8593_v38  ;;  %v4930_v46 = vmul.f32 %v4894_v48, %v4894_v48  ;;  %v4980_v44 = vsel %vm171_vm1, %v4929_v62, 0.0 }
 0x26c   : > { %v4899_v48 = vmul.f32 %v8756_v52, %v9347_v29 }
 0x26d   : > { %v4969_v61 = vadd.f32 %v4968_v6, %v4967_v35  ;;  %v4978_v35 = vsel %vm171_vm1, %v4928_v28, 0.0  ;;  %v9344_v6 = vld [vmem:[#allocation5_spill] sm:$0xff]  ;;  %v4898_v50 = vmul.f32 %v8749_v13, %v9346_v30  ;;  %v4937_v30 = vmul.f32 %v4901_v33, %v4901_v33 }
 0x26e   : > { %v8819_v33 = vsub.f32 %v9356_v63, %v8593_v38 }
 0x26f   : > { %v4971_v22 = vadd.f32 %v4970_v55, %v4969_v61  ;;  %v4897_v61 = vmul.f32 %v8742_v2, %v9344_v6  ;;  %v9345_v55 = vld [vmem:[#allocation20_spill] sm:$0xff]  ;;  %v4902_v6 = vmul.f32 %v8777_v47, %v9350_v3 }
 0x271   : > { %v4973_v20 = vadd.f32 %v4972_v39, %v4971_v22  ;;  %v8763_v22 = vsub.f32 %v9345_v55, %v8593_v38  ;;  %v4982_v39 = vsel %vm171_vm1, %v4930_v46, 0.0  ;;  %v4933_v28 = vmul.f32 %v4897_v61, %v4897_v61 }
 0x272   : > { %v4935_v46 = vmul.f32 %v4899_v48, %v4899_v48  ;;  %v4938_v48 = vmul.f32 %v4902_v6, %v4902_v6 }
 0x273   : > { %v4975_v31 = vadd.f32 %v4974_v19, %v4973_v20  ;;  %v4984_v19 = vsel %vm171_vm1, %v4931_v26, 0.0  ;;  %v4900_v62 = vmul.f32 %v8763_v22, %v9348_v51  ;;  %v9355_v51 = vld [vmem:[#allocation11_spill] sm:$0xff] }
 0x274   : > { %v4998_v3 = vsel %vm171_vm1, %v4938_v48, 0.0  ;;  %v9361_v48 = vld [vmem:[#allocation27_spill] sm:$0xff] }
 0x275   : > { %v4977_v8 = vadd.f32 %v4976_v36, %v4975_v31  ;;  %v4934_v36 = vmul.f32 %v4898_v50, %v4898_v50  ;;  %v4936_v61 = vmul.f32 %v4900_v62, %v4900_v62  ;;  %v4992_v50 = vsel %vm171_vm1, %v4935_v46, 0.0  ;;  %v9357_v46 = vld [vmem:[#allocation12_spill] sm:$0xff] }
 0x276   : > { %v4905_v62 = vmul.f32 %v8798_v10, %v9355_v51 }
 0x277   : > { %v4979_v24 = vadd.f32 %v4978_v35, %v4977_v8  ;;  %v4986_v8 = vsel %vm171_vm1, %v4932_v4, 0.0  ;;  %v4988_v35 = vsel %vm171_vm1, %v4933_v28, 0.0  ;;  %v4990_v26 = vsel %vm171_vm1, %v4934_v36, 0.0 }
 0x278   : > { %v4994_v28 = vsel %vm171_vm1, %v4936_v61, 0.0  ;;  %v9358_v61 = vld [vmem:[#allocation29_spill] sm:$0xff] }
 0x279   : > { %v4981_v45 = vadd.f32 %v4980_v44, %v4979_v24 }
 0x27b   : > { %v4983_v20 = vadd.f32 %v4982_v39, %v4981_v45  ;;  %v9351_v45 = vld [vmem:[#allocation9_spill] sm:$0xff]  ;;  %v8805_v39 = vsub.f32 %v9352_v40, %v8593_v38 }
 0x27c   : > { %v4903_v55 = vmul.f32 %v8784_v42, %v9351_v45 }
 0x27d   : > { %v4985_v31 = vadd.f32 %v4984_v19, %v4983_v20  ;;  %v9353_v20 = vld [vmem:[#allocation10_spill] sm:$0xff] }
 0x27e   : > { %v4904_v29 = vmul.f32 %v8791_v21, %v9353_v20  ;;  %v4939_v36 = vmul.f32 %v4903_v55, %v4903_v55  ;;  %v4941_v55 = vmul.f32 %v4905_v62, %v4905_v62 }
 0x27f   : > { %v4987_v0 = vadd.f32 %v4986_v8, %v4985_v31  ;;  %v8812_v31 = vsub.f32 %v9354_v58, %v8593_v38  ;;  %v4996_v8 = vsel %vm171_vm1, %v4937_v30, 0.0 }
 0x280   : > { %v5000_v30 = vsel %vm171_vm1, %v4939_v36, 0.0 }
 0x281   : > { %v4989_v24 = vadd.f32 %v4988_v35, %v4987_v0  ;;  %v4906_v35 = vmul.f32 %v8805_v39, %v9357_v46 }
 0x283   : > { %v4991_v44 = vadd.f32 %v4990_v26, %v4989_v24  ;;  %v4940_v24 = vmul.f32 %v4904_v29, %v4904_v29  ;;  %v8826_v26 = vsub.f32 %v9358_v61, %v8593_v38  ;;  %v4942_v20 = vmul.f32 %v4906_v35, %v4906_v35 }
 0x284   : > { %v5004_v38 = vsel %vm171_vm1, %v4941_v55, 0.0 }
 0x285   : > { %v4993_v4 = vadd.f32 %v4992_v50, %v4991_v44  ;;  %v9359_v44 = vld [vmem:[#allocation23_spill] sm:$0xff]  ;;  %v5002_v29 = vsel %vm171_vm1, %v4940_v24, 0.0  ;;  %v5006_v36 = vsel %vm171_vm1, %v4942_v20, 0.0 }
 0x286   : > { %v4907_v45 = vmul.f32 %v8812_v31, %v9359_v44  ;;  %v4947_v44 = vmul.f32 %v8617_v17, %v8617_v17 }
 0x287   : > { %v4995_v19 = vadd.f32 %v4994_v28, %v4993_v4  ;;  %v9360_v4 = vld [vmem:[#allocation24_spill] sm:$0xff] }
 0x288   : > { %v4908_v40 = vmul.f32 %v8819_v33, %v9360_v4  ;;  %v4943_v58 = vmul.f32 %v4907_v45, %v4907_v45 }
 0x289   : > { %v4997_v0 = vadd.f32 %v4996_v8, %v4995_v19  ;;  %v4909_v19 = vmul.f32 %v8826_v26, %v9361_v48  ;;  %v9362_v8 = vld [vmem:[#allocation28_spill] sm:$0xff] }
 0x28a   : > { %v4910_v62 = vmul.f32 %v8596_v49, %v9362_v8  ;;  %v5008_v35 = vsel %vm171_vm1, %v4943_v58, 0.0 }
 0x28b   : > { %v4999_v6 = vadd.f32 %v4998_v3, %v4997_v0  ;;  %v4944_v0 = vmul.f32 %v4908_v40, %v4908_v40  ;;  %v4945_v46 = vmul.f32 %v4909_v19, %v4909_v19  ;;  %v5016_v40 = vsel %vm171_vm1, %v4947_v44, 0.0 }
 0x28c   : > { %v4946_v24 = vmul.f32 %v4910_v62, %v4910_v62 }
 0x28d   : > { %v5001_v50 = vadd.f32 %v5000_v30, %v4999_v6  ;;  %v5010_v6 = vsel %vm171_vm1, %v4944_v0, 0.0  ;;  %v5012_v45 = vsel %vm171_vm1, %v4945_v46, 0.0  ;;  %v4948_v30 = vmul.f32 %v8620_v18, %v8620_v18 }
 0x28f   : > { %v5003_v28 = vadd.f32 %v5002_v29, %v5001_v50  ;;  %v5014_v50 = vsel %vm171_vm1, %v4946_v24, 0.0  ;;  %v5018_v29 = vsel %vm171_vm1, %v4948_v30, 0.0 }
 0x291   : > { %v5005_v51 = vadd.f32 %v5004_v38, %v5003_v28 }
 0x293   : > { %v5007_v63 = vadd.f32 %v5006_v36, %v5005_v51 }
 0x295   : > { %v5009_v3 = vadd.f32 %v5008_v35, %v5007_v63 }
 0x297   : > { %v5011_v61 = vadd.f32 %v5010_v6, %v5009_v3 }
 0x299   : > { %v5013_v55 = vadd.f32 %v5012_v45, %v5011_v61 }
 0x29b   : > { %v5015_v4 = vadd.f32 %v5014_v50, %v5013_v55 }
 0x29d   : > { %v5017_v20 = vadd.f32 %v5016_v40, %v5015_v4 }
 0x29f   : > { %v5019_v28 = vadd.f32 %v5018_v29, %v5017_v20 }
 0x2a1   : > { %v5020_v48 = vrot.slane %v5019_v28, 4 }
 0x2a3   : > { %v5021_v19 = vadd.f32 %v5020_v48, %v5019_v28 }
 0x2a5   : > { %v5022_v58 = vrot.slane %v5021_v19, 2 }
 0x2a7   : > { %v5023_v38 = vadd.f32 %v5022_v58, %v5021_v19 }
 0x2a9   : > { %v5024_v17 = vrot.slane %v5023_v38, 1 }
 0x2ab   : > { %v5025_v51 = vadd.f32 %v5024_v17, %v5023_v38 }
 0x2ad   : > { %v5026_v8 = vmul.f32 0.00390625, %v5025_v51 }
 0x2af   : > { %v5027_v62 = vadd.f32 1e-05, %v5026_v8 }
 0x2b1   : > { %6543 = vrsqrt.f32 %v5027_v62 }
 0x2bb   : > { %v6544_v0 = vpop.eup %6543 }
 0x2bc   : > { %v8851_v18 = vmul.f32 %v6544_v0, %v8606_v34  ;;  %v5030_v36 = vmul.f32 %v6544_v0, %v8610_v56  ;;  %v5031_v63 = vmul.f32 %v6544_v0, %v8614_v12  ;;  %v5032_v46 = vmul.f32 %v6544_v0, %v8624_v53 }
 0x2bd   : > { %v5033_v35 = vmul.f32 %v6544_v0, %v8632_v59  ;;  %v5034_v3 = vmul.f32 %v6544_v0, %v8638_v25  ;;  %v5035_v24 = vmul.f32 %v6544_v0, %v8644_v37  ;;  %v5036_v6 = vmul.f32 %v6544_v0, %v8650_v7 }
 0x2be   : > { %v5037_v61 = vmul.f32 %v6544_v0, %v8658_v57  ;;  %v5038_v44 = vmul.f32 %v6544_v0, %v8665_v15  ;;  %v5039_v34 = vmul.f32 %v6544_v0, %v8672_v14  ;;  %v5040_v56 = vmul.f32 %v6544_v0, %v8679_v54 }
 0x2bf   : > { %v5041_v12 = vmul.f32 %v6544_v0, %v8686_v1  ;;  %v5042_v53 = vmul.f32 %v6544_v0, %v8693_v9  ;;  %v5043_v59 = vmul.f32 %v6544_v0, %v8700_v16  ;;  %v5044_v25 = vmul.f32 %v6544_v0, %v8707_v27 }
 0x2c0   : > { %v8869_v37 = vmul.f32 %v6544_v0, %v8714_v23  ;;  %v8872_v7 = vmul.f32 %v6544_v0, %v8721_v32  ;;  %v8875_v57 = vmul.f32 %v6544_v0, %v8728_v43  ;;  %v8878_v15 = vmul.f32 %v6544_v0, %v8735_v60 }
 0x2c1   : > { %v8881_v14 = vmul.f32 %v6544_v0, %v8742_v2  ;;  %v8884_v54 = vmul.f32 %v6544_v0, %v8749_v13  ;;  %v8887_v1 = vmul.f32 %v6544_v0, %v8756_v52  ;;  %v8890_v9 = vmul.f32 %v6544_v0, %v8763_v22 }
 0x2c2   : > { %v8893_v16 = vmul.f32 %v6544_v0, %v8770_v5  ;;  %v8896_v27 = vmul.f32 %v6544_v0, %v8777_v47  ;;  %v8899_v23 = vmul.f32 %v6544_v0, %v8784_v42  ;;  %v8902_v32 = vmul.f32 %v6544_v0, %v8791_v21 }
 0x2c3   : > { %v8905_v43 = vmul.f32 %v6544_v0, %v8798_v10  ;;  %v8908_v60 = vmul.f32 %v6544_v0, %v8805_v39  ;;  %v8911_v2 = vmul.f32 %v6544_v0, %v8812_v31  ;;  %v8914_v13 = vmul.f32 %v6544_v0, %v8819_v33 }
 0x2c4   : > { %v8917_v52 = vmul.f32 %v6544_v0, %v8826_v26  ;;  %v8920_v22 = vmul.f32 %v6544_v0, %v8596_v49  ;;  %v8923_v5 = vmul.f32 %v6544_v0, %v8599_v11  ;;  %v8926_v47 = vmul.f32 %v6544_v0, %v8602_v41 }
 0x2c5   : > { %v5101_v42 = vrot.slane %v8851_v18, 5  ;;  %v5102_v21 = vrot.slane %v5030_v36, 5  ;;  %v5104_v10 = vrot.slane %v5031_v63, 5  ;;  %v5106_v39 = vrot.slane %v5032_v46, 5 }
 0x2c6   : > { %v5108_v31 = vrot.slane %v5033_v35, 5  ;;  %v5110_v33 = vrot.slane %v5034_v3, 5  ;;  %v5112_v45 = vrot.slane %v5035_v24, 5  ;;  %v5114_v55 = vrot.slane %v5036_v6, 5 }
 0x2c7   : > { %v8932_v49 = vsel %vm3505_vm5, %v5101_v42, %v5102_v21  ;;  %v8935_v11 = vsel %vm3505_vm5, %v5102_v21, %v5104_v10  ;;  %v8938_v41 = vsel %vm3505_vm5, %v5104_v10, %v5106_v39  ;;  %v5116_v26 = vrot.slane %v5037_v61, 5 }
 0x2c8   : > { %v8941_v30 = vsel %vm3505_vm5, %v5106_v39, %v5108_v31  ;;  %v8944_v50 = vsel %vm3505_vm5, %v5108_v31, %v5110_v33  ;;  %v8947_v4 = vsel %vm3505_vm5, %v5110_v33, %v5112_v45  ;;  %v8950_v40 = vsel %vm3505_vm5, %v5112_v45, %v5114_v55 }
 0x2c9   : > { %v8953_v20 = vsel %vm3505_vm5, %v5114_v55, %v5116_v26  ;;  %v5118_v29 = vrot.slane %v5038_v44, 5  ;;  %v5120_v28 = vrot.slane %v5039_v34, 5  ;;  %v5122_v48 = vrot.slane %v5040_v56, 5 }
 0x2ca   : > { %v5124_v19 = vrot.slane %v5041_v12, 5  ;;  %v5126_v58 = vrot.slane %v5042_v53, 5  ;;  %v5128_v38 = vrot.slane %v5043_v59, 5  ;;  %v5130_v17 = vrot.slane %v5044_v25, 5 }
 0x2cb   : > { %v8956_v51 = vsel %vm3505_vm5, %v5116_v26, %v5118_v29  ;;  %v8959_v8 = vsel %vm3505_vm5, %v5118_v29, %v5120_v28  ;;  %v8962_v62 = vsel %vm3505_vm5, %v5120_v28, %v5122_v48  ;;  %v5132_v0 = vrot.slane %v8869_v37, 5  ;;  %v6582_v29 = vld [vmem:[%s6678_s23 + $0x10] sm:$0xff] }
 0x2cc   : > { %v8966_v36 = vsel %vm3505_vm5, %v5122_v48, %v5124_v19  ;;  %v8969_v63 = vsel %vm3505_vm5, %v5124_v19, %v5126_v58  ;;  %v8972_v46 = vsel %vm3505_vm5, %v5126_v58, %v5128_v38  ;;  %v8975_v35 = vsel %vm3505_vm5, %v5128_v38, %v5130_v17  ;;  %v6583_v48 = vld [vmem:[%s6678_s23 + $0x18] sm:$0xff]  ;;  %v6584_v58 = vld [vmem:[%s6678_s23 + $0x20] sm:$0xff] }
 0x2cd   : > { %v8978_v3 = vsel %vm3505_vm5, %v5130_v17, %v5132_v0  ;;  %v5134_v24 = vrot.slane %v8872_v7, 5  ;;  %v5136_v6 = vrot.slane %v8875_v57, 5  ;;  %v5138_v61 = vrot.slane %v8878_v15, 5  ;;  %v6585_v17 = vld [vmem:[%s6678_s23 + $0x28] sm:$0xff] }
 0x2ce   : > { %v5140_v44 = vrot.slane %v8881_v14, 5  ;;  %v5142_v34 = vrot.slane %v8884_v54, 5  ;;  %v5144_v56 = vrot.slane %v8887_v1, 5  ;;  %v5146_v12 = vrot.slane %v8890_v9, 5 }
 0x2cf   : > { %v8988_v53 = vsel %vm3505_vm5, %v5132_v0, %v5134_v24  ;;  %v8991_v59 = vsel %vm3505_vm5, %v5134_v24, %v5136_v6  ;;  %v8994_v25 = vsel %vm3505_vm5, %v5136_v6, %v5138_v61  ;;  %v5148_v37 = vrot.slane %v8893_v16, 5  ;;  %v6588_v24 = vld [vmem:[%s6678_s23 + $0x40] sm:$0xff] }
 0x2d0   : > { %v8998_v7 = vsel %vm3505_vm5, %v5138_v61, %v5140_v44  ;;  %v9001_v57 = vsel %vm3505_vm5, %v5140_v44, %v5142_v34  ;;  %v9004_v15 = vsel %vm3505_vm5, %v5142_v34, %v5144_v56  ;;  %v9007_v14 = vsel %vm3505_vm5, %v5144_v56, %v5146_v12  ;;  %v6589_v61 = vld [vmem:[%s6678_s23 + $0x48] sm:$0xff]  ;;  %v6590_v34 = vld [vmem:[%s6678_s23 + $0x50] sm:$0xff] }
 0x2d1   : > { %v9011_v54 = vsel %vm3505_vm5, %v5146_v12, %v5148_v37  ;;  %v5150_v1 = vrot.slane %v8896_v27, 5  ;;  %v5152_v9 = vrot.slane %v8899_v23, 5  ;;  %v5154_v16 = vrot.slane %v8902_v32, 5 }
 0x2d2   : > { %v5156_v21 = vrot.slane %v8905_v43, 5  ;;  %v5158_v10 = vrot.slane %v8908_v60, 5  ;;  %v5160_v39 = vrot.slane %v8911_v2, 5  ;;  %v5162_v31 = vrot.slane %v8914_v13, 5 }
 0x2d3   : > { %v9021_v33 = vsel %vm3505_vm5, %v5148_v37, %v5150_v1  ;;  %v9024_v45 = vsel %vm3505_vm5, %v5150_v1, %v5152_v9  ;;  %v9027_v27 = vsel %vm3505_vm5, %v5152_v9, %v5154_v16  ;;  %v5164_v23 = vrot.slane %v8917_v52, 5  ;;  %v6594_v37 = vld [vmem:[%s6678_s23 + $0x70] sm:$0xff]  ;;  %v6595_v9 = vld [vmem:[%s6678_s23 + $0x78] sm:$0xff] }
 0x2d4   : > { %v9031_v32 = vsel %vm3505_vm5, %v5154_v16, %v5156_v21  ;;  %v9034_v43 = vsel %vm3505_vm5, %v5156_v21, %v5158_v10  ;;  %v9037_v60 = vsel %vm3505_vm5, %v5158_v10, %v5160_v39  ;;  %v9040_v2 = vsel %vm3505_vm5, %v5160_v39, %v5162_v31  ;;  %v6596_v16 = vld [vmem:[%s6678_s23 + $0x80] sm:$0xff]  ;;  %v6597_v21 = vld [vmem:[%s6678_s23 + $0x88] sm:$0xff] }
 0x2d5   : > { %v9048_v13 = vsel %vm3505_vm5, %v5162_v31, %v5164_v23  ;;  %v5166_v52 = vrot.slane %v8920_v22, 5  ;;  %v5168_v55 = vrot.slane %v8923_v5, 5  ;;  %v5170_v26 = vrot.slane %v8926_v47, 5 }
 0x2d6   : > { %v5209_v28 = vadd.f32 %v6582_v29, %v5101_v42  ;;  %v5210_v19 = vadd.f32 %v6583_v48, %v8932_v49  ;;  %v5211_v38 = vadd.f32 %v6584_v58, %v8935_v11  ;;  %v5212_v22 = vadd.f32 %v6585_v17, %v8938_v41  ;;  %v6586_v49 = vld [vmem:[%s6678_s23 + $0x30] sm:$0xff]  ;;  %v6587_v41 = vld [vmem:[%s6678_s23 + $0x38] sm:$0xff] }
 0x2d7   : > { %v9063_v5 = vsel %vm3505_vm5, %v5164_v23, %v5166_v52  ;;  %v9066_v18 = vsel %vm3505_vm5, %v5166_v52, %v5168_v55  ;;  %v9071_v42 = vsel %vm3505_vm5, %v5168_v55, %v5170_v26  ;;  %v5213_v11 = vadd.f32 %v6586_v49, %v8941_v30  ;;  %v6591_v30 = vld [vmem:[%s6678_s23 + $0x58] sm:$0xff]  ;;  %v6602_v23 = vld [vmem:[%s6678_s23 + $0xb0] sm:$0xff] }
 0x2d8   : > { %v5214_v0 = vadd.f32 %v6587_v41, %v8944_v50  ;;  %v5215_v6 = vadd.f32 %v6588_v24, %v8947_v4  ;;  %v5216_v44 = vadd.f32 %v6589_v61, %v8950_v40  ;;  %v5217_v56 = vadd.f32 %v6590_v34, %v8953_v20  ;;  %5247 = vst.msk [vmem:[%s9045_s11 - $0x3] sm:$0xf8] %vm5246_vm7, %v5209_v28  ;;  %v6592_v4 = vld [vmem:[%s6678_s23 + $0x60] sm:$0xff]  ;;  %v6593_v20 = vld [vmem:[%s6678_s23 + $0x68] sm:$0xff]  ;;  %v6606_v28 = vld [vmem:[%s6678_s23 + $0xd0] sm:$0xff] }
 0x2d9   : > { %5248 = vst.msk [vmem:[%s9045_s11 + $0x5] sm:$0xff] %vm171_vm1, %v5210_v19  ;;  %5249 = vst.msk [vmem:[%s9045_s11 + $0xd] sm:$0xff] %vm171_vm1, %v5211_v38  ;;  %v5218_v50 = vadd.f32 %v6591_v30, %v8956_v51  ;;  %v5219_v40 = vadd.f32 %v6592_v4, %v8959_v8  ;;  %v5220_v12 = vadd.f32 %v6593_v20, %v8962_v62  ;;  %v6598_v62 = vld [vmem:[%s6678_s23 + $0x90] sm:$0xff] }
 0x2da   : > { %5250 = vst.msk [vmem:[%s9045_s11 + $0x15] sm:$0xff] %vm171_vm1, %v5212_v22  ;;  %v5221_v1 = vadd.f32 %v6594_v37, %v8966_v36  ;;  %5251 = vst.msk [vmem:[%s9045_s11 + $0x1d] sm:$0xff] %vm171_vm1, %v5213_v11  ;;  %v5222_v51 = vadd.f32 %v6595_v9, %v8969_v63  ;;  %v5223_v8 = vadd.f32 %v6596_v16, %v8972_v46  ;;  %v6599_v63 = vld [vmem:[%s6678_s23 + $0x98] sm:$0xff]  ;;  %v6610_v38 = vld [vmem:[%s6678_s23 + $0xf0] sm:$0xff] }
 0x2db   : > { %v5224_v10 = vadd.f32 %v6597_v21, %v8975_v35  ;;  %v5225_v36 = vadd.f32 %v6598_v62, %v8978_v3  ;;  %5252 = vst.msk [vmem:[%s9045_s11 + $0x25] sm:$0xff] %vm171_vm1, %v5214_v0  ;;  %5253 = vst.msk [vmem:[%s9045_s11 + $0x2d] sm:$0xff] %vm171_vm1, %v5215_v6  ;;  %v5226_v46 = vadd.f32 %v6599_v63, %v8988_v53  ;;  %v6600_v35 = vld [vmem:[%s6678_s23 + $0xa0] sm:$0xff]  ;;  %v6601_v3 = vld [vmem:[%s6678_s23 + $0xa8] sm:$0xff] }
 0x2dc   : > { %5254 = vst.msk [vmem:[%s9045_s11 + $0x35] sm:$0xff] %vm171_vm1, %v5216_v44  ;;  %5255 = vst.msk [vmem:[%s9045_s11 + $0x3d] sm:$0xff] %vm171_vm1, %v5217_v56  ;;  %v5227_v39 = vadd.f32 %v6600_v35, %v8991_v59  ;;  %v5228_v31 = vadd.f32 %v6601_v3, %v8994_v25  ;;  %v5229_v52 = vadd.f32 %v6602_v23, %v8998_v7  ;;  %v6603_v53 = vld [vmem:[%s6678_s23 + $0xb8] sm:$0xff]  ;;  %v6604_v25 = vld [vmem:[%s6678_s23 + $0xc0] sm:$0xff] }
 0x2dd   : > { %5256 = vst.msk [vmem:[%s9045_s11 + $0x45] sm:$0xff] %vm171_vm1, %v5218_v50  ;;  %5257 = vst.msk [vmem:[%s9045_s11 + $0x4d] sm:$0xff] %vm171_vm1, %v5219_v40  ;;  %v5230_v59 = vadd.f32 %v6603_v53, %v9001_v57  ;;  %v5231_v55 = vadd.f32 %v6604_v25, %v9004_v15  ;;  %v6605_v7 = vld [vmem:[%s6678_s23 + $0xc8] sm:$0xff]  ;;  %v5233_v48 = vadd.f32 %v6606_v28, %v9011_v54  ;;  %v6607_v57 = vld [vmem:[%s6678_s23 + $0xd8] sm:$0xff] }
 0x2de   : > { %5258 = vst.msk [vmem:[%s9045_s11 + $0x55] sm:$0xff] %vm171_vm1, %v5220_v12  ;;  %5259 = vst.msk [vmem:[%s9045_s11 + $0x5d] sm:$0xff] %vm171_vm1, %v5221_v1  ;;  %v5232_v29 = vadd.f32 %v6605_v7, %v9007_v14  ;;  %v5234_v15 = vadd.f32 %v6607_v57, %v9021_v33  ;;  %v6608_v14 = vld [vmem:[%s6678_s23 + $0xe0] sm:$0xff]  ;;  %v6609_v54 = vld [vmem:[%s6678_s23 + $0xe8] sm:$0xff]  ;;  %v5237_v17 = vadd.f32 %v6610_v38, %v9031_v32 }
 0x2df   : > { %5260 = vst.msk [vmem:[%s9045_s11 + $0x65] sm:$0xff] %vm171_vm1, %v5222_v51  ;;  %5261 = vst.msk [vmem:[%s9045_s11 + $0x6d] sm:$0xff] %vm171_vm1, %v5223_v8  ;;  %v5235_v19 = vadd.f32 %v6608_v14, %v9024_v45  ;;  %v5236_v58 = vadd.f32 %v6609_v54, %v9027_v27  ;;  %v6611_v33 = vld [vmem:[%s6678_s23 + $0xf8] sm:$0xff]  ;;  %v6612_v27 = vld [vmem:[%s6678_s23 + $0x100] sm:$0xff] }
 0x2e0   : > { %5262 = vst.msk [vmem:[%s9045_s11 + $0x75] sm:$0xff] %vm171_vm1, %v5224_v10  ;;  %5263 = vst.msk [vmem:[%s9045_s11 + $0x7d] sm:$0xff] %vm171_vm1, %v5225_v36  ;;  %v5238_v45 = vadd.f32 %v6611_v33, %v9034_v43  ;;  %v5239_v22 = vadd.f32 %v6612_v27, %v9037_v60  ;;  %v6613_v32 = vld [vmem:[%s6678_s23 + $0x108] sm:$0xff]  ;;  %v6614_v11 = vld [vmem:[%s6678_s23 + $0x110] sm:$0xff] }
 0x2e1   : > { %5264 = vst.msk [vmem:[%s9045_s11 + $0x85] sm:$0xff] %vm171_vm1, %v5226_v46  ;;  %5265 = vst.msk [vmem:[%s9045_s11 + $0x8d] sm:$0xff] %vm171_vm1, %v5227_v39  ;;  %v5240_v49 = vadd.f32 %v6613_v32, %v9040_v2  ;;  %v5241_v41 = vadd.f32 %v6614_v11, %v9048_v13  ;;  %v6615_v43 = vld [vmem:[%s6678_s23 + $0x118] sm:$0xff]  ;;  %v6616_v2 = vld [vmem:[%s6678_s23 + $0x120] sm:$0xff] }
 0x2e2   : > { %5266 = vst.msk [vmem:[%s9045_s11 + $0x95] sm:$0xff] %vm171_vm1, %v5228_v31  ;;  %5267 = vst.msk [vmem:[%s9045_s11 + $0x9d] sm:$0xff] %vm171_vm1, %v5229_v52  ;;  %v5242_v60 = vadd.f32 %v6615_v43, %v9063_v5  ;;  %v5243_v13 = vadd.f32 %v6616_v2, %v9066_v18  ;;  %v6617_v0 = vld [vmem:[%s6678_s23 + $0x128] sm:$0xff]  ;;  %v6618_v6 = vld [vmem:[%s6678_s23 + $0x130] sm:$0xff] }
 0x2e3   : > { %5268 = vst.msk [vmem:[%s9045_s11 + $0xa5] sm:$0xff] %vm171_vm1, %v5230_v59  ;;  %5269 = vst.msk [vmem:[%s9045_s11 + $0xad] sm:$0xff] %vm171_vm1, %v5231_v55  ;;  %v5244_v24 = vadd.f32 %v6617_v0, %v9071_v42  ;;  %v5245_v61 = vadd.f32 %v6618_v6, %v5170_v26 }
 0x2e4   : > { %5270 = vst.msk [vmem:[%s9045_s11 + $0xb5] sm:$0xff] %vm171_vm1, %v5232_v29  ;;  %5271 = vst.msk [vmem:[%s9045_s11 + $0xbd] sm:$0xff] %vm171_vm1, %v5233_v48 }
 0x2e5   : > { %5272 = vst.msk [vmem:[%s9045_s11 + $0xc5] sm:$0xff] %vm171_vm1, %v5234_v15  ;;  %5273 = vst.msk [vmem:[%s9045_s11 + $0xcd] sm:$0xff] %vm171_vm1, %v5235_v19 }
 0x2e6   : > { %5274 = vst.msk [vmem:[%s9045_s11 + $0xd5] sm:$0xff] %vm171_vm1, %v5236_v58  ;;  %5275 = vst.msk [vmem:[%s9045_s11 + $0xdd] sm:$0xff] %vm171_vm1, %v5237_v17 }
 0x2e7   : > { %5276 = vst.msk [vmem:[%s9045_s11 + $0xe5] sm:$0xff] %vm171_vm1, %v5238_v45  ;;  %5277 = vst.msk [vmem:[%s9045_s11 + $0xed] sm:$0xff] %vm171_vm1, %v5239_v22 }
 0x2e8   : > { %5278 = vst.msk [vmem:[%s9045_s11 + $0xf5] sm:$0xff] %vm171_vm1, %v5240_v49  ;;  %5279 = vst.msk [vmem:[%s9045_s11 + $0xfd] sm:$0xff] %vm171_vm1, %v5241_v41 }
 0x2e9   : > { %5280 = vst.msk [vmem:[%s9045_s11 + $0x105] sm:$0xff] %vm171_vm1, %v5242_v60  ;;  %5281 = vst.msk [vmem:[%s9045_s11 + $0x10d] sm:$0xff] %vm171_vm1, %v5243_v13 }
 0x2ea   : > { %5282 = vst.msk [vmem:[%s9045_s11 + $0x115] sm:$0xff] %vm171_vm1, %v5244_v24 }
 0x2eb   : > { %5284 = vst.msk [vmem:[%s9045_s11 + $0x11d] sm:$0x7] %vm5283_vm8, %v5245_v61 }
 0x2ec PF: > { %s13_s12 = sadd.s32 1, %s6625_s12  }
 0x2ed   : > { %p10_p4 = scmp.ge.s32.totalorder %s13_s12, 4  }
 0x2ef   :  { %12 = sbr.rel (!%p10_p4) target bundleno = 1 (0x1), region = 70 }

</bundles_post_ra>
